<compile_context>
chip_gen: v5e
topology: v5e:2x2
jax: 0.10.0
libtpu: 0.0.40
codegen_flags: <defaults>
</compile_context>

<pallas_src>
import functools

import jax
import jax.numpy as jnp
from jax.experimental import pallas as pl
from jax.experimental.pallas import tpu as pltpu

PAD = 128     # lane padding for every feature / hidden dim
B_PAD = 8     # sublane padding for the batch dim (f32)

_GATE_PERM = jnp.array([0, 1, 3, 2])   # torch (i, f, g, o) -> kernel (i, f, o, g)


# ----------------------------------------------------------------------------
# Fused Pallas kernel: daily LSTM + quarterly LSTM + 4-layer MLP head.
# ----------------------------------------------------------------------------
def fused_forward_kernel(
        xd_ref, xq_ref, cat_ref,
        d_wih_ref, d_whh_ref, d_b_ref,
        q_wih_ref, q_whh_ref, q_b_ref,
        w1c_ref, w1d_ref, w1q_ref, b1_ref,
        w2_ref, b2_ref, w3_ref, b3_ref, w4_ref, b4_ref,
        o_ref):
    """Fused StockClassifier forward.

    xd_ref / xq_ref : [T, B_PAD, PAD]  time-major, zero-padded sequences.
    *_wih / *_whh   : [PAD, 4*PAD]     gate blocks in (i, f, o, g) order,
                                       each gate padded to its own 128 lanes.
    cat_ref         : [B_PAD, PAD]     [embeddings | float categoricals] slab.
    w1{c,d,q}       : [PAD, PAD]       fc1 split by input-row group.
    o_ref           : [B_PAD, PAD]     lane-dense padded logits (col 0..out-1 valid).
    """

    def lstm_last(x_tbd, wih, whh, b):
        T, B, D = x_tbd.shape
        G = 4 * D
        # Hoisted input projection: one batched matmul over all timesteps.
        gates_x = (jnp.dot(x_tbd.reshape(T * B, D), wih,
                           preferred_element_type=jnp.float32) + b
                   ).reshape(T, B, G)
        h = jnp.zeros((B, D), jnp.float32)
        c = jnp.zeros((B, D), jnp.float32)
        for t in range(T):                       # static unroll (T small, fixed)
            gates = gates_x[t] + jnp.dot(h, whh,
                                         preferred_element_type=jnp.float32)
            sig = jax.nn.sigmoid(gates[:, :3 * D])   # one EUP slab: i, f, o
            g_g = jnp.tanh(gates[:, 3 * D:])
            i_g = sig[:, 0 * D:1 * D]
            f_g = sig[:, 1 * D:2 * D]
            o_g = sig[:, 2 * D:3 * D]
            c = f_g * c + i_g * g_g
            h = o_g * jnp.tanh(c)
        return h

    # TODO(synk): on v7x the two independent recurrences could run one-per-
    # TensorCore (size-2 "parallel" grid / core_map); kept serial here.
    h_d = lstm_last(xd_ref[...], d_wih_ref[...], d_whh_ref[...], d_b_ref[...])
    h_q = lstm_last(xq_ref[...], q_wih_ref[...], q_whh_ref[...], q_b_ref[...])

    # fc1 on the concatenation [cat_slab | h_daily | h_quarterly], expressed as
    # a sum of three matmuls (no in-kernel concat / lane shuffles).
    y = (jnp.dot(cat_ref[...], w1c_ref[...], preferred_element_type=jnp.float32)
         + jnp.dot(h_d, w1d_ref[...], preferred_element_type=jnp.float32)
         + jnp.dot(h_q, w1q_ref[...], preferred_element_type=jnp.float32)
         + b1_ref[...])
    y = jnp.maximum(y, 0.0)
    y = jnp.dot(y, w2_ref[...], preferred_element_type=jnp.float32) + b2_ref[...]
    y = jnp.maximum(y, 0.0)           # fcd dropout (p=0.1) is identity in eval
    y = jnp.dot(y, w3_ref[...], preferred_element_type=jnp.float32) + b3_ref[...]
    y = jnp.maximum(y, 0.0)
    y = jnp.dot(y, w4_ref[...], preferred_element_type=jnp.float32) + b4_ref[...]
    o_ref[...] = y


def fused_forward(xd_p, xq_p, cat_p, kp):
    operands = (xd_p, xq_p, cat_p,
                kp["d_wih"], kp["d_whh"], kp["d_b"],
                kp["q_wih"], kp["q_whh"], kp["q_b"],
                kp["w1c"], kp["w1d"], kp["w1q"], kp["b1"],
                kp["w2"], kp["b2"], kp["w3"], kp["b3"], kp["w4"], kp["b4"])
    vmem_spec = pl.BlockSpec(memory_space=pltpu.MemorySpace.VMEM)
    return pl.pallas_call(
        fused_forward_kernel,
        out_shape=jax.ShapeDtypeStruct((B_PAD, PAD), jnp.float32),
        in_specs=[vmem_spec] * len(operands),
        out_specs=vmem_spec,
        compiler_params=pltpu.CompilerParams(vmem_limit_bytes=32 * 1024 * 1024),
    )(*operands)


# ----------------------------------------------------------------------------
# Padding / layout helpers (run once per call for activations, once at build
# time for weights).
# ----------------------------------------------------------------------------
def _pad_to(x, shape):
    return jnp.pad(x, [(0, s - d) for s, d in zip(shape, x.shape)])


def _pad_seq(x):
    """[B, T, D] batch-first -> [T, B_PAD, PAD] time-major, zero padded."""
    x = jnp.swapaxes(x, 0, 1).astype(jnp.float32)
    return _pad_to(x, (x.shape[0], B_PAD, PAD))


def _convert_lstm(w_ih, w_hh, b_ih, b_hh):
    """torch LSTM params -> transposed, gate-reordered, 128-lane-padded layout."""
    H = w_hh.shape[1]                       # hidden size (== input size here)

    def reorder(w):                         # [4H, X] gate-block permutation
        return w.reshape(4, H, -1)[_GATE_PERM].reshape(4 * H, -1)

    def pack_weight(w_t):                   # [in, 4H] -> [PAD, 4*PAD]
        out = jnp.zeros((PAD, 4 * PAD), jnp.float32)
        for g in range(4):
            out = out.at[:w_t.shape[0], g * PAD:g * PAD + H].set(
                w_t[:, g * H:(g + 1) * H])
        return out

    w_ih_t = reorder(w_ih).T                # [in, 4H]
    w_hh_t = reorder(w_hh).T                # [H, 4H]
    b = reorder((b_ih + b_hh)[:, None])[:, 0]   # combined, reordered bias [4H]
    b_p = jnp.zeros((1, 4 * PAD), jnp.float32)
    for g in range(4):
        b_p = b_p.at[0, g * PAD:g * PAD + H].set(b[g * H:(g + 1) * H])
    return pack_weight(w_ih_t), pack_weight(w_hh_t), b_p


def build_kernel_params(tp, *, n_emb, emb_hidden, categorical_features,
                        daily_features, quarterly_features):
    """Convert torch-layout params to padded kernel layout (done once)."""
    kp = {"emb": tp["emb"]}
    kp["d_wih"], kp["d_whh"], kp["d_b"] = _convert_lstm(
        tp["d_w_ih"], tp["d_w_hh"], tp["d_b_ih"], tp["d_b_hh"])
    kp["q_wih"], kp["q_whh"], kp["q_b"] = _convert_lstm(
        tp["q_w_ih"], tp["q_w_hh"], tp["q_b_ih"], tp["q_b_hh"])

    cat_width = n_emb * emb_hidden + categorical_features - n_emb
    w1_t = tp["fc1_w"].T                    # [linear_input_size, hidden_dim]
    kp["w1c"] = _pad_to(w1_t[:cat_width], (PAD, PAD))
    kp["w1d"] = _pad_to(w1_t[cat_width:cat_width + daily_features], (PAD, PAD))
    kp["w1q"] = _pad_to(w1_t[cat_width + daily_features:], (PAD, PAD))
    kp["b1"] = _pad_to(tp["fc1_b"][None, :], (1, PAD))
    kp["w2"] = _pad_to(tp["fc2_w"].T, (PAD, PAD))
    kp["b2"] = _pad_to(tp["fc2_b"][None, :], (1, PAD))
    kp["w3"] = _pad_to(tp["fc3_w"].T, (PAD, PAD))
    kp["b3"] = _pad_to(tp["fc3_b"][None, :], (1, PAD))
    kp["w4"] = _pad_to(tp["fc4_w"].T, (PAD, PAD))
    kp["b4"] = _pad_to(tp["fc4_b"][None, :], (1, PAD))
    return kp


# ----------------------------------------------------------------------------
# StockClassifier forward (plain-JAX embedding glue + one fused Pallas call).
# ----------------------------------------------------------------------------
@functools.partial(jax.jit, static_argnames=("n_emb", "output_dim"))
def stock_classifier_forward(x_cat_ids, x_cat_float, x_daily, x_quarterly,
                             kparams, *, n_emb, output_dim):
    """x_cat_ids: [B, n_emb] int32 ids; x_cat_float: [B, C - n_emb] floats."""
    B = x_daily.shape[0]
    # Categorical embeddings (tiny gathers, plain-JAX glue; padding_idx=0 row
    # of each table is zero, matching nn.Embedding(padding_idx=0)).
    embs = [jnp.take(kparams["emb"][i], x_cat_ids[:, i], axis=0)
            for i in range(n_emb)]
    cat_slab = jnp.concatenate(embs + [x_cat_float], axis=1)
    cat_p = _pad_to(cat_slab.astype(jnp.float32), (B_PAD, PAD))
    xd_p = _pad_seq(x_daily)
    xq_p = _pad_seq(x_quarterly)
    y_pad = fused_forward(xd_p, xq_p, cat_p, kparams)   # [B_PAD, PAD]
    # torch returns y[:, -1]  ->  last valid output column of the padded block.
    return y_pad[:B, output_dim - 1]


# ----------------------------------------------------------------------------
# Deterministic synthetic parameters (torch nn.Module layout) + pure-JAX ref.
# ----------------------------------------------------------------------------
def make_params(key, *, categorical_features, emb_dims, emb_hidden,
                daily_features, quarterly_features, hidden_dim, output_dim):
    keys = iter(jax.random.split(key, 64))

    def init(shape, scale=0.1):
        return (scale * jax.random.normal(next(keys), shape)).astype(jnp.float32)

    n_emb = sum(1 for e in emb_dims if e != 0)
    tp = {}
    for name, D in (("d", daily_features), ("q", quarterly_features)):
        tp[f"{name}_w_ih"] = init((4 * D, D))      # torch weight_ih_l0
        tp[f"{name}_w_hh"] = init((4 * D, D))      # torch weight_hh_l0
        tp[f"{name}_b_ih"] = init((4 * D,))
        tp[f"{name}_b_hh"] = init((4 * D,))
    emb_tables = []
    for e in emb_dims:
        if e == 0:
            continue
        tbl = init((e, emb_hidden), scale=0.5)
        emb_tables.append(tbl.at[0].set(0.0))      # padding_idx=0 -> zero row
    tp["emb"] = emb_tables

    lin_in = (n_emb * emb_hidden + categorical_features - n_emb
              + daily_features + quarterly_features)
    h2 = hidden_dim // 2
    for name, (o, i) in (("fc1", (hidden_dim, lin_in)),
                         ("fc2", (h2, hidden_dim)),
                         ("fc3", (h2, h2)),
                         ("fc4", (output_dim, h2))):
        tp[f"{name}_w"] = init((o, i))             # torch Linear.weight [out, in]
        tp[f"{name}_b"] = init((o,))
    return tp, n_emb


def reference_forward(x_cat_ids, x_cat_float, x_daily, x_quarterly, tp,
                      n_emb, output_dim):
    """Pure-JAX reference with torch semantics (for correctness checking)."""
    hp = jax.lax.Precision.HIGHEST

    def lstm_last_ref(x, w_ih, w_hh, b_ih, b_hh):
        B, T, _ = x.shape
        H = w_hh.shape[1]
        h = jnp.zeros((B, H), jnp.float32)
        c = jnp.zeros((B, H), jnp.float32)
        for t in range(T):
            gates = (jnp.dot(x[:, t, :], w_ih.T, precision=hp)
                     + jnp.dot(h, w_hh.T, precision=hp) + b_ih + b_hh)
            i = jax.nn.sigmoid(gates[:, 0 * H:1 * H])
            f = jax.nn.sigmoid(gates[:, 1 * H:2 * H])
            g = jnp.tanh(gates[:, 2 * H:3 * H])
            o = jax.nn.sigmoid(gates[:, 3 * H:4 * H])
            c = f * c + i * g
            h = o * jnp.tanh(c)
        return h

    h_d = lstm_last_ref(x_daily, tp["d_w_ih"], tp["d_w_hh"],
                        tp["d_b_ih"], tp["d_b_hh"])
    h_q = lstm_last_ref(x_quarterly, tp["q_w_ih"], tp["q_w_hh"],
                        tp["q_b_ih"], tp["q_b_hh"])
    embs = [jnp.take(tp["emb"][i], x_cat_ids[:, i], axis=0)
            for i in range(n_emb)]
    lstm_out = jnp.concatenate(embs + [x_cat_float, h_d, h_q], axis=1)
    y = jnp.dot(lstm_out, tp["fc1_w"].T, precision=hp) + tp["fc1_b"]
    y = jnp.dot(jax.nn.relu(y), tp["fc2_w"].T, precision=hp) + tp["fc2_b"]
    y = jax.nn.relu(y)                               # dropout: identity in eval
    y = jnp.dot(y, tp["fc3_w"].T, precision=hp) + tp["fc3_b"]
    y = jnp.dot(jax.nn.relu(y), tp["fc4_w"].T, precision=hp) + tp["fc4_b"]
    return y[:, -1]


if __name__ == "__main__":
    # Small synthetic configuration (matches the module's constructor shapes).
    B = 2
    categorical_features = 4
    emb_dims = [5, 7, 0, 0]            # -> 2 embedding tables
    emb_hidden = 10
    daily_features = 8
    quarterly_features = 4
    hidden_dim = 32
    output_dim = 1
    T_daily, T_quarterly = 8, 4

    key = jax.random.PRNGKey(0)
    k_par, k_ids, k_flt, k_d, k_q = jax.random.split(key, 5)

    torch_params, n_emb = make_params(
        k_par,
        categorical_features=categorical_features,
        emb_dims=emb_dims,
        emb_hidden=emb_hidden,
        daily_features=daily_features,
        quarterly_features=quarterly_features,
        hidden_dim=hidden_dim,
        output_dim=output_dim,
    )
    kernel_params = build_kernel_params(
        torch_params,
        n_emb=n_emb,
        emb_hidden=emb_hidden,
        categorical_features=categorical_features,
        daily_features=daily_features,
        quarterly_features=quarterly_features,
    )

    # Inputs: integer categorical ids (no float round-trip), float categoricals,
    # dense full-length batch_first sequences.
    # TODO(synk): PackedSequence / pad_packed_sequence handling is dataloader
    # glue; sequences here are dense and full length.
    x_cat_ids = jax.random.randint(k_ids, (B, n_emb), 1, 5).astype(jnp.int32)
    x_cat_float = jax.random.normal(
        k_flt, (B, categorical_features - n_emb), dtype=jnp.float32)
    x_daily = jax.random.normal(k_d, (B, T_daily, daily_features),
                                dtype=jnp.float32)
    x_quarterly = jax.random.normal(k_q, (B, T_quarterly, quarterly_features),
                                    dtype=jnp.float32)

    out = stock_classifier_forward(
        x_cat_ids, x_cat_float, x_daily, x_quarterly, kernel_params,
        n_emb=n_emb, output_dim=output_dim)
    out = jax.block_until_ready(out)
    assert out.shape == (B,)

    ref = reference_forward(x_cat_ids, x_cat_float, x_daily, x_quarterly,
                            torch_params, n_emb, output_dim)
    max_err = float(jnp.max(jnp.abs(out - ref)))
    assert max_err < 5e-3, f"kernel/reference mismatch: {max_err}"
    print("KERNEL_OK")
</pallas_src>

<mosaic_0001>
module attributes {stable_mosaic.version = 11 : i64} {
  func.func @fused_forward_kernel(%arg0: memref<8x8x128xf32, #tpu.memory_space<vmem>>, %arg1: memref<4x8x128xf32, #tpu.memory_space<vmem>>, %arg2: memref<8x128xf32, #tpu.memory_space<vmem>>, %arg3: memref<128x512xf32, #tpu.memory_space<vmem>>, %arg4: memref<128x512xf32, #tpu.memory_space<vmem>>, %arg5: memref<1x512xf32, #tpu.memory_space<vmem>>, %arg6: memref<128x512xf32, #tpu.memory_space<vmem>>, %arg7: memref<128x512xf32, #tpu.memory_space<vmem>>, %arg8: memref<1x512xf32, #tpu.memory_space<vmem>>, %arg9: memref<128x128xf32, #tpu.memory_space<vmem>>, %arg10: memref<128x128xf32, #tpu.memory_space<vmem>>, %arg11: memref<128x128xf32, #tpu.memory_space<vmem>>, %arg12: memref<1x128xf32, #tpu.memory_space<vmem>>, %arg13: memref<128x128xf32, #tpu.memory_space<vmem>>, %arg14: memref<1x128xf32, #tpu.memory_space<vmem>>, %arg15: memref<128x128xf32, #tpu.memory_space<vmem>>, %arg16: memref<1x128xf32, #tpu.memory_space<vmem>>, %arg17: memref<128x128xf32, #tpu.memory_space<vmem>>, %arg18: memref<1x128xf32, #tpu.memory_space<vmem>>, %arg19: memref<8x128xf32, #tpu.memory_space<vmem>>) attributes {dimension_semantics = [], scalar_prefetch = 0 : i64, scratch_operands = 0 : i64, tpu.core_type = #tpu.core_type<tc>} {
    %c0 = arith.constant 0 : index
    %c0_0 = arith.constant 0 : index
    %c0_1 = arith.constant 0 : index
    %0 = vector.load %arg0[%c0, %c0_0, %c0_1] : memref<8x8x128xf32, #tpu.memory_space<vmem>>, vector<8x8x128xf32>
    %c0_2 = arith.constant 0 : index
    %c0_3 = arith.constant 0 : index
    %1 = vector.load %arg3[%c0_2, %c0_3] : memref<128x512xf32, #tpu.memory_space<vmem>>, vector<128x512xf32>
    %c0_4 = arith.constant 0 : index
    %c0_5 = arith.constant 0 : index
    %2 = vector.load %arg4[%c0_4, %c0_5] : memref<128x512xf32, #tpu.memory_space<vmem>>, vector<128x512xf32>
    %c0_6 = arith.constant 0 : index
    %c0_7 = arith.constant 0 : index
    %3 = vector.load %arg5[%c0_6, %c0_7] : memref<1x512xf32, #tpu.memory_space<vmem>>, vector<1x512xf32>
    %4 = vector.shape_cast %0 : vector<8x8x128xf32> to vector<64x128xf32>
    %cst = arith.constant dense<0.000000e+00> : vector<64x512xf32>
    %5 = tpu.matmul %4, %1, %cst {dimension_numbers = #tpu.dot_dimension_numbers<[1], [0], [0], [1], [0, 0, 1, 1], [], []>} : vector<64x128xf32>, vector<128x512xf32>, vector<64x512xf32> -> vector<64x512xf32>
    %6 = vector.broadcast %3 : vector<1x512xf32> to vector<64x512xf32>
    %7 = arith.addf %5, %6 : vector<64x512xf32>
    %8 = vector.shape_cast %7 : vector<64x512xf32> to vector<8x8x512xf32>
    %cst_8 = arith.constant 0.000000e+00 : f32
    %9 = vector.broadcast %cst_8 : f32 to vector<8x128xf32>
    %cst_9 = arith.constant 0.000000e+00 : f32
    %10 = vector.broadcast %cst_9 : f32 to vector<8x128xf32>
    %11 = vector.extract_strided_slice %8 {offsets = [0, 0, 0], sizes = [1, 8, 512], strides = [1, 1, 1]} : vector<8x8x512xf32> to vector<1x8x512xf32>
    %12 = vector.shape_cast %11 : vector<1x8x512xf32> to vector<8x512xf32>
    %cst_10 = arith.constant dense<0.000000e+00> : vector<8x512xf32>
    %13 = tpu.matmul %9, %2, %cst_10 {dimension_numbers = #tpu.dot_dimension_numbers<[1], [0], [0], [1], [0, 0, 1, 1], [], []>} : vector<8x128xf32>, vector<128x512xf32>, vector<8x512xf32> -> vector<8x512xf32>
    %14 = arith.addf %12, %13 : vector<8x512xf32>
    %15 = vector.extract_strided_slice %14 {offsets = [0, 0], sizes = [8, 384], strides = [1, 1]} : vector<8x512xf32> to vector<8x384xf32>
    %16 = arith.negf %15 : vector<8x384xf32>
    %17 = math.exp %16 : vector<8x384xf32>
    %cst_11 = arith.constant 1.000000e+00 : f32
    %18 = vector.broadcast %cst_11 : f32 to vector<8x384xf32>
    %19 = arith.addf %18, %17 : vector<8x384xf32>
    %20 = arith.divf %18, %19 : vector<8x384xf32>
    %21 = vector.extract_strided_slice %14 {offsets = [0, 384], sizes = [8, 128], strides = [1, 1]} : vector<8x512xf32> to vector<8x128xf32>
    %22 = math.tanh %21 : vector<8x128xf32>
    %23 = vector.extract_strided_slice %20 {offsets = [0, 0], sizes = [8, 128], strides = [1, 1]} : vector<8x384xf32> to vector<8x128xf32>
    %24 = vector.extract_strided_slice %20 {offsets = [0, 128], sizes = [8, 128], strides = [1, 1]} : vector<8x384xf32> to vector<8x128xf32>
    %25 = vector.extract_strided_slice %20 {offsets = [0, 256], sizes = [8, 128], strides = [1, 1]} : vector<8x384xf32> to vector<8x128xf32>
    %26 = arith.mulf %24, %10 : vector<8x128xf32>
    %27 = arith.mulf %23, %22 : vector<8x128xf32>
    %28 = arith.addf %26, %27 : vector<8x128xf32>
    %29 = math.tanh %28 : vector<8x128xf32>
    %30 = arith.mulf %25, %29 : vector<8x128xf32>
    %31 = vector.extract_strided_slice %8 {offsets = [1, 0, 0], sizes = [1, 8, 512], strides = [1, 1, 1]} : vector<8x8x512xf32> to vector<1x8x512xf32>
    %32 = vector.shape_cast %31 : vector<1x8x512xf32> to vector<8x512xf32>
    %cst_12 = arith.constant dense<0.000000e+00> : vector<8x512xf32>
    %33 = tpu.matmul %30, %2, %cst_12 {dimension_numbers = #tpu.dot_dimension_numbers<[1], [0], [0], [1], [0, 0, 1, 1], [], []>} : vector<8x128xf32>, vector<128x512xf32>, vector<8x512xf32> -> vector<8x512xf32>
    %34 = arith.addf %32, %33 : vector<8x512xf32>
    %35 = vector.extract_strided_slice %34 {offsets = [0, 0], sizes = [8, 384], strides = [1, 1]} : vector<8x512xf32> to vector<8x384xf32>
    %36 = arith.negf %35 : vector<8x384xf32>
    %37 = math.exp %36 : vector<8x384xf32>
    %cst_13 = arith.constant 1.000000e+00 : f32
    %38 = vector.broadcast %cst_13 : f32 to vector<8x384xf32>
    %39 = arith.addf %38, %37 : vector<8x384xf32>
    %40 = arith.divf %38, %39 : vector<8x384xf32>
    %41 = vector.extract_strided_slice %34 {offsets = [0, 384], sizes = [8, 128], strides = [1, 1]} : vector<8x512xf32> to vector<8x128xf32>
    %42 = math.tanh %41 : vector<8x128xf32>
    %43 = vector.extract_strided_slice %40 {offsets = [0, 0], sizes = [8, 128], strides = [1, 1]} : vector<8x384xf32> to vector<8x128xf32>
    %44 = vector.extract_strided_slice %40 {offsets = [0, 128], sizes = [8, 128], strides = [1, 1]} : vector<8x384xf32> to vector<8x128xf32>
    %45 = vector.extract_strided_slice %40 {offsets = [0, 256], sizes = [8, 128], strides = [1, 1]} : vector<8x384xf32> to vector<8x128xf32>
    %46 = arith.mulf %44, %28 : vector<8x128xf32>
    %47 = arith.mulf %43, %42 : vector<8x128xf32>
    %48 = arith.addf %46, %47 : vector<8x128xf32>
    %49 = math.tanh %48 : vector<8x128xf32>
    %50 = arith.mulf %45, %49 : vector<8x128xf32>
    %51 = vector.extract_strided_slice %8 {offsets = [2, 0, 0], sizes = [1, 8, 512], strides = [1, 1, 1]} : vector<8x8x512xf32> to vector<1x8x512xf32>
    %52 = vector.shape_cast %51 : vector<1x8x512xf32> to vector<8x512xf32>
    %cst_14 = arith.constant dense<0.000000e+00> : vector<8x512xf32>
    %53 = tpu.matmul %50, %2, %cst_14 {dimension_numbers = #tpu.dot_dimension_numbers<[1], [0], [0], [1], [0, 0, 1, 1], [], []>} : vector<8x128xf32>, vector<128x512xf32>, vector<8x512xf32> -> vector<8x512xf32>
    %54 = arith.addf %52, %53 : vector<8x512xf32>
    %55 = vector.extract_strided_slice %54 {offsets = [0, 0], sizes = [8, 384], strides = [1, 1]} : vector<8x512xf32> to vector<8x384xf32>
    %56 = arith.negf %55 : vector<8x384xf32>
    %57 = math.exp %56 : vector<8x384xf32>
    %cst_15 = arith.constant 1.000000e+00 : f32
    %58 = vector.broadcast %cst_15 : f32 to vector<8x384xf32>
    %59 = arith.addf %58, %57 : vector<8x384xf32>
    %60 = arith.divf %58, %59 : vector<8x384xf32>
    %61 = vector.extract_strided_slice %54 {offsets = [0, 384], sizes = [8, 128], strides = [1, 1]} : vector<8x512xf32> to vector<8x128xf32>
    %62 = math.tanh %61 : vector<8x128xf32>
    %63 = vector.extract_strided_slice %60 {offsets = [0, 0], sizes = [8, 128], strides = [1, 1]} : vector<8x384xf32> to vector<8x128xf32>
    %64 = vector.extract_strided_slice %60 {offsets = [0, 128], sizes = [8, 128], strides = [1, 1]} : vector<8x384xf32> to vector<8x128xf32>
    %65 = vector.extract_strided_slice %60 {offsets = [0, 256], sizes = [8, 128], strides = [1, 1]} : vector<8x384xf32> to vector<8x128xf32>
    %66 = arith.mulf %64, %48 : vector<8x128xf32>
    %67 = arith.mulf %63, %62 : vector<8x128xf32>
    %68 = arith.addf %66, %67 : vector<8x128xf32>
    %69 = math.tanh %68 : vector<8x128xf32>
    %70 = arith.mulf %65, %69 : vector<8x128xf32>
    %71 = vector.extract_strided_slice %8 {offsets = [3, 0, 0], sizes = [1, 8, 512], strides = [1, 1, 1]} : vector<8x8x512xf32> to vector<1x8x512xf32>
    %72 = vector.shape_cast %71 : vector<1x8x512xf32> to vector<8x512xf32>
    %cst_16 = arith.constant dense<0.000000e+00> : vector<8x512xf32>
    %73 = tpu.matmul %70, %2, %cst_16 {dimension_numbers = #tpu.dot_dimension_numbers<[1], [0], [0], [1], [0, 0, 1, 1], [], []>} : vector<8x128xf32>, vector<128x512xf32>, vector<8x512xf32> -> vector<8x512xf32>
    %74 = arith.addf %72, %73 : vector<8x512xf32>
    %75 = vector.extract_strided_slice %74 {offsets = [0, 0], sizes = [8, 384], strides = [1, 1]} : vector<8x512xf32> to vector<8x384xf32>
    %76 = arith.negf %75 : vector<8x384xf32>
    %77 = math.exp %76 : vector<8x384xf32>
    %cst_17 = arith.constant 1.000000e+00 : f32
    %78 = vector.broadcast %cst_17 : f32 to vector<8x384xf32>
    %79 = arith.addf %78, %77 : vector<8x384xf32>
    %80 = arith.divf %78, %79 : vector<8x384xf32>
    %81 = vector.extract_strided_slice %74 {offsets = [0, 384], sizes = [8, 128], strides = [1, 1]} : vector<8x512xf32> to vector<8x128xf32>
    %82 = math.tanh %81 : vector<8x128xf32>
    %83 = vector.extract_strided_slice %80 {offsets = [0, 0], sizes = [8, 128], strides = [1, 1]} : vector<8x384xf32> to vector<8x128xf32>
    %84 = vector.extract_strided_slice %80 {offsets = [0, 128], sizes = [8, 128], strides = [1, 1]} : vector<8x384xf32> to vector<8x128xf32>
    %85 = vector.extract_strided_slice %80 {offsets = [0, 256], sizes = [8, 128], strides = [1, 1]} : vector<8x384xf32> to vector<8x128xf32>
    %86 = arith.mulf %84, %68 : vector<8x128xf32>
    %87 = arith.mulf %83, %82 : vector<8x128xf32>
    %88 = arith.addf %86, %87 : vector<8x128xf32>
    %89 = math.tanh %88 : vector<8x128xf32>
    %90 = arith.mulf %85, %89 : vector<8x128xf32>
    %91 = vector.extract_strided_slice %8 {offsets = [4, 0, 0], sizes = [1, 8, 512], strides = [1, 1, 1]} : vector<8x8x512xf32> to vector<1x8x512xf32>
    %92 = vector.shape_cast %91 : vector<1x8x512xf32> to vector<8x512xf32>
    %cst_18 = arith.constant dense<0.000000e+00> : vector<8x512xf32>
    %93 = tpu.matmul %90, %2, %cst_18 {dimension_numbers = #tpu.dot_dimension_numbers<[1], [0], [0], [1], [0, 0, 1, 1], [], []>} : vector<8x128xf32>, vector<128x512xf32>, vector<8x512xf32> -> vector<8x512xf32>
    %94 = arith.addf %92, %93 : vector<8x512xf32>
    %95 = vector.extract_strided_slice %94 {offsets = [0, 0], sizes = [8, 384], strides = [1, 1]} : vector<8x512xf32> to vector<8x384xf32>
    %96 = arith.negf %95 : vector<8x384xf32>
    %97 = math.exp %96 : vector<8x384xf32>
    %cst_19 = arith.constant 1.000000e+00 : f32
    %98 = vector.broadcast %cst_19 : f32 to vector<8x384xf32>
    %99 = arith.addf %98, %97 : vector<8x384xf32>
    %100 = arith.divf %98, %99 : vector<8x384xf32>
    %101 = vector.extract_strided_slice %94 {offsets = [0, 384], sizes = [8, 128], strides = [1, 1]} : vector<8x512xf32> to vector<8x128xf32>
    %102 = math.tanh %101 : vector<8x128xf32>
    %103 = vector.extract_strided_slice %100 {offsets = [0, 0], sizes = [8, 128], strides = [1, 1]} : vector<8x384xf32> to vector<8x128xf32>
    %104 = vector.extract_strided_slice %100 {offsets = [0, 128], sizes = [8, 128], strides = [1, 1]} : vector<8x384xf32> to vector<8x128xf32>
    %105 = vector.extract_strided_slice %100 {offsets = [0, 256], sizes = [8, 128], strides = [1, 1]} : vector<8x384xf32> to vector<8x128xf32>
    %106 = arith.mulf %104, %88 : vector<8x128xf32>
    %107 = arith.mulf %103, %102 : vector<8x128xf32>
    %108 = arith.addf %106, %107 : vector<8x128xf32>
    %109 = math.tanh %108 : vector<8x128xf32>
    %110 = arith.mulf %105, %109 : vector<8x128xf32>
    %111 = vector.extract_strided_slice %8 {offsets = [5, 0, 0], sizes = [1, 8, 512], strides = [1, 1, 1]} : vector<8x8x512xf32> to vector<1x8x512xf32>
    %112 = vector.shape_cast %111 : vector<1x8x512xf32> to vector<8x512xf32>
    %cst_20 = arith.constant dense<0.000000e+00> : vector<8x512xf32>
    %113 = tpu.matmul %110, %2, %cst_20 {dimension_numbers = #tpu.dot_dimension_numbers<[1], [0], [0], [1], [0, 0, 1, 1], [], []>} : vector<8x128xf32>, vector<128x512xf32>, vector<8x512xf32> -> vector<8x512xf32>
    %114 = arith.addf %112, %113 : vector<8x512xf32>
    %115 = vector.extract_strided_slice %114 {offsets = [0, 0], sizes = [8, 384], strides = [1, 1]} : vector<8x512xf32> to vector<8x384xf32>
    %116 = arith.negf %115 : vector<8x384xf32>
    %117 = math.exp %116 : vector<8x384xf32>
    %cst_21 = arith.constant 1.000000e+00 : f32
    %118 = vector.broadcast %cst_21 : f32 to vector<8x384xf32>
    %119 = arith.addf %118, %117 : vector<8x384xf32>
    %120 = arith.divf %118, %119 : vector<8x384xf32>
    %121 = vector.extract_strided_slice %114 {offsets = [0, 384], sizes = [8, 128], strides = [1, 1]} : vector<8x512xf32> to vector<8x128xf32>
    %122 = math.tanh %121 : vector<8x128xf32>
    %123 = vector.extract_strided_slice %120 {offsets = [0, 0], sizes = [8, 128], strides = [1, 1]} : vector<8x384xf32> to vector<8x128xf32>
    %124 = vector.extract_strided_slice %120 {offsets = [0, 128], sizes = [8, 128], strides = [1, 1]} : vector<8x384xf32> to vector<8x128xf32>
    %125 = vector.extract_strided_slice %120 {offsets = [0, 256], sizes = [8, 128], strides = [1, 1]} : vector<8x384xf32> to vector<8x128xf32>
    %126 = arith.mulf %124, %108 : vector<8x128xf32>
    %127 = arith.mulf %123, %122 : vector<8x128xf32>
    %128 = arith.addf %126, %127 : vector<8x128xf32>
    %129 = math.tanh %128 : vector<8x128xf32>
    %130 = arith.mulf %125, %129 : vector<8x128xf32>
    %131 = vector.extract_strided_slice %8 {offsets = [6, 0, 0], sizes = [1, 8, 512], strides = [1, 1, 1]} : vector<8x8x512xf32> to vector<1x8x512xf32>
    %132 = vector.shape_cast %131 : vector<1x8x512xf32> to vector<8x512xf32>
    %cst_22 = arith.constant dense<0.000000e+00> : vector<8x512xf32>
    %133 = tpu.matmul %130, %2, %cst_22 {dimension_numbers = #tpu.dot_dimension_numbers<[1], [0], [0], [1], [0, 0, 1, 1], [], []>} : vector<8x128xf32>, vector<128x512xf32>, vector<8x512xf32> -> vector<8x512xf32>
    %134 = arith.addf %132, %133 : vector<8x512xf32>
    %135 = vector.extract_strided_slice %134 {offsets = [0, 0], sizes = [8, 384], strides = [1, 1]} : vector<8x512xf32> to vector<8x384xf32>
    %136 = arith.negf %135 : vector<8x384xf32>
    %137 = math.exp %136 : vector<8x384xf32>
    %cst_23 = arith.constant 1.000000e+00 : f32
    %138 = vector.broadcast %cst_23 : f32 to vector<8x384xf32>
    %139 = arith.addf %138, %137 : vector<8x384xf32>
    %140 = arith.divf %138, %139 : vector<8x384xf32>
    %141 = vector.extract_strided_slice %134 {offsets = [0, 384], sizes = [8, 128], strides = [1, 1]} : vector<8x512xf32> to vector<8x128xf32>
    %142 = math.tanh %141 : vector<8x128xf32>
    %143 = vector.extract_strided_slice %140 {offsets = [0, 0], sizes = [8, 128], strides = [1, 1]} : vector<8x384xf32> to vector<8x128xf32>
    %144 = vector.extract_strided_slice %140 {offsets = [0, 128], sizes = [8, 128], strides = [1, 1]} : vector<8x384xf32> to vector<8x128xf32>
    %145 = vector.extract_strided_slice %140 {offsets = [0, 256], sizes = [8, 128], strides = [1, 1]} : vector<8x384xf32> to vector<8x128xf32>
    %146 = arith.mulf %144, %128 : vector<8x128xf32>
    %147 = arith.mulf %143, %142 : vector<8x128xf32>
    %148 = arith.addf %146, %147 : vector<8x128xf32>
    %149 = math.tanh %148 : vector<8x128xf32>
    %150 = arith.mulf %145, %149 : vector<8x128xf32>
    %151 = vector.extract_strided_slice %8 {offsets = [7, 0, 0], sizes = [1, 8, 512], strides = [1, 1, 1]} : vector<8x8x512xf32> to vector<1x8x512xf32>
    %152 = vector.shape_cast %151 : vector<1x8x512xf32> to vector<8x512xf32>
    %cst_24 = arith.constant dense<0.000000e+00> : vector<8x512xf32>
    %153 = tpu.matmul %150, %2, %cst_24 {dimension_numbers = #tpu.dot_dimension_numbers<[1], [0], [0], [1], [0, 0, 1, 1], [], []>} : vector<8x128xf32>, vector<128x512xf32>, vector<8x512xf32> -> vector<8x512xf32>
    %154 = arith.addf %152, %153 : vector<8x512xf32>
    %155 = vector.extract_strided_slice %154 {offsets = [0, 0], sizes = [8, 384], strides = [1, 1]} : vector<8x512xf32> to vector<8x384xf32>
    %156 = arith.negf %155 : vector<8x384xf32>
    %157 = math.exp %156 : vector<8x384xf32>
    %cst_25 = arith.constant 1.000000e+00 : f32
    %158 = vector.broadcast %cst_25 : f32 to vector<8x384xf32>
    %159 = arith.addf %158, %157 : vector<8x384xf32>
    %160 = arith.divf %158, %159 : vector<8x384xf32>
    %161 = vector.extract_strided_slice %154 {offsets = [0, 384], sizes = [8, 128], strides = [1, 1]} : vector<8x512xf32> to vector<8x128xf32>
    %162 = math.tanh %161 : vector<8x128xf32>
    %163 = vector.extract_strided_slice %160 {offsets = [0, 0], sizes = [8, 128], strides = [1, 1]} : vector<8x384xf32> to vector<8x128xf32>
    %164 = vector.extract_strided_slice %160 {offsets = [0, 128], sizes = [8, 128], strides = [1, 1]} : vector<8x384xf32> to vector<8x128xf32>
    %165 = vector.extract_strided_slice %160 {offsets = [0, 256], sizes = [8, 128], strides = [1, 1]} : vector<8x384xf32> to vector<8x128xf32>
    %166 = arith.mulf %164, %148 : vector<8x128xf32>
    %167 = arith.mulf %163, %162 : vector<8x128xf32>
    %168 = arith.addf %166, %167 : vector<8x128xf32>
    %169 = math.tanh %168 : vector<8x128xf32>
    %170 = arith.mulf %165, %169 : vector<8x128xf32>
    %c0_26 = arith.constant 0 : index
    %c0_27 = arith.constant 0 : index
    %c0_28 = arith.constant 0 : index
    %171 = vector.load %arg1[%c0_26, %c0_27, %c0_28] : memref<4x8x128xf32, #tpu.memory_space<vmem>>, vector<4x8x128xf32>
    %c0_29 = arith.constant 0 : index
    %c0_30 = arith.constant 0 : index
    %172 = vector.load %arg6[%c0_29, %c0_30] : memref<128x512xf32, #tpu.memory_space<vmem>>, vector<128x512xf32>
    %c0_31 = arith.constant 0 : index
    %c0_32 = arith.constant 0 : index
    %173 = vector.load %arg7[%c0_31, %c0_32] : memref<128x512xf32, #tpu.memory_space<vmem>>, vector<128x512xf32>
    %c0_33 = arith.constant 0 : index
    %c0_34 = arith.constant 0 : index
    %174 = vector.load %arg8[%c0_33, %c0_34] : memref<1x512xf32, #tpu.memory_space<vmem>>, vector<1x512xf32>
    %175 = vector.shape_cast %171 : vector<4x8x128xf32> to vector<32x128xf32>
    %cst_35 = arith.constant dense<0.000000e+00> : vector<32x512xf32>
    %176 = tpu.matmul %175, %172, %cst_35 {dimension_numbers = #tpu.dot_dimension_numbers<[1], [0], [0], [1], [0, 0, 1, 1], [], []>} : vector<32x128xf32>, vector<128x512xf32>, vector<32x512xf32> -> vector<32x512xf32>
    %177 = vector.broadcast %174 : vector<1x512xf32> to vector<32x512xf32>
    %178 = arith.addf %176, %177 : vector<32x512xf32>
    %179 = vector.shape_cast %178 : vector<32x512xf32> to vector<4x8x512xf32>
    %cst_36 = arith.constant 0.000000e+00 : f32
    %180 = vector.broadcast %cst_36 : f32 to vector<8x128xf32>
    %cst_37 = arith.constant 0.000000e+00 : f32
    %181 = vector.broadcast %cst_37 : f32 to vector<8x128xf32>
    %182 = vector.extract_strided_slice %179 {offsets = [0, 0, 0], sizes = [1, 8, 512], strides = [1, 1, 1]} : vector<4x8x512xf32> to vector<1x8x512xf32>
    %183 = vector.shape_cast %182 : vector<1x8x512xf32> to vector<8x512xf32>
    %cst_38 = arith.constant dense<0.000000e+00> : vector<8x512xf32>
    %184 = tpu.matmul %180, %173, %cst_38 {dimension_numbers = #tpu.dot_dimension_numbers<[1], [0], [0], [1], [0, 0, 1, 1], [], []>} : vector<8x128xf32>, vector<128x512xf32>, vector<8x512xf32> -> vector<8x512xf32>
    %185 = arith.addf %183, %184 : vector<8x512xf32>
    %186 = vector.extract_strided_slice %185 {offsets = [0, 0], sizes = [8, 384], strides = [1, 1]} : vector<8x512xf32> to vector<8x384xf32>
    %187 = arith.negf %186 : vector<8x384xf32>
    %188 = math.exp %187 : vector<8x384xf32>
    %cst_39 = arith.constant 1.000000e+00 : f32
    %189 = vector.broadcast %cst_39 : f32 to vector<8x384xf32>
    %190 = arith.addf %189, %188 : vector<8x384xf32>
    %191 = arith.divf %189, %190 : vector<8x384xf32>
    %192 = vector.extract_strided_slice %185 {offsets = [0, 384], sizes = [8, 128], strides = [1, 1]} : vector<8x512xf32> to vector<8x128xf32>
    %193 = math.tanh %192 : vector<8x128xf32>
    %194 = vector.extract_strided_slice %191 {offsets = [0, 0], sizes = [8, 128], strides = [1, 1]} : vector<8x384xf32> to vector<8x128xf32>
    %195 = vector.extract_strided_slice %191 {offsets = [0, 128], sizes = [8, 128], strides = [1, 1]} : vector<8x384xf32> to vector<8x128xf32>
    %196 = vector.extract_strided_slice %191 {offsets = [0, 256], sizes = [8, 128], strides = [1, 1]} : vector<8x384xf32> to vector<8x128xf32>
    %197 = arith.mulf %195, %181 : vector<8x128xf32>
    %198 = arith.mulf %194, %193 : vector<8x128xf32>
    %199 = arith.addf %197, %198 : vector<8x128xf32>
    %200 = math.tanh %199 : vector<8x128xf32>
    %201 = arith.mulf %196, %200 : vector<8x128xf32>
    %202 = vector.extract_strided_slice %179 {offsets = [1, 0, 0], sizes = [1, 8, 512], strides = [1, 1, 1]} : vector<4x8x512xf32> to vector<1x8x512xf32>
    %203 = vector.shape_cast %202 : vector<1x8x512xf32> to vector<8x512xf32>
    %cst_40 = arith.constant dense<0.000000e+00> : vector<8x512xf32>
    %204 = tpu.matmul %201, %173, %cst_40 {dimension_numbers = #tpu.dot_dimension_numbers<[1], [0], [0], [1], [0, 0, 1, 1], [], []>} : vector<8x128xf32>, vector<128x512xf32>, vector<8x512xf32> -> vector<8x512xf32>
    %205 = arith.addf %203, %204 : vector<8x512xf32>
    %206 = vector.extract_strided_slice %205 {offsets = [0, 0], sizes = [8, 384], strides = [1, 1]} : vector<8x512xf32> to vector<8x384xf32>
    %207 = arith.negf %206 : vector<8x384xf32>
    %208 = math.exp %207 : vector<8x384xf32>
    %cst_41 = arith.constant 1.000000e+00 : f32
    %209 = vector.broadcast %cst_41 : f32 to vector<8x384xf32>
    %210 = arith.addf %209, %208 : vector<8x384xf32>
    %211 = arith.divf %209, %210 : vector<8x384xf32>
    %212 = vector.extract_strided_slice %205 {offsets = [0, 384], sizes = [8, 128], strides = [1, 1]} : vector<8x512xf32> to vector<8x128xf32>
    %213 = math.tanh %212 : vector<8x128xf32>
    %214 = vector.extract_strided_slice %211 {offsets = [0, 0], sizes = [8, 128], strides = [1, 1]} : vector<8x384xf32> to vector<8x128xf32>
    %215 = vector.extract_strided_slice %211 {offsets = [0, 128], sizes = [8, 128], strides = [1, 1]} : vector<8x384xf32> to vector<8x128xf32>
    %216 = vector.extract_strided_slice %211 {offsets = [0, 256], sizes = [8, 128], strides = [1, 1]} : vector<8x384xf32> to vector<8x128xf32>
    %217 = arith.mulf %215, %199 : vector<8x128xf32>
    %218 = arith.mulf %214, %213 : vector<8x128xf32>
    %219 = arith.addf %217, %218 : vector<8x128xf32>
    %220 = math.tanh %219 : vector<8x128xf32>
    %221 = arith.mulf %216, %220 : vector<8x128xf32>
    %222 = vector.extract_strided_slice %179 {offsets = [2, 0, 0], sizes = [1, 8, 512], strides = [1, 1, 1]} : vector<4x8x512xf32> to vector<1x8x512xf32>
    %223 = vector.shape_cast %222 : vector<1x8x512xf32> to vector<8x512xf32>
    %cst_42 = arith.constant dense<0.000000e+00> : vector<8x512xf32>
    %224 = tpu.matmul %221, %173, %cst_42 {dimension_numbers = #tpu.dot_dimension_numbers<[1], [0], [0], [1], [0, 0, 1, 1], [], []>} : vector<8x128xf32>, vector<128x512xf32>, vector<8x512xf32> -> vector<8x512xf32>
    %225 = arith.addf %223, %224 : vector<8x512xf32>
    %226 = vector.extract_strided_slice %225 {offsets = [0, 0], sizes = [8, 384], strides = [1, 1]} : vector<8x512xf32> to vector<8x384xf32>
    %227 = arith.negf %226 : vector<8x384xf32>
    %228 = math.exp %227 : vector<8x384xf32>
    %cst_43 = arith.constant 1.000000e+00 : f32
    %229 = vector.broadcast %cst_43 : f32 to vector<8x384xf32>
    %230 = arith.addf %229, %228 : vector<8x384xf32>
    %231 = arith.divf %229, %230 : vector<8x384xf32>
    %232 = vector.extract_strided_slice %225 {offsets = [0, 384], sizes = [8, 128], strides = [1, 1]} : vector<8x512xf32> to vector<8x128xf32>
    %233 = math.tanh %232 : vector<8x128xf32>
    %234 = vector.extract_strided_slice %231 {offsets = [0, 0], sizes = [8, 128], strides = [1, 1]} : vector<8x384xf32> to vector<8x128xf32>
    %235 = vector.extract_strided_slice %231 {offsets = [0, 128], sizes = [8, 128], strides = [1, 1]} : vector<8x384xf32> to vector<8x128xf32>
    %236 = vector.extract_strided_slice %231 {offsets = [0, 256], sizes = [8, 128], strides = [1, 1]} : vector<8x384xf32> to vector<8x128xf32>
    %237 = arith.mulf %235, %219 : vector<8x128xf32>
    %238 = arith.mulf %234, %233 : vector<8x128xf32>
    %239 = arith.addf %237, %238 : vector<8x128xf32>
    %240 = math.tanh %239 : vector<8x128xf32>
    %241 = arith.mulf %236, %240 : vector<8x128xf32>
    %242 = vector.extract_strided_slice %179 {offsets = [3, 0, 0], sizes = [1, 8, 512], strides = [1, 1, 1]} : vector<4x8x512xf32> to vector<1x8x512xf32>
    %243 = vector.shape_cast %242 : vector<1x8x512xf32> to vector<8x512xf32>
    %cst_44 = arith.constant dense<0.000000e+00> : vector<8x512xf32>
    %244 = tpu.matmul %241, %173, %cst_44 {dimension_numbers = #tpu.dot_dimension_numbers<[1], [0], [0], [1], [0, 0, 1, 1], [], []>} : vector<8x128xf32>, vector<128x512xf32>, vector<8x512xf32> -> vector<8x512xf32>
    %245 = arith.addf %243, %244 : vector<8x512xf32>
    %246 = vector.extract_strided_slice %245 {offsets = [0, 0], sizes = [8, 384], strides = [1, 1]} : vector<8x512xf32> to vector<8x384xf32>
    %247 = arith.negf %246 : vector<8x384xf32>
    %248 = math.exp %247 : vector<8x384xf32>
    %cst_45 = arith.constant 1.000000e+00 : f32
    %249 = vector.broadcast %cst_45 : f32 to vector<8x384xf32>
    %250 = arith.addf %249, %248 : vector<8x384xf32>
    %251 = arith.divf %249, %250 : vector<8x384xf32>
    %252 = vector.extract_strided_slice %245 {offsets = [0, 384], sizes = [8, 128], strides = [1, 1]} : vector<8x512xf32> to vector<8x128xf32>
    %253 = math.tanh %252 : vector<8x128xf32>
    %254 = vector.extract_strided_slice %251 {offsets = [0, 0], sizes = [8, 128], strides = [1, 1]} : vector<8x384xf32> to vector<8x128xf32>
    %255 = vector.extract_strided_slice %251 {offsets = [0, 128], sizes = [8, 128], strides = [1, 1]} : vector<8x384xf32> to vector<8x128xf32>
    %256 = vector.extract_strided_slice %251 {offsets = [0, 256], sizes = [8, 128], strides = [1, 1]} : vector<8x384xf32> to vector<8x128xf32>
    %257 = arith.mulf %255, %239 : vector<8x128xf32>
    %258 = arith.mulf %254, %253 : vector<8x128xf32>
    %259 = arith.addf %257, %258 : vector<8x128xf32>
    %260 = math.tanh %259 : vector<8x128xf32>
    %261 = arith.mulf %256, %260 : vector<8x128xf32>
    %c0_46 = arith.constant 0 : index
    %c0_47 = arith.constant 0 : index
    %262 = vector.load %arg2[%c0_46, %c0_47] : memref<8x128xf32, #tpu.memory_space<vmem>>, vector<8x128xf32>
    %c0_48 = arith.constant 0 : index
    %c0_49 = arith.constant 0 : index
    %263 = vector.load %arg9[%c0_48, %c0_49] : memref<128x128xf32, #tpu.memory_space<vmem>>, vector<128x128xf32>
    %cst_50 = arith.constant dense<0.000000e+00> : vector<8x128xf32>
    %264 = tpu.matmul %262, %263, %cst_50 {dimension_numbers = #tpu.dot_dimension_numbers<[1], [0], [0], [1], [0, 0, 1, 1], [], []>} : vector<8x128xf32>, vector<128x128xf32>, vector<8x128xf32> -> vector<8x128xf32>
    %c0_51 = arith.constant 0 : index
    %c0_52 = arith.constant 0 : index
    %265 = vector.load %arg10[%c0_51, %c0_52] : memref<128x128xf32, #tpu.memory_space<vmem>>, vector<128x128xf32>
    %cst_53 = arith.constant dense<0.000000e+00> : vector<8x128xf32>
    %266 = tpu.matmul %170, %265, %cst_53 {dimension_numbers = #tpu.dot_dimension_numbers<[1], [0], [0], [1], [0, 0, 1, 1], [], []>} : vector<8x128xf32>, vector<128x128xf32>, vector<8x128xf32> -> vector<8x128xf32>
    %267 = arith.addf %264, %266 : vector<8x128xf32>
    %c0_54 = arith.constant 0 : index
    %c0_55 = arith.constant 0 : index
    %268 = vector.load %arg11[%c0_54, %c0_55] : memref<128x128xf32, #tpu.memory_space<vmem>>, vector<128x128xf32>
    %cst_56 = arith.constant dense<0.000000e+00> : vector<8x128xf32>
    %269 = tpu.matmul %261, %268, %cst_56 {dimension_numbers = #tpu.dot_dimension_numbers<[1], [0], [0], [1], [0, 0, 1, 1], [], []>} : vector<8x128xf32>, vector<128x128xf32>, vector<8x128xf32> -> vector<8x128xf32>
    %270 = arith.addf %267, %269 : vector<8x128xf32>
    %c0_57 = arith.constant 0 : index
    %c0_58 = arith.constant 0 : index
    %271 = vector.load %arg12[%c0_57, %c0_58] : memref<1x128xf32, #tpu.memory_space<vmem>>, vector<1x128xf32>
    %272 = vector.broadcast %271 : vector<1x128xf32> to vector<8x128xf32>
    %273 = arith.addf %270, %272 : vector<8x128xf32>
    %cst_59 = arith.constant 0.000000e+00 : f32
    %274 = vector.broadcast %cst_59 : f32 to vector<8x128xf32>
    %275 = arith.maximumf %273, %274 : vector<8x128xf32>
    %c0_60 = arith.constant 0 : index
    %c0_61 = arith.constant 0 : index
    %276 = vector.load %arg13[%c0_60, %c0_61] : memref<128x128xf32, #tpu.memory_space<vmem>>, vector<128x128xf32>
    %cst_62 = arith.constant dense<0.000000e+00> : vector<8x128xf32>
    %277 = tpu.matmul %275, %276, %cst_62 {dimension_numbers = #tpu.dot_dimension_numbers<[1], [0], [0], [1], [0, 0, 1, 1], [], []>} : vector<8x128xf32>, vector<128x128xf32>, vector<8x128xf32> -> vector<8x128xf32>
    %c0_63 = arith.constant 0 : index
    %c0_64 = arith.constant 0 : index
    %278 = vector.load %arg14[%c0_63, %c0_64] : memref<1x128xf32, #tpu.memory_space<vmem>>, vector<1x128xf32>
    %279 = vector.broadcast %278 : vector<1x128xf32> to vector<8x128xf32>
    %280 = arith.addf %277, %279 : vector<8x128xf32>
    %cst_65 = arith.constant 0.000000e+00 : f32
    %281 = vector.broadcast %cst_65 : f32 to vector<8x128xf32>
    %282 = arith.maximumf %280, %281 : vector<8x128xf32>
    %c0_66 = arith.constant 0 : index
    %c0_67 = arith.constant 0 : index
    %283 = vector.load %arg15[%c0_66, %c0_67] : memref<128x128xf32, #tpu.memory_space<vmem>>, vector<128x128xf32>
    %cst_68 = arith.constant dense<0.000000e+00> : vector<8x128xf32>
    %284 = tpu.matmul %282, %283, %cst_68 {dimension_numbers = #tpu.dot_dimension_numbers<[1], [0], [0], [1], [0, 0, 1, 1], [], []>} : vector<8x128xf32>, vector<128x128xf32>, vector<8x128xf32> -> vector<8x128xf32>
    %c0_69 = arith.constant 0 : index
    %c0_70 = arith.constant 0 : index
    %285 = vector.load %arg16[%c0_69, %c0_70] : memref<1x128xf32, #tpu.memory_space<vmem>>, vector<1x128xf32>
    %286 = vector.broadcast %285 : vector<1x128xf32> to vector<8x128xf32>
    %287 = arith.addf %284, %286 : vector<8x128xf32>
    %cst_71 = arith.constant 0.000000e+00 : f32
    %288 = vector.broadcast %cst_71 : f32 to vector<8x128xf32>
    %289 = arith.maximumf %287, %288 : vector<8x128xf32>
    %c0_72 = arith.constant 0 : index
    %c0_73 = arith.constant 0 : index
    %290 = vector.load %arg17[%c0_72, %c0_73] : memref<128x128xf32, #tpu.memory_space<vmem>>, vector<128x128xf32>
    %cst_74 = arith.constant dense<0.000000e+00> : vector<8x128xf32>
    %291 = tpu.matmul %289, %290, %cst_74 {dimension_numbers = #tpu.dot_dimension_numbers<[1], [0], [0], [1], [0, 0, 1, 1], [], []>} : vector<8x128xf32>, vector<128x128xf32>, vector<8x128xf32> -> vector<8x128xf32>
    %c0_75 = arith.constant 0 : index
    %c0_76 = arith.constant 0 : index
    %292 = vector.load %arg18[%c0_75, %c0_76] : memref<1x128xf32, #tpu.memory_space<vmem>>, vector<1x128xf32>
    %293 = vector.broadcast %292 : vector<1x128xf32> to vector<8x128xf32>
    %294 = arith.addf %291, %293 : vector<8x128xf32>
    %c0_77 = arith.constant 0 : index
    %c0_78 = arith.constant 0 : index
    %295 = vector.load %arg19[%c0_77, %c0_78] : memref<8x128xf32, #tpu.memory_space<vmem>>, vector<8x128xf32>
    tpu.vector_store %arg19[%c0_77, %c0_78], %294 {strides = array<i32>} : memref<8x128xf32, #tpu.memory_space<vmem>>, vector<8x128xf32>,
    return
  }
}

</mosaic_0001>

<bundles_post_ra>
// kernel: stock_classifier_forward.1
= control target key start
LH: loop header
LB: loop body
LE: loop exit
PB: predicated region body
PF: predicated region fallthrough
CT: control target
= control target key end

     0   :  { %s5027_s0 = inlined_call_operand.vmem [shape: f32[8,8,128], index: 0, kind: input, shape index: {}]   ;;  %s5028_s1 = inlined_call_operand.vmem [shape: f32[4,8,128], index: 1, kind: input, shape index: {}]   ;;  %s5029_s2 = inlined_call_operand.vmem [shape: f32[8,128], index: 2, kind: input, shape index: {}]   ;;  %s5030_s3 = inlined_call_operand.hbm [shape: f32[128,512], index: 3, kind: input, shape index: {}]   ;;  %s5031_s4 = inlined_call_operand.hbm [shape: f32[128,512], index: 4, kind: input, shape index: {}]   ;;  %s5032_s5 = inlined_call_operand.vmem [shape: f32[1,512], index: 5, kind: input, shape index: {}]   ;;  %s5033_s6 = inlined_call_operand.hbm [shape: f32[128,512], index: 6, kind: input, shape index: {}]   ;;  %s5034_s7 = inlined_call_operand.hbm [shape: f32[128,512], index: 7, kind: input, shape index: {}]   ;;  %s5035_s8 = inlined_call_operand.vmem [shape: f32[1,512], index: 8, kind: input, shape index: {}]   ;;  %s5036_s9 = inlined_call_operand.vmem [shape: f32[128,128], index: 9, kind: input, shape index: {}]   ;;  %s5037_s10 = inlined_call_operand.hbm [shape: f32[128,128], index: 10, kind: input, shape index: {}]   ;;  %s5038_s11 = inlined_call_operand.hbm [shape: f32[128,128], index: 11, kind: input, shape index: {}]   ;;  %s5039_s12 = inlined_call_operand.vmem [shape: f32[1,128], index: 12, kind: input, shape index: {}]   ;;  %s5040_s13 = inlined_call_operand.hbm [shape: f32[128,128], index: 13, kind: input, shape index: {}]   ;;  %s5041_s14 = inlined_call_operand.vmem [shape: f32[1,128], index: 14, kind: input, shape index: {}]   ;;  %s5042_s15 = inlined_call_operand.hbm [shape: f32[128,128], index: 15, kind: input, shape index: {}]   ;;  %s5043_s16 = inlined_call_operand.vmem [shape: f32[1,128], index: 16, kind: input, shape index: {}]   ;;  %s5044_s17 = inlined_call_operand.hbm [shape: f32[128,128], index: 17, kind: input, shape index: {}]   ;;  %s5045_s18 = inlined_call_operand.vmem [shape: f32[1,128], index: 18, kind: input, shape index: {}]   ;;  %s5046_s19 = inlined_call_operand.vmem [shape: f32[8,128], index: 19, kind: output, shape index: {}]  }
   0x1   :  { %5178 = sst [smem:[#allocation77_spill]] %s5027_s0 }
   0x2   :  { %5179 = sst [smem:[#allocation78_spill]] %s5028_s1 }
   0x3   :  { %5180 = sst [smem:[#allocation79_spill]] %s5029_s2 }
   0x4   :  { %5181 = sst [smem:[#allocation80_spill]] %s5030_s3 }
   0x5   :  { %24 = vsyncpa [#allocation3], 0 }
   0x6   :  { %25 = vsyncpa [#allocation5], 0 }
   0x7   :  { %26 = vsyncpa [#allocation8], 0 }
   0x8   :  { %27 = vsyncpa [#allocation11], 0 }
   0x9   :  { %28 = vsyncpa [#allocation14], 0  ;;  %s52_s20 = sshll.u32 %s5031_s4, 4  ;;  %s3318_s21 = smov [#allocation4]   ;;  %s53_s20 = int_to_ptr.hbm [resolvable:$true] %s52_s20 }
   0xa   :  { %s54_s1 = sshll.u32 %s3318_s21, 4  ;;  %s80_s23 = sshll.u32 %s5034_s7, 4  ;;  %s55_s1 = int_to_ptr.vmem [resolvable:$true] %s54_s1  ;;  %s81_s23 = int_to_ptr.hbm [resolvable:$true] %s80_s23 }
   0xb   :  { %s3319_s24 = smov 512   ;;  %s3320_s25 = smov 32  }
   0xc   :  { %60 = dma.hbm_to_vmem [thread:$0]  %s53_s20, 8192, %s55_s1, [#allocation5], %s3319_s24, %s3319_s24, %s3320_s25  }
   0xd   :  { %s3321_s3 = smov [#allocation7]   ;;  %s110_s28 = sshll.u32 %s5038_s11, 4  ;;  %s111_s28 = int_to_ptr.hbm [resolvable:$true] %s110_s28 }
   0xe   :  { %s82_s26 = sshll.u32 %s3321_s3, 4  ;;  %s3322_s7 = smov [#allocation10]   ;;  %s83_s26 = int_to_ptr.vmem [resolvable:$true] %s82_s26 }
   0xf   :  { %88 = dma.hbm_to_vmem [thread:$0]  %s81_s23, 8192, %s83_s26, [#allocation8], %s3319_s24, %s3319_s24, %s3320_s25  }
  0x10   :  { %s112_s29 = sshll.u32 %s3322_s7, 4  ;;  %s140_s20 = sshll.u32 %s5042_s15, 4  ;;  %s113_s29 = int_to_ptr.vmem [resolvable:$true] %s112_s29  ;;  %s141_s20 = int_to_ptr.hbm [resolvable:$true] %s140_s20 }
  0x11   :  { %s3323_s21 = smov 128   ;;  %s3324_s1 = smov 8  }
  0x12   :  { %118 = dma.hbm_to_vmem [thread:$0]  %s111_s28, 2048, %s113_s29, [#allocation11], %s3323_s21, %s3323_s21, %s3324_s1  }
  0x13   :  { %s3325_s22 = smov [#allocation13]   ;;  %s5182_s11 = sld [smem:[#allocation80_spill]] }
  0x14   :  { %s142_s2 = sshll.u32 %s3325_s22, 4  ;;  %s67_s27 = sshll.u32 %s5033_s6, 4  ;;  %s143_s2 = int_to_ptr.vmem [resolvable:$true] %s142_s2  ;;  %s68_s27 = int_to_ptr.hbm [resolvable:$true] %s67_s27 }
  0x15   :  { %148 = dma.hbm_to_vmem [thread:$0]  %s141_s20, 2048, %s143_s2, [#allocation14], %s3323_s21, %s3323_s21, %s3324_s1  }
  0x16   :  { %s3326_s7 = smov [#allocation2]   ;;  %s3327_s28 = smov [#allocation6]  }
  0x17   :  { %s41_s0 = sshll.u32 %s3326_s7, 4  ;;  %s69_s29 = sshll.u32 %s3327_s28, 4  ;;  %s42_s0 = int_to_ptr.vmem [resolvable:$true] %s41_s0  ;;  %s70_s29 = int_to_ptr.vmem [resolvable:$true] %s69_s29 }
  0x18   :  { %s97_s23 = sshll.u32 %s5037_s10, 4  ;;  %s125_s2 = sshll.u32 %s5040_s13, 4  ;;  %s98_s23 = int_to_ptr.hbm [resolvable:$true] %s97_s23  ;;  %s126_s2 = int_to_ptr.hbm [resolvable:$true] %s125_s2 }
  0x19   :  { %s39_s26 = sshll.u32 %s5182_s11, 4  ;;  %s3328_s3 = smov [#allocation9]   ;;  %s40_s26 = int_to_ptr.hbm [resolvable:$true] %s39_s26 }
  0x1a   :  { %47 = dma.hbm_to_vmem [thread:$0]  %s40_s26, 8192, %s42_s0, [#allocation3], %s3319_s24, %s3319_s24, %s3320_s25  }
  0x1b   :  { %75 = dma.hbm_to_vmem [thread:$0]  %s68_s27, 8192, %s70_s29, [#allocation5], %s3319_s24, %s3319_s24, %s3320_s25  }
  0x1c   :  { %s99_s11 = sshll.u32 %s3328_s3, 4  ;;  %s3329_s26 = smov [#allocation12]   ;;  %s100_s11 = int_to_ptr.vmem [resolvable:$true] %s99_s11 }
  0x1d   :  { %105 = dma.hbm_to_vmem [thread:$0]  %s98_s23, 2048, %s100_s11, [#allocation8], %s3323_s21, %s3323_s21, %s3324_s1  }
  0x1e   :  { %s127_s10 = sshll.u32 %s3329_s26, 4  ;;  %s155_s7 = sshll.u32 %s5044_s17, 4  ;;  %s128_s10 = int_to_ptr.vmem [resolvable:$true] %s127_s10  ;;  %s156_s7 = int_to_ptr.hbm [resolvable:$true] %s155_s7 }
  0x1f   :  { %133 = dma.hbm_to_vmem [thread:$0]  %s126_s2, 2048, %s128_s10, [#allocation11], %s3323_s21, %s3323_s21, %s3324_s1  }
  0x20   :  { %s3330_s13 = smov [#allocation15]  }
  0x21   :  { %s157_s24 = sshll.u32 %s3330_s13, 4  ;;  %s158_s24 = int_to_ptr.vmem [resolvable:$true] %s157_s24 }
  0x22   :  { %163 = dma.hbm_to_vmem [thread:$0]  %s156_s7, 2048, %s158_s24, [#allocation14], %s3323_s21, %s3323_s21, %s3324_s1  }
  0x23   :  { %3308 = dma.done.wait [#allocation3], 8192  }
  0x24   :  { %3309 = vsyncadd [#allocation3], 4294959104 }
  0x25   :  { %3310 = dma.done.wait [#allocation5], 16384  }
  0x26   :  { %3311 = vsyncadd [#allocation5], 4294950912 }
  0x27   :  { %3312 = dma.done.wait [#allocation8], 10240  }
  0x28   :  { %3313 = vsyncadd [#allocation8], 4294957056 }
  0x29   :  { %3314 = dma.done.wait [#allocation11], 4096  }
  0x2a   :  { %3315 = vsyncadd [#allocation11], 4294963200 }
  0x2b   :  { %3316 = dma.done.wait [#allocation14], 4096  }
  0x2c   :  { %3317 = vsyncadd [#allocation14], 4294963200  ;;  %v270_v0 = vld [vmem:[#allocation2 + $0x1e0] sm:$0xff]  ;;  %v271_v1 = vld [vmem:[#allocation2 + $0x1e8] sm:$0xff]  ;;  %s5183_s21 = sld [smem:[#allocation77_spill]] }
  0x2d   :  { %v272_v2 = vld [vmem:[#allocation2 + $0x1f0] sm:$0xff]  ;;  %348 = vmatpush.msra.mxu0 %v270_v0  ;;  %389 = vmatpush.msra.mxu1 %v271_v1  ;;  %v273_v3 = vld [vmem:[#allocation2 + $0x1f8] sm:$0xff]  ;;  %v266_v4 = vld [vmem:[#allocation2 + $0x1c0] sm:$0xff]  ;;  %s5393_s7 = sld [smem:[#allocation78_spill]] }
  0x2e   :  { %v267_v5 = vld [vmem:[#allocation2 + $0x1c8] sm:$0xff]  ;;  %430 = vmatpush.msra.mxu2 %v272_v2  ;;  %471 = vmatpush.msra.mxu3 %v273_v3  ;;  %v268_v6 = vld [vmem:[#allocation2 + $0x1d0] sm:$0xff]  ;;  %v269_v7 = vld [vmem:[#allocation2 + $0x1d8] sm:$0xff]  ;;  %s5483_s2 = sld [smem:[#allocation79_spill]] }
  0x2f   :  { %v262_v8 = vld [vmem:[#allocation2 + $0x1a0] sm:$0xff]  ;;  %349 = vmatpush.msra.mxu0 %v266_v4  ;;  %390 = vmatpush.msra.mxu1 %v267_v5  ;;  %v263_v9 = vld [vmem:[#allocation2 + $0x1a8] sm:$0xff]  ;;  %v264_v10 = vld [vmem:[#allocation2 + $0x1b0] sm:$0xff] }
  0x30   :  { %v265_v11 = vld [vmem:[#allocation2 + $0x1b8] sm:$0xff]  ;;  %431 = vmatpush.msra.mxu2 %v268_v6  ;;  %472 = vmatpush.msra.mxu3 %v269_v7  ;;  %v258_v12 = vld [vmem:[#allocation2 + $0x180] sm:$0xff]  ;;  %v259_v13 = vld [vmem:[#allocation2 + $0x188] sm:$0xff] }
  0x31   :  { %350 = vmatpush.msra.mxu0 %v262_v8  ;;  %391 = vmatpush.msra.mxu1 %v263_v9  ;;  %v260_v14 = vld [vmem:[#allocation2 + $0x190] sm:$0xff]  ;;  %v261_v15 = vld [vmem:[#allocation2 + $0x198] sm:$0xff]  ;;  %v254_v16 = vld [vmem:[#allocation2 + $0x160] sm:$0xff] }
  0x32   :  { %432 = vmatpush.msra.mxu2 %v264_v10  ;;  %473 = vmatpush.msra.mxu3 %v265_v11  ;;  %v255_v17 = vld [vmem:[#allocation2 + $0x168] sm:$0xff]  ;;  %v256_v18 = vld [vmem:[#allocation2 + $0x170] sm:$0xff]  ;;  %v257_v19 = vld [vmem:[#allocation2 + $0x178] sm:$0xff] }
  0x33   :  { %351 = vmatpush.msra.mxu0 %v258_v12  ;;  %392 = vmatpush.msra.mxu1 %v259_v13  ;;  %v250_v20 = vld [vmem:[#allocation2 + $0x140] sm:$0xff]  ;;  %v251_v21 = vld [vmem:[#allocation2 + $0x148] sm:$0xff]  ;;  %v252_v22 = vld [vmem:[#allocation2 + $0x150] sm:$0xff] }
  0x34   :  { %433 = vmatpush.msra.mxu2 %v260_v14  ;;  %474 = vmatpush.msra.mxu3 %v261_v15  ;;  %v253_v23 = vld [vmem:[#allocation2 + $0x158] sm:$0xff]  ;;  %v246_v24 = vld [vmem:[#allocation2 + $0x120] sm:$0xff]  ;;  %v247_v25 = vld [vmem:[#allocation2 + $0x128] sm:$0xff] }
  0x35   :  { %352 = vmatpush.msra.mxu0 %v254_v16  ;;  %393 = vmatpush.msra.mxu1 %v255_v17  ;;  %v248_v26 = vld [vmem:[#allocation2 + $0x130] sm:$0xff]  ;;  %v249_v27 = vld [vmem:[#allocation2 + $0x138] sm:$0xff]  ;;  %v242_v28 = vld [vmem:[#allocation2 + $0x100] sm:$0xff] }
  0x36   :  { %434 = vmatpush.msra.mxu2 %v256_v18  ;;  %475 = vmatpush.msra.mxu3 %v257_v19  ;;  %v243_v29 = vld [vmem:[#allocation2 + $0x108] sm:$0xff]  ;;  %v244_v30 = vld [vmem:[#allocation2 + $0x110] sm:$0xff]  ;;  %v245_v31 = vld [vmem:[#allocation2 + $0x118] sm:$0xff] }
  0x37   :  { %353 = vmatpush.msra.mxu0 %v250_v20  ;;  %394 = vmatpush.msra.mxu1 %v251_v21  ;;  %v238_v32 = vld [vmem:[#allocation2 + $0xe0] sm:$0xff]  ;;  %v239_v33 = vld [vmem:[#allocation2 + $0xe8] sm:$0xff]  ;;  %v240_v34 = vld [vmem:[#allocation2 + $0xf0] sm:$0xff] }
  0x38   :  { %435 = vmatpush.msra.mxu2 %v252_v22  ;;  %476 = vmatpush.msra.mxu3 %v253_v23  ;;  %v241_v35 = vld [vmem:[#allocation2 + $0xf8] sm:$0xff]  ;;  %v234_v36 = vld [vmem:[#allocation2 + $0xc0] sm:$0xff]  ;;  %v235_v37 = vld [vmem:[#allocation2 + $0xc8] sm:$0xff] }
  0x39   :  { %354 = vmatpush.msra.mxu0 %v246_v24  ;;  %395 = vmatpush.msra.mxu1 %v247_v25  ;;  %v236_v38 = vld [vmem:[#allocation2 + $0xd0] sm:$0xff]  ;;  %v237_v39 = vld [vmem:[#allocation2 + $0xd8] sm:$0xff]  ;;  %v230_v40 = vld [vmem:[#allocation2 + $0xa0] sm:$0xff] }
  0x3a   :  { %436 = vmatpush.msra.mxu2 %v248_v26  ;;  %477 = vmatpush.msra.mxu3 %v249_v27  ;;  %v231_v41 = vld [vmem:[#allocation2 + $0xa8] sm:$0xff]  ;;  %v232_v42 = vld [vmem:[#allocation2 + $0xb0] sm:$0xff]  ;;  %v233_v43 = vld [vmem:[#allocation2 + $0xb8] sm:$0xff] }
  0x3b   :  { %355 = vmatpush.msra.mxu0 %v242_v28  ;;  %396 = vmatpush.msra.mxu1 %v243_v29  ;;  %v226_v44 = vld [vmem:[#allocation2 + $0x80] sm:$0xff]  ;;  %v227_v45 = vld [vmem:[#allocation2 + $0x88] sm:$0xff]  ;;  %v228_v46 = vld [vmem:[#allocation2 + $0x90] sm:$0xff] }
  0x3c   :  { %437 = vmatpush.msra.mxu2 %v244_v30  ;;  %478 = vmatpush.msra.mxu3 %v245_v31  ;;  %v229_v47 = vld [vmem:[#allocation2 + $0x98] sm:$0xff]  ;;  %v222_v48 = vld [vmem:[#allocation2 + $0x60] sm:$0xff]  ;;  %v223_v49 = vld [vmem:[#allocation2 + $0x68] sm:$0xff] }
  0x3d   :  { %356 = vmatpush.msra.mxu0 %v238_v32  ;;  %397 = vmatpush.msra.mxu1 %v239_v33  ;;  %v224_v50 = vld [vmem:[#allocation2 + $0x70] sm:$0xff]  ;;  %v225_v51 = vld [vmem:[#allocation2 + $0x78] sm:$0xff]  ;;  %v218_v52 = vld [vmem:[#allocation2 + $0x40] sm:$0xff] }
  0x3e   :  { %438 = vmatpush.msra.mxu2 %v240_v34  ;;  %479 = vmatpush.msra.mxu3 %v241_v35  ;;  %v219_v53 = vld [vmem:[#allocation2 + $0x48] sm:$0xff]  ;;  %v220_v54 = vld [vmem:[#allocation2 + $0x50] sm:$0xff]  ;;  %v221_v55 = vld [vmem:[#allocation2 + $0x58] sm:$0xff] }
  0x3f   :  { %357 = vmatpush.msra.mxu0 %v234_v36  ;;  %398 = vmatpush.msra.mxu1 %v235_v37  ;;  %v214_v56 = vld [vmem:[#allocation2 + $0x20] sm:$0xff]  ;;  %v215_v57 = vld [vmem:[#allocation2 + $0x28] sm:$0xff]  ;;  %v216_v58 = vld [vmem:[#allocation2 + $0x30] sm:$0xff] }
  0x40   :  { %439 = vmatpush.msra.mxu2 %v236_v38  ;;  %480 = vmatpush.msra.mxu3 %v237_v39  ;;  %v217_v59 = vld [vmem:[#allocation2 + $0x38] sm:$0xff]  ;;  %v210_v60 = vld [vmem:[#allocation2] sm:$0xff]  ;;  %v211_v61 = vld [vmem:[#allocation2 + $0x8] sm:$0xff] }
  0x41   :  { %358 = vmatpush.msra.mxu0 %v230_v40  ;;  %399 = vmatpush.msra.mxu1 %v231_v41  ;;  %v212_v62 = vld [vmem:[#allocation2 + $0x10] sm:$0xff]  ;;  %v213_v63 = vld [vmem:[#allocation2 + $0x18] sm:$0xff]  ;;  %v202_v0 = vld [vmem:[%s5183_s21] sm:$0xff] }
  0x42   :  { %440 = vmatpush.msra.mxu2 %v232_v42  ;;  %481 = vmatpush.msra.mxu3 %v233_v43  ;;  %v3489_v1 = vld [vmem:[#allocation4 + $0x1e0] sm:$0xff]  ;;  %v3491_v2 = vld [vmem:[#allocation4 + $0x1e8] sm:$0xff]  ;;  %v3493_v3 = vld [vmem:[#allocation4 + $0x1f0] sm:$0xff] }
  0x43   :  { %359 = vmatpush.msra.mxu0 %v226_v44  ;;  %400 = vmatpush.msra.mxu1 %v227_v45  ;;  %v3495_v4 = vld [vmem:[#allocation4 + $0x1f8] sm:$0xff]  ;;  %v3497_v5 = vld [vmem:[#allocation4 + $0x1c0] sm:$0xff]  ;;  %v3499_v6 = vld [vmem:[#allocation4 + $0x1c8] sm:$0xff] }
  0x44   :  { %441 = vmatpush.msra.mxu2 %v228_v46  ;;  %482 = vmatpush.msra.mxu3 %v229_v47  ;;  %v3503_v7 = vld [vmem:[#allocation4 + $0x1d0] sm:$0xff]  ;;  %v3505_v8 = vld [vmem:[#allocation4 + $0x1d8] sm:$0xff]  ;;  %v3508_v9 = vld [vmem:[#allocation4 + $0x1a0] sm:$0xff] }
  0x45   :  { %360 = vmatpush.msra.mxu0 %v222_v48  ;;  %401 = vmatpush.msra.mxu1 %v223_v49  ;;  %v3510_v10 = vld [vmem:[#allocation4 + $0x1a8] sm:$0xff]  ;;  %v3515_v11 = vld [vmem:[#allocation4 + $0x1b0] sm:$0xff]  ;;  %v3517_v12 = vld [vmem:[#allocation4 + $0x1b8] sm:$0xff] }
  0x46   :  { %442 = vmatpush.msra.mxu2 %v224_v50  ;;  %483 = vmatpush.msra.mxu3 %v225_v51  ;;  %v203_v13 = vld [vmem:[%s5183_s21 + $0x8] sm:$0xff]  ;;  %v3526_v14 = vld [vmem:[#allocation4 + $0x180] sm:$0xff]  ;;  %v3532_v16 = vld [vmem:[#allocation4 + $0x190] sm:$0xff] }
  0x47   :  { %361 = vmatpush.msra.mxu0 %v218_v52  ;;  %402 = vmatpush.msra.mxu1 %v219_v53  ;;  %v3528_v15 = vld [vmem:[#allocation4 + $0x188] sm:$0xff]  ;;  %v3534_v17 = vld [vmem:[#allocation4 + $0x198] sm:$0xff]  ;;  %v3536_v18 = vld [vmem:[#allocation4 + $0x160] sm:$0xff] }
  0x48   :  { %443 = vmatpush.msra.mxu2 %v220_v54  ;;  %484 = vmatpush.msra.mxu3 %v221_v55  ;;  %v3538_v19 = vld [vmem:[#allocation4 + $0x168] sm:$0xff]  ;;  %v3542_v20 = vld [vmem:[#allocation4 + $0x170] sm:$0xff]  ;;  %v3544_v21 = vld [vmem:[#allocation4 + $0x178] sm:$0xff] }
  0x49   :  { %362 = vmatpush.msra.mxu0 %v214_v56  ;;  %403 = vmatpush.msra.mxu1 %v215_v57  ;;  %v3547_v22 = vld [vmem:[#allocation4 + $0x140] sm:$0xff]  ;;  %v3549_v23 = vld [vmem:[#allocation4 + $0x148] sm:$0xff]  ;;  %v3554_v24 = vld [vmem:[#allocation4 + $0x150] sm:$0xff] }
  0x4a   :  { %444 = vmatpush.msra.mxu2 %v216_v58  ;;  %485 = vmatpush.msra.mxu3 %v217_v59  ;;  %v3556_v25 = vld [vmem:[#allocation4 + $0x158] sm:$0xff]  ;;  %v204_v26 = vld [vmem:[%s5183_s21 + $0x10] sm:$0xff]  ;;  %v3565_v27 = vld [vmem:[#allocation4 + $0x120] sm:$0xff] }
  0x4b   :  { %363 = vmatpush.msra.mxu0 %v210_v60  ;;  %404 = vmatpush.msra.mxu1 %v211_v61  ;;  %v3567_v28 = vld [vmem:[#allocation4 + $0x128] sm:$0xff]  ;;  %v3571_v29 = vld [vmem:[#allocation4 + $0x130] sm:$0xff]  ;;  %v3573_v30 = vld [vmem:[#allocation4 + $0x138] sm:$0xff] }
  0x4c   :  { %445 = vmatpush.msra.mxu2 %v212_v62  ;;  %486 = vmatpush.msra.mxu3 %v213_v63  ;;  %v3575_v31 = vld [vmem:[#allocation4 + $0x100] sm:$0xff]  ;;  %v3577_v32 = vld [vmem:[#allocation4 + $0x108] sm:$0xff]  ;;  %v3581_v33 = vld [vmem:[#allocation4 + $0x110] sm:$0xff] }
  0x4d   :  { %364 = vmatmul.f32.vlgmr.msra.gmra.mxu0 %v202_v0  ;;  %405 = vmatmul.f32.vlgmr.msra.gmra.mxu1 %v202_v0  ;;  %v3583_v34 = vld [vmem:[#allocation4 + $0x118] sm:$0xff]  ;;  %v3586_v35 = vld [vmem:[#allocation4 + $0xe0] sm:$0xff]  ;;  %v3588_v36 = vld [vmem:[#allocation4 + $0xe8] sm:$0xff] }
  0x4e   :  { %446 = vmatmul.f32.vlgmr.msra.gmra.mxu2 %v202_v0  ;;  %487 = vmatmul.f32.vlgmr.msra.gmra.mxu3 %v202_v0  ;;  %v3593_v37 = vld [vmem:[#allocation4 + $0xf0] sm:$0xff]  ;;  %v3595_v38 = vld [vmem:[#allocation4 + $0xf8] sm:$0xff]  ;;  %v3604_v40 = vld [vmem:[#allocation4 + $0xc0] sm:$0xff] }
  0x4f   :  { %512 = vmatpush.msrb.mxu0 %v3489_v1  ;;  %532 = vmatpush.msrb.mxu1 %v3491_v2  ;;  %v205_v39 = vld [vmem:[%s5183_s21 + $0x18] sm:$0xff]  ;;  %v3606_v41 = vld [vmem:[#allocation4 + $0xc8] sm:$0xff]  ;;  %v3610_v42 = vld [vmem:[#allocation4 + $0xd0] sm:$0xff] }
  0x50   :  { %552 = vmatpush.msrb.mxu2 %v3493_v3  ;;  %572 = vmatpush.msrb.mxu3 %v3495_v4  ;;  %5184 = vst [vmem:[#allocation21_spill] sm:$0xff] %v3610_v42  ;;  %v3612_v43 = vld [vmem:[#allocation4 + $0xd8] sm:$0xff]  ;;  %v3614_v44 = vld [vmem:[#allocation4 + $0xa0] sm:$0xff]  ;;  %v3616_v45 = vld [vmem:[#allocation4 + $0xa8] sm:$0xff] }
  0x51   :  { %513 = vmatpush.msrb.mxu0 %v3497_v5  ;;  %533 = vmatpush.msrb.mxu1 %v3499_v6  ;;  %5185 = vst [vmem:[#allocation22_spill] sm:$0xff] %v3612_v43  ;;  %v3620_v46 = vld [vmem:[#allocation4 + $0xb0] sm:$0xff]  ;;  %v3622_v47 = vld [vmem:[#allocation4 + $0xb8] sm:$0xff]  ;;  %v3625_v48 = vld [vmem:[#allocation4 + $0x80] sm:$0xff] }
  0x52   :  { %553 = vmatpush.msrb.mxu2 %v3503_v7  ;;  %573 = vmatpush.msrb.mxu3 %v3505_v8  ;;  %5186 = vst [vmem:[#allocation23_spill] sm:$0xff] %v3614_v44  ;;  %v3627_v49 = vld [vmem:[#allocation4 + $0x88] sm:$0xff]  ;;  %v3632_v50 = vld [vmem:[#allocation4 + $0x90] sm:$0xff]  ;;  %v3634_v51 = vld [vmem:[#allocation4 + $0x98] sm:$0xff] }
  0x53   :  { %514 = vmatpush.msrb.mxu0 %v3508_v9  ;;  %534 = vmatpush.msrb.mxu1 %v3510_v10  ;;  %5187 = vst [vmem:[#allocation24_spill] sm:$0xff] %v3616_v45  ;;  %v206_v52 = vld [vmem:[%s5183_s21 + $0x20] sm:$0xff]  ;;  %v3645_v54 = vld [vmem:[#allocation4 + $0x68] sm:$0xff]  ;;  %v3649_v55 = vld [vmem:[#allocation4 + $0x70] sm:$0xff] }
  0x54   :  { %554 = vmatpush.msrb.mxu2 %v3515_v11  ;;  %574 = vmatpush.msrb.mxu3 %v3517_v12  ;;  %5188 = vst [vmem:[#allocation25_spill] sm:$0xff] %v3620_v46  ;;  %v3643_v53 = vld [vmem:[#allocation4 + $0x60] sm:$0xff]  ;;  %v3651_v56 = vld [vmem:[#allocation4 + $0x78] sm:$0xff]  ;;  %v3655_v58 = vld [vmem:[#allocation4 + $0x48] sm:$0xff] }
  0x55   :  { %367 = vmatmul.f32.gmra.mxu0 %v203_v13  ;;  %408 = vmatmul.f32.gmra.mxu1 %v203_v13  ;;  %5189 = vst [vmem:[#allocation26_spill] sm:$0xff] %v3622_v47  ;;  %v3653_v57 = vld [vmem:[#allocation4 + $0x40] sm:$0xff]  ;;  %v3659_v59 = vld [vmem:[#allocation4 + $0x50] sm:$0xff]  ;;  %v3661_v60 = vld [vmem:[#allocation4 + $0x58] sm:$0xff] }
  0x56   :  { %449 = vmatmul.f32.gmra.mxu2 %v203_v13  ;;  %490 = vmatmul.f32.gmra.mxu3 %v203_v13  ;;  %5190 = vst [vmem:[#allocation27_spill] sm:$0xff] %v3625_v48  ;;  %v3664_v61 = vld [vmem:[#allocation4 + $0x20] sm:$0xff]  ;;  %v3666_v62 = vld [vmem:[#allocation4 + $0x28] sm:$0xff]  ;;  %v3671_v63 = vld [vmem:[#allocation4 + $0x30] sm:$0xff] }
  0x57   :  { %515 = vmatpush.msrb.mxu0 %v3526_v14  ;;  %535 = vmatpush.msrb.mxu1 %v3528_v15  ;;  %5191 = vst [vmem:[#allocation28_spill] sm:$0xff] %v3627_v49  ;;  %v3673_v0 = vld [vmem:[#allocation4 + $0x38] sm:$0xff]  ;;  %v207_v13 = vld [vmem:[%s5183_s21 + $0x28] sm:$0xff] }
  0x58   :  { %555 = vmatpush.msrb.mxu2 %v3532_v16  ;;  %575 = vmatpush.msrb.mxu3 %v3534_v17  ;;  %5192 = vst [vmem:[#allocation29_spill] sm:$0xff] %v3632_v50 }
  0x59   :  { %516 = vmatpush.msrb.mxu0 %v3536_v18  ;;  %536 = vmatpush.msrb.mxu1 %v3538_v19  ;;  %5193 = vst [vmem:[#allocation30_spill] sm:$0xff] %v3634_v51 }
  0x5a   :  { %556 = vmatpush.msrb.mxu2 %v3542_v20  ;;  %576 = vmatpush.msrb.mxu3 %v3544_v21  ;;  %5194 = vst [vmem:[#allocation31_spill] sm:$0xff] %v3643_v53 }
  0x5b   :  { %517 = vmatpush.msrb.mxu0 %v3547_v22  ;;  %537 = vmatpush.msrb.mxu1 %v3549_v23  ;;  %5195 = vst [vmem:[#allocation32_spill] sm:$0xff] %v3645_v54 }
  0x5c   :  { %557 = vmatpush.msrb.mxu2 %v3554_v24  ;;  %577 = vmatpush.msrb.mxu3 %v3556_v25  ;;  %5196 = vst [vmem:[#allocation33_spill] sm:$0xff] %v3649_v55 }
  0x5d   :  { %370 = vmatmul.f32.gmra.mxu0 %v204_v26  ;;  %411 = vmatmul.f32.gmra.mxu1 %v204_v26  ;;  %5197 = vst [vmem:[#allocation34_spill] sm:$0xff] %v3651_v56 }
  0x5e   :  { %452 = vmatmul.f32.gmra.mxu2 %v204_v26  ;;  %493 = vmatmul.f32.gmra.mxu3 %v204_v26  ;;  %5198 = vst [vmem:[#allocation35_spill] sm:$0xff] %v3653_v57  ;;  %v3682_v26 = vld [vmem:[#allocation4] sm:$0xff] }
  0x5f   :  { %518 = vmatpush.msrb.mxu0 %v3565_v27  ;;  %538 = vmatpush.msrb.mxu1 %v3567_v28  ;;  %5199 = vst [vmem:[#allocation36_spill] sm:$0xff] %v3655_v58 }
  0x60   :  { %558 = vmatpush.msrb.mxu2 %v3571_v29  ;;  %578 = vmatpush.msrb.mxu3 %v3573_v30  ;;  %5200 = vst [vmem:[#allocation37_spill] sm:$0xff] %v3659_v59 }
  0x61   :  { %519 = vmatpush.msrb.mxu0 %v3575_v31  ;;  %539 = vmatpush.msrb.mxu1 %v3577_v32  ;;  %5201 = vst [vmem:[#allocation38_spill] sm:$0xff] %v3661_v60 }
  0x62   :  { %559 = vmatpush.msrb.mxu2 %v3581_v33  ;;  %579 = vmatpush.msrb.mxu3 %v3583_v34  ;;  %5202 = vst [vmem:[#allocation39_spill] sm:$0xff] %v3664_v61 }
  0x63   :  { %520 = vmatpush.msrb.mxu0 %v3586_v35  ;;  %540 = vmatpush.msrb.mxu1 %v3588_v36  ;;  %5203 = vst [vmem:[#allocation40_spill] sm:$0xff] %v3666_v62 }
  0x64   :  { %560 = vmatpush.msrb.mxu2 %v3593_v37  ;;  %580 = vmatpush.msrb.mxu3 %v3595_v38  ;;  %5204 = vst [vmem:[#allocation41_spill] sm:$0xff] %v3671_v63 }
  0x65   :  { %373 = vmatmul.f32.gmra.mxu0 %v205_v39  ;;  %414 = vmatmul.f32.gmra.mxu1 %v205_v39  ;;  %5205 = vst [vmem:[#allocation42_spill] sm:$0xff] %v3673_v0 }
  0x66   :  { %455 = vmatmul.f32.gmra.mxu2 %v205_v39  ;;  %496 = vmatmul.f32.gmra.mxu3 %v205_v39  ;;  %5206 = vst [vmem:[#allocation43_spill] sm:$0xff] %v3682_v26  ;;  %v3684_v39 = vld [vmem:[#allocation4 + $0x8] sm:$0xff] }
  0x67   :  { %521 = vmatpush.msrb.mxu0 %v3604_v40  ;;  %541 = vmatpush.msrb.mxu1 %v3606_v41  ;;  %5207 = vst [vmem:[#allocation44_spill] sm:$0xff] %v3684_v39 }
  0x68   :  { %561 = vmatpush.msrb.mxu2 %v3610_v42  ;;  %581 = vmatpush.msrb.mxu3 %v3612_v43 }
  0x69   :  { %522 = vmatpush.msrb.mxu0 %v3614_v44  ;;  %542 = vmatpush.msrb.mxu1 %v3616_v45 }
  0x6a   :  { %562 = vmatpush.msrb.mxu2 %v3620_v46  ;;  %582 = vmatpush.msrb.mxu3 %v3622_v47 }
  0x6b   :  { %523 = vmatpush.msrb.mxu0 %v3625_v48  ;;  %543 = vmatpush.msrb.mxu1 %v3627_v49 }
  0x6c   :  { %563 = vmatpush.msrb.mxu2 %v3632_v50  ;;  %583 = vmatpush.msrb.mxu3 %v3634_v51 }
  0x6d   :  { %376 = vmatmul.f32.gmra.mxu0 %v206_v52  ;;  %417 = vmatmul.f32.gmra.mxu1 %v206_v52 }
  0x6e   :  { %458 = vmatmul.f32.gmra.mxu2 %v206_v52  ;;  %499 = vmatmul.f32.gmra.mxu3 %v206_v52  ;;  %v3688_v52 = vld [vmem:[#allocation4 + $0x10] sm:$0xff] }
  0x6f   :  { %524 = vmatpush.msrb.mxu0 %v3643_v53  ;;  %544 = vmatpush.msrb.mxu1 %v3645_v54  ;;  %5208 = vst [vmem:[#allocation45_spill] sm:$0xff] %v3688_v52 }
  0x70   :  { %564 = vmatpush.msrb.mxu2 %v3649_v55  ;;  %584 = vmatpush.msrb.mxu3 %v3651_v56 }
  0x71   :  { %525 = vmatpush.msrb.mxu0 %v3653_v57  ;;  %545 = vmatpush.msrb.mxu1 %v3655_v58  ;;  %v3690_v58 = vld [vmem:[#allocation4 + $0x18] sm:$0xff] }
  0x72   :  { %565 = vmatpush.msrb.mxu2 %v3659_v59  ;;  %585 = vmatpush.msrb.mxu3 %v3661_v60  ;;  %5209 = vst [vmem:[#allocation46_spill] sm:$0xff] %v3690_v58 }
  0x73   :  { %526 = vmatpush.msrb.mxu0 %v3664_v61  ;;  %546 = vmatpush.msrb.mxu1 %v3666_v62 }
  0x74   :  { %566 = vmatpush.msrb.mxu2 %v3671_v63  ;;  %586 = vmatpush.msrb.mxu3 %v3673_v0  ;;  %v208_v0 = vld [vmem:[%s5183_s21 + $0x30] sm:$0xff] }
  0x75   :  { %379 = vmatmul.f32.gmra.mxu0 %v207_v13  ;;  %420 = vmatmul.f32.gmra.mxu1 %v207_v13 }
  0x76   :  { %461 = vmatmul.f32.gmra.mxu2 %v207_v13  ;;  %502 = vmatmul.f32.gmra.mxu3 %v207_v13  ;;  %v209_v13 = vld [vmem:[%s5183_s21 + $0x38] sm:$0xff] }
  0x77   :  { %527 = vmatpush.msrb.mxu0 %v3682_v26  ;;  %547 = vmatpush.msrb.mxu1 %v3684_v39 }
  0x78   :  { %567 = vmatpush.msrb.mxu2 %v3688_v52  ;;  %587 = vmatpush.msrb.mxu3 %v3690_v58 }
  0x79   :  { %659 = vmatpush.msra.mxu0 %v3489_v1  ;;  %679 = vmatpush.msra.mxu1 %v3491_v2 }
  0x7a   :  { %699 = vmatpush.msra.mxu2 %v3493_v3  ;;  %719 = vmatpush.msra.mxu3 %v3495_v4 }
  0x7b   :  { %660 = vmatpush.msra.mxu0 %v3497_v5  ;;  %680 = vmatpush.msra.mxu1 %v3499_v6 }
  0x7c   :  { %700 = vmatpush.msra.mxu2 %v3503_v7  ;;  %720 = vmatpush.msra.mxu3 %v3505_v8 }
  0x7d   :  { %382 = vmatmul.f32.gmra.mxu0 %v208_v0  ;;  %423 = vmatmul.f32.gmra.mxu1 %v208_v0 }
  0x7e   :  { %464 = vmatmul.f32.gmra.mxu2 %v208_v0  ;;  %505 = vmatmul.f32.gmra.mxu3 %v208_v0  ;;  %v5053_v0 = vmov 0.0  }
  0x7f   :  { %661 = vmatpush.msra.mxu0 %v3508_v9  ;;  %681 = vmatpush.msra.mxu1 %v3510_v10 }
  0x80   :  { %701 = vmatpush.msra.mxu2 %v3515_v11  ;;  %721 = vmatpush.msra.mxu3 %v3517_v12 }
  0x81   :  { %662 = vmatpush.msra.mxu0 %v3526_v14  ;;  %682 = vmatpush.msra.mxu1 %v3528_v15 }
  0x82   :  { %702 = vmatpush.msra.mxu2 %v3532_v16  ;;  %722 = vmatpush.msra.mxu3 %v3534_v17 }
  0x83   :  { %663 = vmatpush.msra.mxu0 %v3536_v18  ;;  %683 = vmatpush.msra.mxu1 %v3538_v19 }
  0x84   :  { %703 = vmatpush.msra.mxu2 %v3542_v20  ;;  %723 = vmatpush.msra.mxu3 %v3544_v21 }
  0x85   :  { %385 = vmatmul.f32.gmra.mxu0 %v209_v13  ;;  %426 = vmatmul.f32.gmra.mxu1 %v209_v13 }
  0x86   :  { %467 = vmatmul.f32.gmra.mxu2 %v209_v13  ;;  %508 = vmatmul.f32.gmra.mxu3 %v209_v13  ;;  %v5210_v13 = vld [vmem:[#allocation36_spill] sm:$0xff] }
  0x87   :  { %664 = vmatpush.msra.mxu0 %v3547_v22  ;;  %684 = vmatpush.msra.mxu1 %v3549_v23 }
  0x88   :  { %704 = vmatpush.msra.mxu2 %v3554_v24  ;;  %724 = vmatpush.msra.mxu3 %v3556_v25 }
  0x89   :  { %665 = vmatpush.msra.mxu0 %v3565_v27  ;;  %685 = vmatpush.msra.mxu1 %v3567_v28 }
  0x8a   :  { %705 = vmatpush.msra.mxu2 %v3571_v29  ;;  %725 = vmatpush.msra.mxu3 %v3573_v30 }
  0x8b   :  { %666 = vmatpush.msra.mxu0 %v3575_v31  ;;  %686 = vmatpush.msra.mxu1 %v3577_v32 }
  0x8c   :  { %706 = vmatpush.msra.mxu2 %v3581_v33  ;;  %726 = vmatpush.msra.mxu3 %v3583_v34 }
  0x8d   :  { %528 = vmatmul.f32.vlgmr.msrb.gmra.mxu0 %v5053_v0  ;;  %548 = vmatmul.f32.vlgmr.msrb.gmra.mxu1 %v5053_v0 }
  0x8e   :  { %568 = vmatmul.f32.vlgmr.msrb.gmra.mxu2 %v5053_v0  ;;  %588 = vmatmul.f32.vlgmr.msrb.gmra.mxu3 %v5053_v0  ;;  %v5211_v0 = vld [vmem:[#allocation42_spill] sm:$0xff] }
  0x8f   :  { %667 = vmatpush.msra.mxu0 %v3586_v35  ;;  %687 = vmatpush.msra.mxu1 %v3588_v36 }
  0x90   :  { %707 = vmatpush.msra.mxu2 %v3593_v37  ;;  %727 = vmatpush.msra.mxu3 %v3595_v38 }
  0x91   :  { %668 = vmatpush.msra.mxu0 %v3604_v40  ;;  %688 = vmatpush.msra.mxu1 %v3606_v41 }
  0x92   :  { %708 = vmatpush.msra.mxu2 %v3610_v42  ;;  %728 = vmatpush.msra.mxu3 %v3612_v43 }
  0x93   :  { %669 = vmatpush.msra.mxu0 %v3614_v44  ;;  %689 = vmatpush.msra.mxu1 %v3616_v45 }
  0x94   :  { %709 = vmatpush.msra.mxu2 %v3620_v46  ;;  %729 = vmatpush.msra.mxu3 %v3622_v47 }
  0x95   :  { %670 = vmatpush.msra.mxu0 %v3625_v48  ;;  %690 = vmatpush.msra.mxu1 %v3627_v49 }
  0x96   :  { %710 = vmatpush.msra.mxu2 %v3632_v50  ;;  %730 = vmatpush.msra.mxu3 %v3634_v51 }
  0x97   :  { %671 = vmatpush.msra.mxu0 %v3643_v53  ;;  %691 = vmatpush.msra.mxu1 %v3645_v54 }
  0x98   :  { %711 = vmatpush.msra.mxu2 %v3649_v55  ;;  %731 = vmatpush.msra.mxu3 %v3651_v56 }
  0x99   :  { %672 = vmatpush.msra.mxu0 %v3653_v57  ;;  %692 = vmatpush.msra.mxu1 %v5210_v13 }
  0x9a   :  { %712 = vmatpush.msra.mxu2 %v3659_v59  ;;  %732 = vmatpush.msra.mxu3 %v3661_v60 }
  0x9b   :  { %673 = vmatpush.msra.mxu0 %v3664_v61  ;;  %693 = vmatpush.msra.mxu1 %v3666_v62 }
  0x9c   :  { %713 = vmatpush.msra.mxu2 %v3671_v63  ;;  %733 = vmatpush.msra.mxu3 %v5211_v0 }
  0x9d   :  { %674 = vmatpush.msra.mxu0 %v3682_v26  ;;  %694 = vmatpush.msra.mxu1 %v3684_v39 }
  0x9e   :  { %714 = vmatpush.msra.mxu2 %v3688_v52  ;;  %734 = vmatpush.msra.mxu3 %v3690_v58 }
  0x9f   :  { %806 = vmatpush.msrb.mxu0 %v3489_v1  ;;  %826 = vmatpush.msrb.mxu1 %v3491_v2 }
  0xa0   :  { %846 = vmatpush.msrb.mxu2 %v3493_v3  ;;  %866 = vmatpush.msrb.mxu3 %v3495_v4 }
  0xa1   :  { %807 = vmatpush.msrb.mxu0 %v3497_v5  ;;  %827 = vmatpush.msrb.mxu1 %v3499_v6 }
  0xa2   :  { %847 = vmatpush.msrb.mxu2 %v3503_v7  ;;  %867 = vmatpush.msrb.mxu3 %v3505_v8 }
  0xa3   :  { %808 = vmatpush.msrb.mxu0 %v3508_v9  ;;  %828 = vmatpush.msrb.mxu1 %v3510_v10 }
  0xa4   :  { %848 = vmatpush.msrb.mxu2 %v3515_v11  ;;  %868 = vmatpush.msrb.mxu3 %v3517_v12 }
  0xa5   :  { %809 = vmatpush.msrb.mxu0 %v3526_v14  ;;  %829 = vmatpush.msrb.mxu1 %v3528_v15 }
  0xa6   :  { %849 = vmatpush.msrb.mxu2 %v3532_v16  ;;  %869 = vmatpush.msrb.mxu3 %v3534_v17 }
  0xa7   :  { %810 = vmatpush.msrb.mxu0 %v3536_v18  ;;  %830 = vmatpush.msrb.mxu1 %v3538_v19 }
  0xa8   :  { %850 = vmatpush.msrb.mxu2 %v3542_v20  ;;  %870 = vmatpush.msrb.mxu3 %v3544_v21 }
  0xa9   :  { %811 = vmatpush.msrb.mxu0 %v3547_v22  ;;  %831 = vmatpush.msrb.mxu1 %v3549_v23 }
  0xaa   :  { %851 = vmatpush.msrb.mxu2 %v3554_v24  ;;  %871 = vmatpush.msrb.mxu3 %v3556_v25 }
  0xab   :  { %812 = vmatpush.msrb.mxu0 %v3565_v27  ;;  %832 = vmatpush.msrb.mxu1 %v3567_v28 }
  0xac   :  { %852 = vmatpush.msrb.mxu2 %v3571_v29  ;;  %872 = vmatpush.msrb.mxu3 %v3573_v30 }
  0xad   :  { %813 = vmatpush.msrb.mxu0 %v3575_v31  ;;  %833 = vmatpush.msrb.mxu1 %v3577_v32 }
  0xae   :  { %853 = vmatpush.msrb.mxu2 %v3581_v33  ;;  %873 = vmatpush.msrb.mxu3 %v3583_v34 }
  0xaf   :  { %814 = vmatpush.msrb.mxu0 %v3586_v35  ;;  %834 = vmatpush.msrb.mxu1 %v3588_v36 }
  0xb0   :  { %854 = vmatpush.msrb.mxu2 %v3593_v37  ;;  %874 = vmatpush.msrb.mxu3 %v3595_v38 }
  0xb1   :  { %815 = vmatpush.msrb.mxu0 %v3604_v40  ;;  %835 = vmatpush.msrb.mxu1 %v3606_v41 }
  0xb2   :  { %855 = vmatpush.msrb.mxu2 %v3610_v42  ;;  %875 = vmatpush.msrb.mxu3 %v3612_v43 }
  0xb3   :  { %816 = vmatpush.msrb.mxu0 %v3614_v44  ;;  %836 = vmatpush.msrb.mxu1 %v3616_v45 }
  0xb4   :  { %856 = vmatpush.msrb.mxu2 %v3620_v46  ;;  %876 = vmatpush.msrb.mxu3 %v3622_v47 }
  0xb5   :  { %817 = vmatpush.msrb.mxu0 %v3625_v48  ;;  %837 = vmatpush.msrb.mxu1 %v3627_v49 }
  0xb6   :  { %857 = vmatpush.msrb.mxu2 %v3632_v50  ;;  %877 = vmatpush.msrb.mxu3 %v3634_v51 }
  0xb7   :  { %818 = vmatpush.msrb.mxu0 %v3643_v53  ;;  %838 = vmatpush.msrb.mxu1 %v3645_v54 }
  0xb8   :  { %858 = vmatpush.msrb.mxu2 %v3649_v55  ;;  %878 = vmatpush.msrb.mxu3 %v3651_v56 }
  0xb9   :  { %819 = vmatpush.msrb.mxu0 %v3653_v57  ;;  %839 = vmatpush.msrb.mxu1 %v5210_v13 }
  0xba   :  { %859 = vmatpush.msrb.mxu2 %v3659_v59  ;;  %879 = vmatpush.msrb.mxu3 %v3661_v60 }
  0xbb   :  { %820 = vmatpush.msrb.mxu0 %v3664_v61  ;;  %840 = vmatpush.msrb.mxu1 %v3666_v62 }
  0xbc   :  { %860 = vmatpush.msrb.mxu2 %v3671_v63  ;;  %880 = vmatpush.msrb.mxu3 %v5211_v0 }
  0xbd   :  { %821 = vmatpush.msrb.mxu0 %v3682_v26  ;;  %841 = vmatpush.msrb.mxu1 %v3684_v39  ;;  %v338_v26 = vld [vmem:[%s5032_s5] sm:$0xf] }
  0xbe   :  { %861 = vmatpush.msrb.mxu2 %v3688_v52  ;;  %881 = vmatpush.msrb.mxu3 %v3690_v58  ;;  %v3845_v0 = vperm.slane %v338_v26, 2  ;;  %v3847_v39 = vperm.slane %v338_v26, 3  ;;  %v3849_v52 = vperm.slane %v338_v26, 0  ;;  %v3851_v58 = vperm.slane %v338_v26, 1 }
  0xc0   :  { %5214 = vst [vmem:[#allocation49_spill] sm:$0xff] %v3849_v52 }
  0xc1   :  { %5215 = vst [vmem:[#allocation50_spill] sm:$0xff] %v3851_v58 }
  0xca   :  { %v365_v13 = vpop.f32.mrf.mxu0  ;;  %v406_v59 = vpop.f32.mrf.mxu1 }
  0xd1   :  { %v3834_v57 = vpop.f32.mrf.mxu2  ;;  %v3836_v60 = vpop.f32.mrf.mxu3 }
  0xd2   :  { %v3838_v61 = vpop.f32.mrf.mxu0  ;;  %v3840_v62 = vpop.f32.mrf.mxu1 }
  0xd3   :  { %5212 = vst [vmem:[#allocation47_spill] sm:$0xff] %v3838_v61 }
  0xd4   :  { %5213 = vst [vmem:[#allocation48_spill] sm:$0xff] %v3840_v62 }
  0xd9   :  { %v450_v63 = vpop.f32.mrf.mxu2  ;;  %v491_v56 = vpop.f32.mrf.mxu3 }
  0xda   :  { %v3854_v55 = vadd.f32 %v450_v63, %v3845_v0  ;;  %v3857_v61 = vadd.f32 %v491_v56, %v3847_v39  ;;  %v371_v62 = vpop.f32.mrf.mxu0  ;;  %v412_v54 = vpop.f32.mrf.mxu1 }
  0xdb   :  { %v3860_v53 = vadd.f32 %v371_v62, %v3849_v52  ;;  %v3863_v51 = vadd.f32 %v412_v54, %v3851_v58 }
  0xdc   :  { %5216 = vst [vmem:[#allocation51_spill] sm:$0xff] %v3854_v55 }
  0xdd   :  { %5217 = vst [vmem:[#allocation52_spill] sm:$0xff] %v3857_v61 }
  0xde   :  { %5218 = vst [vmem:[#allocation53_spill] sm:$0xff] %v3860_v53 }
  0xdf   :  { %5219 = vst [vmem:[#allocation54_spill] sm:$0xff] %v3863_v51 }
  0xe1   :  { %v453_v50 = vpop.f32.mrf.mxu2  ;;  %v494_v49 = vpop.f32.mrf.mxu3 }
  0xe2   :  { %v3866_v26 = vadd.f32 %v453_v50, %v3845_v0  ;;  %v3869_v48 = vadd.f32 %v494_v49, %v3847_v39  ;;  %v374_v63 = vpop.f32.mrf.mxu0  ;;  %v415_v55 = vpop.f32.mrf.mxu1 }
  0xe3   :  { %v3872_v56 = vadd.f32 %v374_v63, %v3849_v52  ;;  %v3875_v61 = vadd.f32 %v415_v55, %v3851_v58 }
  0xe4   :  { %5220 = vst [vmem:[#allocation55_spill] sm:$0xff] %v3866_v26 }
  0xe5   :  { %5221 = vst [vmem:[#allocation56_spill] sm:$0xff] %v3869_v48 }
  0xe6   :  { %5222 = vst [vmem:[#allocation57_spill] sm:$0xff] %v3872_v56 }
  0xe7   :  { %5223 = vst [vmem:[#allocation58_spill] sm:$0xff] %v3875_v61 }
  0xe9   :  { %v456_v62 = vpop.f32.mrf.mxu2  ;;  %v497_v53 = vpop.f32.mrf.mxu3 }
  0xea   :  { %v3878_v54 = vadd.f32 %v456_v62, %v3845_v0  ;;  %v3881_v51 = vadd.f32 %v497_v53, %v3847_v39  ;;  %v377_v50 = vpop.f32.mrf.mxu0  ;;  %v418_v26 = vpop.f32.mrf.mxu1 }
  0xeb   :  { %v3884_v49 = vadd.f32 %v377_v50, %v3849_v52  ;;  %v3887_v48 = vadd.f32 %v418_v26, %v3851_v58 }
  0xec   :  { %5224 = vst [vmem:[#allocation59_spill] sm:$0xff] %v3878_v54 }
  0xed   :  { %5225 = vst [vmem:[#allocation60_spill] sm:$0xff] %v3881_v51 }
  0xee   :  { %5226 = vst [vmem:[#allocation61_spill] sm:$0xff] %v3884_v49 }
  0xef   :  { %5227 = vst [vmem:[#allocation62_spill] sm:$0xff] %v3887_v48 }
  0xf1   :  { %v459_v63 = vpop.f32.mrf.mxu2  ;;  %v500_v56 = vpop.f32.mrf.mxu3 }
  0xf2   :  { %v3890_v55 = vadd.f32 %v459_v63, %v3845_v0  ;;  %v3893_v61 = vadd.f32 %v500_v56, %v3847_v39  ;;  %v380_v62 = vpop.f32.mrf.mxu0  ;;  %v421_v54 = vpop.f32.mrf.mxu1 }
  0xf3   :  { %v3896_v53 = vadd.f32 %v380_v62, %v3849_v52  ;;  %v3899_v51 = vadd.f32 %v421_v54, %v3851_v58 }
  0xf4   :  { %5228 = vst [vmem:[#allocation63_spill] sm:$0xff] %v3890_v55 }
  0xf5   :  { %5229 = vst [vmem:[#allocation64_spill] sm:$0xff] %v3893_v61 }
  0xf6   :  { %5230 = vst [vmem:[#allocation65_spill] sm:$0xff] %v3896_v53 }
  0xf7   :  { %5231 = vst [vmem:[#allocation66_spill] sm:$0xff] %v3899_v51 }
  0xf9   :  { %v462_v50 = vpop.f32.mrf.mxu2  ;;  %v503_v49 = vpop.f32.mrf.mxu3 }
  0xfa   :  { %v3902_v26 = vadd.f32 %v462_v50, %v3845_v0  ;;  %v3905_v48 = vadd.f32 %v503_v49, %v3847_v39  ;;  %v383_v63 = vpop.f32.mrf.mxu0  ;;  %v424_v55 = vpop.f32.mrf.mxu1 }
  0xfb   :  { %v3908_v56 = vadd.f32 %v383_v63, %v3849_v52  ;;  %v3911_v61 = vadd.f32 %v424_v55, %v3851_v58  ;;  %v366_v63 = vadd.f32 %v365_v13, %v3849_v52  ;;  %v407_v55 = vadd.f32 %v406_v59, %v3851_v58 }
  0xfc   :  { %5232 = vst [vmem:[#allocation67_spill] sm:$0xff] %v3902_v26  ;;  %v448_v13 = vadd.f32 %v3834_v57, %v3845_v0 }
  0xfd   :  { %5233 = vst [vmem:[#allocation68_spill] sm:$0xff] %v3905_v48 }
  0xfe   :  { %5234 = vst [vmem:[#allocation69_spill] sm:$0xff] %v3908_v56 }
  0xff   :  { %5235 = vst [vmem:[#allocation70_spill] sm:$0xff] %v3911_v61 }
 0x101   :  { %v465_v62 = vpop.f32.mrf.mxu2  ;;  %v506_v53 = vpop.f32.mrf.mxu3 }
 0x102   :  { %v3914_v54 = vadd.f32 %v465_v62, %v3845_v0  ;;  %v3917_v51 = vadd.f32 %v506_v53, %v3847_v39  ;;  %v386_v50 = vpop.f32.mrf.mxu0  ;;  %v427_v26 = vpop.f32.mrf.mxu1 }
 0x103   :  { %v3920_v49 = vadd.f32 %v386_v50, %v3849_v52  ;;  %v3923_v48 = vadd.f32 %v427_v26, %v3851_v58 }
 0x104   :  { %5236 = vst [vmem:[#allocation71_spill] sm:$0xff] %v3914_v54 }
 0x105   :  { %5237 = vst [vmem:[#allocation72_spill] sm:$0xff] %v3917_v51 }
 0x106   :  { %5238 = vst [vmem:[#allocation73_spill] sm:$0xff] %v3920_v49 }
 0x107   :  { %5239 = vst [vmem:[#allocation74_spill] sm:$0xff] %v3923_v48 }
 0x109   :  { %v468_v61 = vpop.f32.mrf.mxu2  ;;  %v509_v56 = vpop.f32.mrf.mxu3 }
 0x10a   :  { %v3928_v62 = vadd.f32 %v468_v61, %v3845_v0  ;;  %v3931_v53 = vadd.f32 %v509_v56, %v3847_v39  ;;  %v529_v51 = vpop.f32.mrf.mxu0  ;;  %v549_v54 = vpop.f32.mrf.mxu1 }
 0x10b   :  { %v592_v47 = vadd.f32 %v529_v51, %v366_v63  ;;  %v593_v50 = vadd.f32 %v549_v54, %v407_v55 }
 0x10c   :  { %5240 = vst [vmem:[#allocation75_spill] sm:$0xff] %v3928_v62 }
 0x10d   :  { %5241 = vst [vmem:[#allocation76_spill] sm:$0xff] %v3931_v53  ;;  %v2782_v49 = vmul.f32 -1.442695, %v592_v47  ;;  %v2783_v46 = vmul.f32 -1.442695, %v593_v50  ;;  %v489_v47 = vadd.f32 %v3836_v60, %v3847_v39 }
 0x10f   :  { %2836 = vpow2.f32 %v2782_v49 }
 0x110   :  { %2838 = vpow2.f32 %v2783_v46 }
 0x111   :  { %v569_v59 = vpop.f32.mrf.mxu2  ;;  %v589_v53 = vpop.f32.mrf.mxu3 }
 0x112   :  { %v594_v26 = vadd.f32 %v569_v59, %v448_v13  ;;  %v595_v63 = vadd.f32 %v589_v53, %v489_v47 }
 0x114   :  { %v2784_v48 = vmul.f32 -1.442695, %v594_v26 }
 0x115   :  { %v2837_v58 = vpop.eup %2836 }
 0x116   :  { %v2839_v61 = vpop.eup %2838  ;;  %v605_v62 = vadd.f32 1.0, %v2837_v58  ;;  %2840 = vpow2.f32 %v2784_v48 }
 0x117   :  { %v606_v56 = vadd.f32 1.0, %v2839_v61 }
 0x118   :  { %2842 = vrcp.f32 %v605_v62  ;;  %v619_v13 = vand.u32 2147483648, %v605_v62  ;;  %v617_v59 = vand.u32 2147483647, %v605_v62  ;;  %vm613_vm2 = vweird.f32 %v605_v62 }
 0x119   :  { %2844 = vrcp.f32 %v606_v56  ;;  %v634_v48 = vand.u32 2147483648, %v606_v56  ;;  %v632_v61 = vand.u32 2147483647, %v606_v56  ;;  %vm628_vm3 = vweird.f32 %v606_v56 }
 0x11a   :  { %v620_v53 = vor.u32 1.1754944e-38, %v619_v13  ;;  %vm618_vm5 = vcmp.eq.f32.partialorder %v617_v59, 8.507059e+37 }
 0x11b   :  { %v635_v47 = vor.u32 1.1754944e-38, %v634_v48  ;;  %vm633_vm7 = vcmp.eq.f32.partialorder %v632_v61, 8.507059e+37 }
 0x11c   :  { %v2841_v51 = vpop.eup %2840 }
 0x11d   :  { %v607_v54 = vadd.f32 1.0, %v2841_v51 }
 0x11e   :  { %v2843_v49 = vpop.eup %2842 }
 0x11f   :  { %v2845_v57 = vpop.eup %2844  ;;  %v609_v46 = vmul.f32 %v2843_v49, %v605_v62  ;;  %2846 = vrcp.f32 %v607_v54  ;;  %vm614_vm0 = vweird.f32 %v2843_v49  ;;  %vm643_vm9 = vweird.f32 %v607_v54 }
 0x120   :  { %v624_v0 = vmul.f32 %v2845_v57, %v606_v56  ;;  %2848 = vtanh.f32 %v595_v63  ;;  %vm629_vm1 = vweird.f32 %v2845_v57  ;;  %vm615_vm4 = vmor %vm613_vm2, %vm614_vm0  ;;  %v649_v56 = vand.u32 2147483648, %v607_v54 }
 0x121   :  { %v610_v55 = vsub.f32 1.0, %v609_v46  ;;  %vm630_vm6 = vmor %vm628_vm3, %vm629_vm1 }
 0x122   :  { %v625_v50 = vsub.f32 1.0, %v624_v0  ;;  %v650_v48 = vor.u32 1.1754944e-38, %v649_v56 }
 0x123   :  { %v611_v58 = vmul.f32 %v2843_v49, %v610_v55 }
 0x124   :  { %v626_v26 = vmul.f32 %v2845_v57, %v625_v50 }
 0x125   :  { %v2847_v52 = vpop.eup %2846  ;;  %v612_v60 = vadd.f32 %v2843_v49, %v611_v58 }
 0x126   :  { %v639_v39 = vmul.f32 %v2847_v52, %v607_v54  ;;  %v627_v51 = vadd.f32 %v2845_v57, %v626_v26  ;;  %v2849_v63 = vpop.eup %2848  ;;  %vm644_vm8 = vweird.f32 %v2847_v52 }
 0x127   :  { %v616_v46 = vsel %vm615_vm4, %v2843_v49, %v612_v60  ;;  %v647_v49 = vand.u32 2147483647, %v607_v54  ;;  %vm645_vm10 = vmor %vm643_vm9, %vm644_vm8 }
 0x128   :  { %v640_v0 = vsub.f32 1.0, %v639_v39  ;;  %v621_v55 = vsel %vm618_vm5, %v620_v53, %v616_v46  ;;  %v631_v45 = vsel %vm630_vm6, %v2845_v57, %v627_v51  ;;  %v5273_v46 = vld [vmem:[#allocation52_spill] sm:$0xff] }
 0x129   :  { %v636_v50 = vsel %vm633_vm7, %v635_v47, %v631_v45  ;;  %v655_v44 = vmul.f32 %v2849_v63, %v621_v55  ;;  %vm648_vm11 = vcmp.eq.f32.partialorder %v647_v49, 8.507059e+37 }
 0x12a   :  { %v654_v43 = vmul.f32 0.0, %v636_v50  ;;  %v641_v42 = vmul.f32 %v2847_v52, %v640_v0 }
 0x12c   :  { %v3937_v58 = vadd.f32 %v655_v44, %v654_v43  ;;  %v642_v62 = vadd.f32 %v2847_v52, %v641_v42  ;;  %v5272_v43 = vld [vmem:[#allocation51_spill] sm:$0xff] }
 0x12e   :  { %2850 = vtanh.f32 %v3937_v58  ;;  %v646_v13 = vsel %vm645_vm10, %v2847_v52, %v642_v62 }
 0x12f   :  { %v651_v57 = vsel %vm648_vm11, %v650_v48, %v646_v13 }
 0x134   :  { %v2851_v59 = vpop.eup %2850 }
 0x135   :  { %v658_v26 = vmul.f32 %v2851_v59, %v651_v57 }
 0x137   :  { %675 = vmatmul.f32.vlgmr.msra.gmra.mxu0 %v658_v26  ;;  %695 = vmatmul.f32.vlgmr.msra.gmra.mxu1 %v658_v26 }
 0x138   :  { %715 = vmatmul.f32.vlgmr.msra.gmra.mxu2 %v658_v26  ;;  %735 = vmatmul.f32.vlgmr.msra.gmra.mxu3 %v658_v26 }
 0x139   :  { %953 = vmatpush.msra.mxu0 %v3489_v1  ;;  %973 = vmatpush.msra.mxu1 %v3491_v2  ;;  %v5242_v1 = vld [vmem:[#allocation21_spill] sm:$0xff]  ;;  %v5243_v2 = vld [vmem:[#allocation22_spill] sm:$0xff] }
 0x13a   :  { %993 = vmatpush.msra.mxu2 %v3493_v3  ;;  %1013 = vmatpush.msra.mxu3 %v3495_v4  ;;  %v5244_v3 = vld [vmem:[#allocation23_spill] sm:$0xff]  ;;  %v5245_v4 = vld [vmem:[#allocation24_spill] sm:$0xff] }
 0x13b   :  { %954 = vmatpush.msra.mxu0 %v3497_v5  ;;  %974 = vmatpush.msra.mxu1 %v3499_v6  ;;  %v5246_v5 = vld [vmem:[#allocation25_spill] sm:$0xff]  ;;  %v5247_v6 = vld [vmem:[#allocation26_spill] sm:$0xff] }
 0x13c   :  { %994 = vmatpush.msra.mxu2 %v3503_v7  ;;  %1014 = vmatpush.msra.mxu3 %v3505_v8  ;;  %v5248_v7 = vld [vmem:[#allocation27_spill] sm:$0xff]  ;;  %v5249_v8 = vld [vmem:[#allocation28_spill] sm:$0xff] }
 0x13d   :  { %955 = vmatpush.msra.mxu0 %v3508_v9  ;;  %975 = vmatpush.msra.mxu1 %v3510_v10  ;;  %v5250_v9 = vld [vmem:[#allocation29_spill] sm:$0xff]  ;;  %v5251_v10 = vld [vmem:[#allocation30_spill] sm:$0xff] }
 0x13e   :  { %995 = vmatpush.msra.mxu2 %v3515_v11  ;;  %1015 = vmatpush.msra.mxu3 %v3517_v12  ;;  %v5252_v11 = vld [vmem:[#allocation31_spill] sm:$0xff]  ;;  %v5253_v12 = vld [vmem:[#allocation32_spill] sm:$0xff] }
 0x13f   :  { %956 = vmatpush.msra.mxu0 %v3526_v14  ;;  %976 = vmatpush.msra.mxu1 %v3528_v15  ;;  %v5254_v14 = vld [vmem:[#allocation33_spill] sm:$0xff]  ;;  %v5255_v15 = vld [vmem:[#allocation34_spill] sm:$0xff] }
 0x140   :  { %996 = vmatpush.msra.mxu2 %v3532_v16  ;;  %1016 = vmatpush.msra.mxu3 %v3534_v17  ;;  %v5256_v16 = vld [vmem:[#allocation35_spill] sm:$0xff]  ;;  %v5257_v17 = vld [vmem:[#allocation36_spill] sm:$0xff] }
 0x141   :  { %957 = vmatpush.msra.mxu0 %v3536_v18  ;;  %977 = vmatpush.msra.mxu1 %v3538_v19  ;;  %v5258_v18 = vld [vmem:[#allocation37_spill] sm:$0xff]  ;;  %v5259_v19 = vld [vmem:[#allocation38_spill] sm:$0xff] }
 0x142   :  { %997 = vmatpush.msra.mxu2 %v3542_v20  ;;  %1017 = vmatpush.msra.mxu3 %v3544_v21  ;;  %v5260_v20 = vld [vmem:[#allocation39_spill] sm:$0xff]  ;;  %v5261_v21 = vld [vmem:[#allocation40_spill] sm:$0xff] }
 0x143   :  { %958 = vmatpush.msra.mxu0 %v3547_v22  ;;  %978 = vmatpush.msra.mxu1 %v3549_v23  ;;  %v5262_v22 = vld [vmem:[#allocation41_spill] sm:$0xff]  ;;  %v5263_v23 = vld [vmem:[#allocation42_spill] sm:$0xff] }
 0x144   :  { %998 = vmatpush.msra.mxu2 %v3554_v24  ;;  %1018 = vmatpush.msra.mxu3 %v3556_v25  ;;  %v5264_v24 = vld [vmem:[#allocation43_spill] sm:$0xff]  ;;  %v5265_v25 = vld [vmem:[#allocation44_spill] sm:$0xff] }
 0x145   :  { %959 = vmatpush.msra.mxu0 %v3565_v27  ;;  %979 = vmatpush.msra.mxu1 %v3567_v28  ;;  %v5266_v27 = vld [vmem:[#allocation45_spill] sm:$0xff]  ;;  %v5267_v28 = vld [vmem:[#allocation46_spill] sm:$0xff] }
 0x146   :  { %999 = vmatpush.msra.mxu2 %v3571_v29  ;;  %1019 = vmatpush.msra.mxu3 %v3573_v30  ;;  %v5268_v29 = vld [vmem:[#allocation49_spill] sm:$0xff]  ;;  %v5269_v30 = vld [vmem:[#allocation47_spill] sm:$0xff] }
 0x147   :  { %960 = vmatpush.msra.mxu0 %v3575_v31  ;;  %980 = vmatpush.msra.mxu1 %v3577_v32  ;;  %v369_v31 = vadd.f32 %v5269_v30, %v5268_v29  ;;  %v5270_v32 = vld [vmem:[#allocation50_spill] sm:$0xff] }
 0x148   :  { %1000 = vmatpush.msra.mxu2 %v3581_v33  ;;  %1020 = vmatpush.msra.mxu3 %v3583_v34  ;;  %v5271_v33 = vld [vmem:[#allocation48_spill] sm:$0xff] }
 0x149   :  { %961 = vmatpush.msra.mxu0 %v3586_v35  ;;  %981 = vmatpush.msra.mxu1 %v3588_v36  ;;  %v410_v34 = vadd.f32 %v5271_v33, %v5270_v32  ;;  %v4017_v33 = vld [vmem:[#allocation4 + $0x1e8] sm:$0xff] }
 0x14a   :  { %1001 = vmatpush.msra.mxu2 %v3593_v37  ;;  %1021 = vmatpush.msra.mxu3 %v3595_v38 }
 0x14b   :  { %962 = vmatpush.msra.mxu0 %v3604_v40  ;;  %982 = vmatpush.msra.mxu1 %v3606_v41 }
 0x14c   :  { %1002 = vmatpush.msra.mxu2 %v5242_v1  ;;  %1022 = vmatpush.msra.mxu3 %v5243_v2 }
 0x14d   :  { %963 = vmatpush.msra.mxu0 %v5244_v3  ;;  %983 = vmatpush.msra.mxu1 %v5245_v4 }
 0x14e   :  { %1003 = vmatpush.msra.mxu2 %v5246_v5  ;;  %1023 = vmatpush.msra.mxu3 %v5247_v6 }
 0x14f   :  { %964 = vmatpush.msra.mxu0 %v5248_v7  ;;  %984 = vmatpush.msra.mxu1 %v5249_v8 }
 0x150   :  { %1004 = vmatpush.msra.mxu2 %v5250_v9  ;;  %1024 = vmatpush.msra.mxu3 %v5251_v10 }
 0x151   :  { %965 = vmatpush.msra.mxu0 %v5252_v11  ;;  %985 = vmatpush.msra.mxu1 %v5253_v12 }
 0x152   :  { %1005 = vmatpush.msra.mxu2 %v5254_v14  ;;  %1025 = vmatpush.msra.mxu3 %v5255_v15 }
 0x153   :  { %966 = vmatpush.msra.mxu0 %v5256_v16  ;;  %986 = vmatpush.msra.mxu1 %v5257_v17 }
 0x154   :  { %1006 = vmatpush.msra.mxu2 %v5258_v18  ;;  %1026 = vmatpush.msra.mxu3 %v5259_v19 }
 0x155   :  { %967 = vmatpush.msra.mxu0 %v5260_v20  ;;  %987 = vmatpush.msra.mxu1 %v5261_v21 }
 0x156   :  { %1007 = vmatpush.msra.mxu2 %v5262_v22  ;;  %1027 = vmatpush.msra.mxu3 %v5263_v23 }
 0x157   :  { %968 = vmatpush.msra.mxu0 %v5264_v24  ;;  %988 = vmatpush.msra.mxu1 %v5265_v25 }
 0x158   :  { %1008 = vmatpush.msra.mxu2 %v5266_v27  ;;  %1028 = vmatpush.msra.mxu3 %v5267_v28 }
 0x1b4   :  { %v676_v35 = vpop.f32.mrf.mxu0  ;;  %v696_v36 = vpop.f32.mrf.mxu1 }
 0x1b5   :  { %v739_v37 = vadd.f32 %v676_v35, %v369_v31  ;;  %v740_v38 = vadd.f32 %v696_v36, %v410_v34  ;;  %v4020_v34 = vld [vmem:[#allocation4 + $0x1f0] sm:$0xff]  ;;  %v4023_v35 = vld [vmem:[#allocation4 + $0x1f8] sm:$0xff]  ;;  %v4026_v36 = vld [vmem:[#allocation4 + $0x1c0] sm:$0xff] }
 0x1b7   :  { %v2785_v40 = vmul.f32 -1.442695, %v739_v37  ;;  %v2786_v41 = vmul.f32 -1.442695, %v740_v38  ;;  %v4029_v37 = vld [vmem:[#allocation4 + $0x1c8] sm:$0xff]  ;;  %v4032_v38 = vld [vmem:[#allocation4 + $0x1d0] sm:$0xff] }
 0x1b9   :  { %2852 = vpow2.f32 %v2785_v40  ;;  %v4035_v40 = vld [vmem:[#allocation4 + $0x1d8] sm:$0xff] }
 0x1ba   :  { %2854 = vpow2.f32 %v2786_v41  ;;  %v4038_v41 = vld [vmem:[#allocation4 + $0x1a0] sm:$0xff] }
 0x1bb   :  { %v716_v42 = vpop.f32.mrf.mxu2  ;;  %v736_v39 = vpop.f32.mrf.mxu3 }
 0x1bc   :  { %v741_v44 = vadd.f32 %v716_v42, %v5272_v43  ;;  %v742_v63 = vadd.f32 %v736_v39, %v5273_v46  ;;  %v4041_v42 = vld [vmem:[#allocation4 + $0x1a8] sm:$0xff]  ;;  %v4044_v43 = vld [vmem:[#allocation4 + $0x1b0] sm:$0xff] }
 0x1bd   :  { %v4065_v39 = vld [vmem:[#allocation4 + $0x168] sm:$0xff] }
 0x1be   :  { %v2787_v45 = vmul.f32 -1.442695, %v741_v44  ;;  %v4047_v44 = vld [vmem:[#allocation4 + $0x1b8] sm:$0xff]  ;;  %v4077_v46 = vld [vmem:[#allocation4 + $0x148] sm:$0xff] }
 0x1bf   :  { %v2853_v52 = vpop.eup %2852 }
 0x1c0   :  { %v2855_v54 = vpop.eup %2854  ;;  %v752_v61 = vadd.f32 1.0, %v2853_v52  ;;  %2856 = vpow2.f32 %v2787_v45  ;;  %v4050_v45 = vld [vmem:[#allocation4 + $0x180] sm:$0xff]  ;;  %v4053_v52 = vld [vmem:[#allocation4 + $0x188] sm:$0xff] }
 0x1c1   :  { %v753_v60 = vadd.f32 1.0, %v2855_v54  ;;  %v4056_v54 = vld [vmem:[#allocation4 + $0x190] sm:$0xff] }
 0x1c2   :  { %2858 = vrcp.f32 %v752_v61  ;;  %v766_v49 = vand.u32 2147483648, %v752_v61  ;;  %v764_v59 = vand.u32 2147483647, %v752_v61  ;;  %vm760_vm14 = vweird.f32 %v752_v61 }
 0x1c3   :  { %2860 = vrcp.f32 %v753_v60  ;;  %v781_v13 = vand.u32 2147483648, %v753_v60  ;;  %v779_v26 = vand.u32 2147483647, %v753_v60  ;;  %vm775_vm15 = vweird.f32 %v753_v60 }
 0x1c4   :  { %v767_v4 = vor.u32 1.1754944e-38, %v766_v49  ;;  %vm765_vm2 = vcmp.eq.f32.partialorder %v764_v59, 8.507059e+37  ;;  %v4098_v49 = vld [vmem:[#allocation4 + $0x100] sm:$0xff]  ;;  %v4107_v59 = vld [vmem:[#allocation4 + $0x118] sm:$0xff] }
 0x1c5   :  { %v782_v6 = vor.u32 1.1754944e-38, %v781_v13  ;;  %vm780_vm3 = vcmp.eq.f32.partialorder %v779_v26, 8.507059e+37  ;;  %v4101_v13 = vld [vmem:[#allocation4 + $0x108] sm:$0xff] }
 0x1c6   :  { %v2857_v53 = vpop.eup %2856  ;;  %v4113_v26 = vld [vmem:[#allocation4 + $0xe8] sm:$0xff] }
 0x1c7   :  { %v754_v51 = vadd.f32 1.0, %v2857_v53  ;;  %v4068_v53 = vld [vmem:[#allocation4 + $0x170] sm:$0xff] }
 0x1c8   :  { %v2859_v47 = vpop.eup %2858 }
 0x1c9   :  { %v2861_v0 = vpop.eup %2860  ;;  %v756_v55 = vmul.f32 %v2859_v47, %v752_v61  ;;  %2862 = vrcp.f32 %v754_v51  ;;  %vm761_vm12 = vweird.f32 %v2859_v47  ;;  %v796_v19 = vand.u32 2147483648, %v754_v51  ;;  %v4059_v61 = vld [vmem:[#allocation4 + $0x198] sm:$0xff] }
 0x1ca   :  { %v771_v50 = vmul.f32 %v2861_v0, %v753_v60  ;;  %2864 = vtanh.f32 %v742_v63  ;;  %vm776_vm13 = vweird.f32 %v2861_v0  ;;  %vm762_vm0 = vmor %vm760_vm14, %vm761_vm12  ;;  %vm790_vm5 = vweird.f32 %v754_v51  ;;  %v4062_v60 = vld [vmem:[#allocation4 + $0x160] sm:$0xff]  ;;  %v4080_v63 = vld [vmem:[#allocation4 + $0x150] sm:$0xff] }
 0x1cb   :  { %v757_v62 = vsub.f32 1.0, %v756_v55  ;;  %vm777_vm1 = vmor %vm775_vm15, %vm776_vm13  ;;  %v794_v20 = vand.u32 2147483647, %v754_v51  ;;  %v797_v29 = vor.u32 1.1754944e-38, %v796_v19  ;;  %v4086_v55 = vld [vmem:[#allocation4 + $0x120] sm:$0xff]  ;;  %v4164_v19 = vld [vmem:[#allocation4 + $0x70] sm:$0xff] }
 0x1cc   :  { %v772_v56 = vsub.f32 1.0, %v771_v50  ;;  %v4089_v50 = vld [vmem:[#allocation4 + $0x128] sm:$0xff]  ;;  %5286 = vst [vmem:[#allocation33_spill] sm:$0xff] %v4164_v19 }
 0x1cd   :  { %v758_v48 = vmul.f32 %v2859_v47, %v757_v62  ;;  %vm795_vm7 = vcmp.eq.f32.partialorder %v794_v20, 8.507059e+37  ;;  %v4092_v62 = vld [vmem:[#allocation4 + $0x130] sm:$0xff]  ;;  %v4167_v20 = vld [vmem:[#allocation4 + $0x78] sm:$0xff] }
 0x1ce   :  { %v773_v57 = vmul.f32 %v2861_v0, %v772_v56  ;;  %v4095_v56 = vld [vmem:[#allocation4 + $0x138] sm:$0xff]  ;;  %5287 = vst [vmem:[#allocation34_spill] sm:$0xff] %v4167_v20 }
 0x1cf   :  { %v2863_v1 = vpop.eup %2862  ;;  %v759_v2 = vadd.f32 %v2859_v47, %v758_v48  ;;  %v4104_v48 = vld [vmem:[#allocation4 + $0x110] sm:$0xff] }
 0x1d0   :  { %v786_v3 = vmul.f32 %v2863_v1, %v754_v51  ;;  %v774_v5 = vadd.f32 %v2861_v0, %v773_v57  ;;  %v2865_v8 = vpop.eup %2864  ;;  %vm791_vm4 = vweird.f32 %v2863_v1  ;;  %v4071_v51 = vld [vmem:[#allocation4 + $0x178] sm:$0xff]  ;;  %v4110_v57 = vld [vmem:[#allocation4 + $0xe0] sm:$0xff] }
 0x1d1   :  { %v763_v7 = vsel %vm762_vm0, %v2859_v47, %v759_v2  ;;  %vm792_vm6 = vmor %vm790_vm5, %vm791_vm4  ;;  %v4074_v47 = vld [vmem:[#allocation4 + $0x140] sm:$0xff]  ;;  %v4119_v2 = vld [vmem:[#allocation4 + $0xf8] sm:$0xff] }
 0x1d2   :  { %v787_v9 = vsub.f32 1.0, %v786_v3  ;;  %v768_v10 = vsel %vm765_vm2, %v767_v4, %v763_v7  ;;  %v778_v11 = vsel %vm777_vm1, %v2861_v0, %v774_v5  ;;  %v4083_v0 = vld [vmem:[#allocation4 + $0x158] sm:$0xff]  ;;  %v4122_v3 = vld [vmem:[#allocation4 + $0xc0] sm:$0xff]  ;;  %v4125_v4 = vld [vmem:[#allocation4 + $0xc8] sm:$0xff] }
 0x1d3   :  { %v783_v12 = vsel %vm780_vm3, %v782_v6, %v778_v11  ;;  %v802_v14 = vmul.f32 %v2865_v8, %v768_v10  ;;  %v4128_v5 = vld [vmem:[#allocation4 + $0xd0] sm:$0xff]  ;;  %v4131_v6 = vld [vmem:[#allocation4 + $0xd8] sm:$0xff]  ;;  %v4134_v7 = vld [vmem:[#allocation4 + $0xa0] sm:$0xff] }
 0x1d4   :  { %v801_v15 = vmul.f32 %v783_v12, %v3937_v58  ;;  %v788_v16 = vmul.f32 %v2863_v1, %v787_v9  ;;  %v4014_v58 = vld [vmem:[#allocation4 + $0x1e0] sm:$0xff]  ;;  %5274 = vst [vmem:[#allocation21_spill] sm:$0xff] %v4128_v5  ;;  %v4137_v8 = vld [vmem:[#allocation4 + $0xa8] sm:$0xff]  ;;  %v4140_v9 = vld [vmem:[#allocation4 + $0xb0] sm:$0xff] }
 0x1d5   :  { %5275 = vst [vmem:[#allocation22_spill] sm:$0xff] %v4131_v6  ;;  %v4143_v10 = vld [vmem:[#allocation4 + $0xb8] sm:$0xff]  ;;  %v4146_v11 = vld [vmem:[#allocation4 + $0x80] sm:$0xff]  ;;  %v4149_v12 = vld [vmem:[#allocation4 + $0x88] sm:$0xff] }
 0x1d6   :  { %v4011_v17 = vadd.f32 %v802_v14, %v801_v15  ;;  %v789_v18 = vadd.f32 %v2863_v1, %v788_v16  ;;  %5276 = vst [vmem:[#allocation23_spill] sm:$0xff] %v4134_v7  ;;  %v4152_v14 = vld [vmem:[#allocation4 + $0x90] sm:$0xff]  ;;  %v4155_v15 = vld [vmem:[#allocation4 + $0x98] sm:$0xff]  ;;  %v4158_v16 = vld [vmem:[#allocation4 + $0x60] sm:$0xff] }
 0x1d7   :  { %5277 = vst [vmem:[#allocation24_spill] sm:$0xff] %v4137_v8 }
 0x1d8   :  { %2866 = vtanh.f32 %v4011_v17  ;;  %v793_v21 = vsel %vm792_vm6, %v2863_v1, %v789_v18  ;;  %v4116_v1 = vld [vmem:[#allocation4 + $0xf0] sm:$0xff]  ;;  %5278 = vst [vmem:[#allocation25_spill] sm:$0xff] %v4140_v9  ;;  %v4161_v18 = vld [vmem:[#allocation4 + $0x68] sm:$0xff] }
 0x1d9   :  { %v798_v31 = vsel %vm795_vm7, %v797_v29, %v793_v21  ;;  %5279 = vst [vmem:[#allocation26_spill] sm:$0xff] %v4143_v10  ;;  %v4170_v21 = vld [vmem:[#allocation4 + $0x40] sm:$0xff]  ;;  %v4173_v29 = vld [vmem:[#allocation4 + $0x48] sm:$0xff] }
 0x1da   :  { %5280 = vst [vmem:[#allocation27_spill] sm:$0xff] %v4146_v11 }
 0x1db   :  { %5281 = vst [vmem:[#allocation28_spill] sm:$0xff] %v4149_v12 }
 0x1dc   :  { %5282 = vst [vmem:[#allocation29_spill] sm:$0xff] %v4152_v14 }
 0x1dd   :  { %5283 = vst [vmem:[#allocation30_spill] sm:$0xff] %v4155_v15 }
 0x1de   :  { %v2867_v30 = vpop.eup %2866  ;;  %5284 = vst [vmem:[#allocation31_spill] sm:$0xff] %v4158_v16 }
 0x1df   :  { %v805_v32 = vmul.f32 %v2867_v30, %v798_v31  ;;  %5285 = vst [vmem:[#allocation32_spill] sm:$0xff] %v4161_v18  ;;  %v4176_v30 = vld [vmem:[#allocation4 + $0x50] sm:$0xff]  ;;  %v4179_v31 = vld [vmem:[#allocation4 + $0x58] sm:$0xff] }
 0x1e0   :  { %5288 = vst [vmem:[#allocation35_spill] sm:$0xff] %v4170_v21 }
 0x1e1   :  { %822 = vmatmul.f32.vlgmr.msrb.gmra.mxu0 %v805_v32  ;;  %842 = vmatmul.f32.vlgmr.msrb.gmra.mxu1 %v805_v32  ;;  %5289 = vst [vmem:[#allocation36_spill] sm:$0xff] %v4173_v29 }
 0x1e2   :  { %862 = vmatmul.f32.vlgmr.msrb.gmra.mxu2 %v805_v32  ;;  %882 = vmatmul.f32.vlgmr.msrb.gmra.mxu3 %v805_v32  ;;  %5290 = vst [vmem:[#allocation37_spill] sm:$0xff] %v4176_v30  ;;  %v4182_v32 = vld [vmem:[#allocation4 + $0x20] sm:$0xff] }
 0x1e3   :  { %1100 = vmatpush.msrb.mxu0 %v4014_v58  ;;  %1120 = vmatpush.msrb.mxu1 %v4017_v33  ;;  %5291 = vst [vmem:[#allocation38_spill] sm:$0xff] %v4179_v31 }
 0x1e4   :  { %1140 = vmatpush.msrb.mxu2 %v4020_v34  ;;  %1160 = vmatpush.msrb.mxu3 %v4023_v35  ;;  %5292 = vst [vmem:[#allocation39_spill] sm:$0xff] %v4182_v32 }
 0x1e5   :  { %1101 = vmatpush.msrb.mxu0 %v4026_v36  ;;  %1121 = vmatpush.msrb.mxu1 %v4029_v37 }
 0x1e6   :  { %1141 = vmatpush.msrb.mxu2 %v4032_v38  ;;  %1161 = vmatpush.msrb.mxu3 %v4035_v40 }
 0x1e7   :  { %1102 = vmatpush.msrb.mxu0 %v4038_v41  ;;  %1122 = vmatpush.msrb.mxu1 %v4041_v42 }
 0x1e8   :  { %1142 = vmatpush.msrb.mxu2 %v4044_v43  ;;  %1162 = vmatpush.msrb.mxu3 %v4047_v44 }
 0x1e9   :  { %1103 = vmatpush.msrb.mxu0 %v4050_v45  ;;  %1123 = vmatpush.msrb.mxu1 %v4053_v52 }
 0x1ea   :  { %1143 = vmatpush.msrb.mxu2 %v4056_v54  ;;  %1163 = vmatpush.msrb.mxu3 %v4059_v61 }
 0x1eb   :  { %1104 = vmatpush.msrb.mxu0 %v4062_v60  ;;  %1124 = vmatpush.msrb.mxu1 %v4065_v39 }
 0x1ec   :  { %1144 = vmatpush.msrb.mxu2 %v4068_v53  ;;  %1164 = vmatpush.msrb.mxu3 %v4071_v51 }
 0x1ed   :  { %1105 = vmatpush.msrb.mxu0 %v4074_v47  ;;  %1125 = vmatpush.msrb.mxu1 %v4077_v46 }
 0x1ee   :  { %1145 = vmatpush.msrb.mxu2 %v4080_v63  ;;  %1165 = vmatpush.msrb.mxu3 %v4083_v0 }
 0x1ef   :  { %1106 = vmatpush.msrb.mxu0 %v4086_v55  ;;  %1126 = vmatpush.msrb.mxu1 %v4089_v50 }
 0x1f0   :  { %1146 = vmatpush.msrb.mxu2 %v4092_v62  ;;  %1166 = vmatpush.msrb.mxu3 %v4095_v56 }
 0x1f1   :  { %1107 = vmatpush.msrb.mxu0 %v4098_v49  ;;  %1127 = vmatpush.msrb.mxu1 %v4101_v13 }
 0x1f2   :  { %1147 = vmatpush.msrb.mxu2 %v4104_v48  ;;  %1167 = vmatpush.msrb.mxu3 %v4107_v59 }
 0x1f3   :  { %1108 = vmatpush.msrb.mxu0 %v4110_v57  ;;  %1128 = vmatpush.msrb.mxu1 %v4113_v26 }
 0x1f4   :  { %1148 = vmatpush.msrb.mxu2 %v4116_v1  ;;  %1168 = vmatpush.msrb.mxu3 %v4119_v2 }
 0x1f5   :  { %1109 = vmatpush.msrb.mxu0 %v4122_v3  ;;  %1129 = vmatpush.msrb.mxu1 %v4125_v4 }
 0x1f6   :  { %1149 = vmatpush.msrb.mxu2 %v4128_v5  ;;  %1169 = vmatpush.msrb.mxu3 %v4131_v6 }
 0x1f7   :  { %1110 = vmatpush.msrb.mxu0 %v4134_v7  ;;  %1130 = vmatpush.msrb.mxu1 %v4137_v8 }
 0x1f8   :  { %1150 = vmatpush.msrb.mxu2 %v4140_v9  ;;  %1170 = vmatpush.msrb.mxu3 %v4143_v10 }
 0x1f9   :  { %1111 = vmatpush.msrb.mxu0 %v4146_v11  ;;  %1131 = vmatpush.msrb.mxu1 %v4149_v12 }
 0x1fa   :  { %1151 = vmatpush.msrb.mxu2 %v4152_v14  ;;  %1171 = vmatpush.msrb.mxu3 %v4155_v15 }
 0x1fb   :  { %1112 = vmatpush.msrb.mxu0 %v4158_v16  ;;  %1132 = vmatpush.msrb.mxu1 %v4161_v18 }
 0x1fc   :  { %1152 = vmatpush.msrb.mxu2 %v4164_v19  ;;  %1172 = vmatpush.msrb.mxu3 %v4167_v20  ;;  %v4185_v20 = vld [vmem:[#allocation4 + $0x28] sm:$0xff] }
 0x1fd   :  { %1113 = vmatpush.msrb.mxu0 %v4170_v21  ;;  %1133 = vmatpush.msrb.mxu1 %v4173_v29  ;;  %5293 = vst [vmem:[#allocation40_spill] sm:$0xff] %v4185_v20  ;;  %v5294_v29 = vld [vmem:[#allocation53_spill] sm:$0xff]  ;;  %v5295_v21 = vld [vmem:[#allocation54_spill] sm:$0xff] }
 0x1fe   :  { %1153 = vmatpush.msrb.mxu2 %v4176_v30  ;;  %1173 = vmatpush.msrb.mxu3 %v4179_v31 }
 0x1ff   :  { %1114 = vmatpush.msrb.mxu0 %v4182_v32  ;;  %1134 = vmatpush.msrb.mxu1 %v4185_v20 }
 0x200   :  { %1154 = vmatpush.msrb.mxu2 %v5262_v22  ;;  %1174 = vmatpush.msrb.mxu3 %v5263_v23  ;;  %v5296_v23 = vld [vmem:[#allocation55_spill] sm:$0xff] }
 0x201   :  { %1115 = vmatpush.msrb.mxu0 %v5264_v24  ;;  %1135 = vmatpush.msrb.mxu1 %v5265_v25 }
 0x202   :  { %1155 = vmatpush.msrb.mxu2 %v5266_v27  ;;  %1175 = vmatpush.msrb.mxu3 %v5267_v28 }
 0x25e   :  { %v823_v31 = vpop.f32.mrf.mxu0  ;;  %v843_v30 = vpop.f32.mrf.mxu1 }
 0x25f   :  { %v886_v32 = vadd.f32 %v823_v31, %v5294_v29  ;;  %v887_v19 = vadd.f32 %v843_v30, %v5295_v21  ;;  %v5297_v21 = vld [vmem:[#allocation56_spill] sm:$0xff] }
 0x261   :  { %v2788_v18 = vmul.f32 -1.442695, %v886_v32  ;;  %v2789_v20 = vmul.f32 -1.442695, %v887_v19 }
 0x263   :  { %2868 = vpow2.f32 %v2788_v18 }
 0x264   :  { %2870 = vpow2.f32 %v2789_v20 }
 0x265   :  { %v863_v22 = vpop.f32.mrf.mxu2  ;;  %v883_v28 = vpop.f32.mrf.mxu3 }
 0x266   :  { %v888_v16 = vadd.f32 %v863_v22, %v5296_v23  ;;  %v889_v30 = vadd.f32 %v883_v28, %v5297_v21 }
 0x268   :  { %v2790_v24 = vmul.f32 -1.442695, %v888_v16 }
 0x269   :  { %v2869_v15 = vpop.eup %2868 }
 0x26a   :  { %v2871_v25 = vpop.eup %2870  ;;  %v899_v14 = vadd.f32 1.0, %v2869_v15  ;;  %2872 = vpow2.f32 %v2790_v24 }
 0x26b   :  { %v900_v27 = vadd.f32 1.0, %v2871_v25 }
 0x26c   :  { %2874 = vrcp.f32 %v899_v14  ;;  %v913_v16 = vand.u32 2147483648, %v899_v14  ;;  %v911_v24 = vand.u32 2147483647, %v899_v14  ;;  %vm907_vm10 = vweird.f32 %v899_v14 }
 0x26d   :  { %2876 = vrcp.f32 %v900_v27  ;;  %v928_v23 = vand.u32 2147483648, %v900_v27  ;;  %v926_v11 = vand.u32 2147483647, %v900_v27  ;;  %vm922_vm11 = vweird.f32 %v900_v27 }
 0x26e   :  { %v914_v21 = vor.u32 1.1754944e-38, %v913_v16  ;;  %vm912_vm14 = vcmp.eq.f32.partialorder %v911_v24, 8.507059e+37 }
 0x26f   :  { %vm927_vm15 = vcmp.eq.f32.partialorder %v926_v11, 8.507059e+37 }
 0x270   :  { %v2873_v12 = vpop.eup %2872 }
 0x271   :  { %v901_v29 = vadd.f32 1.0, %v2873_v12 }
 0x272   :  { %v2875_v31 = vpop.eup %2874 }
 0x273   :  { %v2877_v19 = vpop.eup %2876  ;;  %v903_v18 = vmul.f32 %v2875_v31, %v899_v14  ;;  %2878 = vrcp.f32 %v901_v29  ;;  %vm908_vm8 = vweird.f32 %v2875_v31  ;;  %v943_v16 = vand.u32 2147483648, %v901_v29 }
 0x274   :  { %v918_v20 = vmul.f32 %v2877_v19, %v900_v27  ;;  %2880 = vtanh.f32 %v889_v30  ;;  %vm923_vm9 = vweird.f32 %v2877_v19  ;;  %vm909_vm12 = vmor %vm907_vm10, %vm908_vm8  ;;  %vm937_vm1 = vweird.f32 %v901_v29 }
 0x275   :  { %v904_v32 = vsub.f32 1.0, %v903_v18  ;;  %vm924_vm13 = vmor %vm922_vm11, %vm923_vm9  ;;  %v929_v18 = vor.u32 1.1754944e-38, %v928_v23  ;;  %v944_v24 = vor.u32 1.1754944e-38, %v943_v16  ;;  %v5316_v16 = vld [vmem:[#allocation39_spill] sm:$0xff] }
 0x276   :  { %v919_v22 = vsub.f32 1.0, %v918_v20 }
 0x277   :  { %v905_v15 = vmul.f32 %v2875_v31, %v904_v32 }
 0x278   :  { %v920_v25 = vmul.f32 %v2877_v19, %v919_v22 }
 0x279   :  { %v2879_v10 = vpop.eup %2878  ;;  %v906_v12 = vadd.f32 %v2875_v31, %v905_v15 }
 0x27a   :  { %v933_v28 = vmul.f32 %v2879_v10, %v901_v29  ;;  %v921_v9 = vadd.f32 %v2877_v19, %v920_v25  ;;  %v2881_v30 = vpop.eup %2880  ;;  %vm938_vm0 = vweird.f32 %v2879_v10  ;;  %v5305_v25 = vld [vmem:[#allocation28_spill] sm:$0xff] }
 0x27b   :  { %v910_v20 = vsel %vm909_vm12, %v2875_v31, %v906_v12  ;;  %v941_v31 = vand.u32 2147483647, %v901_v29  ;;  %vm939_vm2 = vmor %vm937_vm1, %vm938_vm0  ;;  %v5303_v29 = vld [vmem:[#allocation26_spill] sm:$0xff]  ;;  %v5306_v12 = vld [vmem:[#allocation29_spill] sm:$0xff] }
 0x27c   :  { %v934_v8 = vsub.f32 1.0, %v933_v28  ;;  %v915_v32 = vsel %vm912_vm14, %v914_v21, %v910_v20  ;;  %v925_v7 = vsel %vm924_vm13, %v2877_v19, %v921_v9  ;;  %v5304_v19 = vld [vmem:[#allocation27_spill] sm:$0xff]  ;;  %v5307_v28 = vld [vmem:[#allocation30_spill] sm:$0xff]  ;;  %v5310_v20 = vld [vmem:[#allocation33_spill] sm:$0xff] }
 0x27d   :  { %v930_v22 = vsel %vm927_vm15, %v929_v18, %v925_v7  ;;  %v949_v6 = vmul.f32 %v2881_v30, %v915_v32  ;;  %vm942_vm3 = vcmp.eq.f32.partialorder %v941_v31, 8.507059e+37  ;;  %v5308_v21 = vld [vmem:[#allocation31_spill] sm:$0xff]  ;;  %v5309_v18 = vld [vmem:[#allocation32_spill] sm:$0xff]  ;;  %v5311_v30 = vld [vmem:[#allocation34_spill] sm:$0xff] }
 0x27e   :  { %v948_v5 = vmul.f32 %v930_v22, %v4011_v17  ;;  %v935_v15 = vmul.f32 %v2879_v10, %v934_v8  ;;  %v5298_v17 = vld [vmem:[#allocation21_spill] sm:$0xff]  ;;  %v5301_v8 = vld [vmem:[#allocation24_spill] sm:$0xff]  ;;  %v5312_v32 = vld [vmem:[#allocation35_spill] sm:$0xff] }
 0x27f   :  { %v5313_v22 = vld [vmem:[#allocation36_spill] sm:$0xff] }
 0x280   :  { %v4199_v14 = vadd.f32 %v949_v6, %v948_v5  ;;  %v936_v27 = vadd.f32 %v2879_v10, %v935_v15  ;;  %v5299_v5 = vld [vmem:[#allocation22_spill] sm:$0xff]  ;;  %v5300_v6 = vld [vmem:[#allocation23_spill] sm:$0xff]  ;;  %v5314_v15 = vld [vmem:[#allocation37_spill] sm:$0xff] }
 0x281   :  { %v5317_v31 = vld [vmem:[#allocation40_spill] sm:$0xff] }
 0x282   :  { %2882 = vtanh.f32 %v4199_v14  ;;  %v940_v23 = vsel %vm939_vm2, %v2879_v10, %v936_v27  ;;  %v5302_v10 = vld [vmem:[#allocation25_spill] sm:$0xff]  ;;  %v5315_v27 = vld [vmem:[#allocation38_spill] sm:$0xff] }
 0x283   :  { %v945_v11 = vsel %vm942_vm3, %v944_v24, %v940_v23  ;;  %v4260_v23 = vld [vmem:[#allocation4 + $0x30] sm:$0xff]  ;;  %v4263_v24 = vld [vmem:[#allocation4 + $0x38] sm:$0xff] }
 0x284   :  { %5318 = vst [vmem:[#allocation41_spill] sm:$0xff] %v4260_v23 }
 0x285   :  { %5319 = vst [vmem:[#allocation42_spill] sm:$0xff] %v4263_v24 }
 0x288   :  { %v2883_v9 = vpop.eup %2882 }
 0x289   :  { %v952_v7 = vmul.f32 %v2883_v9, %v945_v11  ;;  %v4266_v9 = vld [vmem:[#allocation4] sm:$0xff]  ;;  %v4269_v11 = vld [vmem:[#allocation4 + $0x8] sm:$0xff] }
 0x28a   :  { %5320 = vst [vmem:[#allocation43_spill] sm:$0xff] %v4266_v9 }
 0x28b   :  { %969 = vmatmul.f32.vlgmr.msra.gmra.mxu0 %v952_v7  ;;  %989 = vmatmul.f32.vlgmr.msra.gmra.mxu1 %v952_v7  ;;  %5321 = vst [vmem:[#allocation44_spill] sm:$0xff] %v4269_v11 }
 0x28c   :  { %1009 = vmatmul.f32.vlgmr.msra.gmra.mxu2 %v952_v7  ;;  %1029 = vmatmul.f32.vlgmr.msra.gmra.mxu3 %v952_v7  ;;  %v4272_v7 = vld [vmem:[#allocation4 + $0x10] sm:$0xff] }
 0x28d   :  { %1247 = vmatpush.msra.mxu0 %v4014_v58  ;;  %1267 = vmatpush.msra.mxu1 %v4017_v33  ;;  %5322 = vst [vmem:[#allocation45_spill] sm:$0xff] %v4272_v7 }
 0x28e   :  { %1287 = vmatpush.msra.mxu2 %v4020_v34  ;;  %1307 = vmatpush.msra.mxu3 %v4023_v35 }
 0x28f   :  { %1248 = vmatpush.msra.mxu0 %v4026_v36  ;;  %1268 = vmatpush.msra.mxu1 %v4029_v37 }
 0x290   :  { %1288 = vmatpush.msra.mxu2 %v4032_v38  ;;  %1308 = vmatpush.msra.mxu3 %v4035_v40 }
 0x291   :  { %1249 = vmatpush.msra.mxu0 %v4038_v41  ;;  %1269 = vmatpush.msra.mxu1 %v4041_v42 }
 0x292   :  { %1289 = vmatpush.msra.mxu2 %v4044_v43  ;;  %1309 = vmatpush.msra.mxu3 %v4047_v44 }
 0x293   :  { %1250 = vmatpush.msra.mxu0 %v4050_v45  ;;  %1270 = vmatpush.msra.mxu1 %v4053_v52 }
 0x294   :  { %1290 = vmatpush.msra.mxu2 %v4056_v54  ;;  %1310 = vmatpush.msra.mxu3 %v4059_v61 }
 0x295   :  { %1251 = vmatpush.msra.mxu0 %v4062_v60  ;;  %1271 = vmatpush.msra.mxu1 %v4065_v39 }
 0x296   :  { %1291 = vmatpush.msra.mxu2 %v4068_v53  ;;  %1311 = vmatpush.msra.mxu3 %v4071_v51 }
 0x297   :  { %1252 = vmatpush.msra.mxu0 %v4074_v47  ;;  %1272 = vmatpush.msra.mxu1 %v4077_v46 }
 0x298   :  { %1292 = vmatpush.msra.mxu2 %v4080_v63  ;;  %1312 = vmatpush.msra.mxu3 %v4083_v0 }
 0x299   :  { %1253 = vmatpush.msra.mxu0 %v4086_v55  ;;  %1273 = vmatpush.msra.mxu1 %v4089_v50 }
 0x29a   :  { %1293 = vmatpush.msra.mxu2 %v4092_v62  ;;  %1313 = vmatpush.msra.mxu3 %v4095_v56 }
 0x29b   :  { %1254 = vmatpush.msra.mxu0 %v4098_v49  ;;  %1274 = vmatpush.msra.mxu1 %v4101_v13 }
 0x29c   :  { %1294 = vmatpush.msra.mxu2 %v4104_v48  ;;  %1314 = vmatpush.msra.mxu3 %v4107_v59 }
 0x29d   :  { %1255 = vmatpush.msra.mxu0 %v4110_v57  ;;  %1275 = vmatpush.msra.mxu1 %v4113_v26 }
 0x29e   :  { %1295 = vmatpush.msra.mxu2 %v4116_v1  ;;  %1315 = vmatpush.msra.mxu3 %v4119_v2 }
 0x29f   :  { %1256 = vmatpush.msra.mxu0 %v4122_v3  ;;  %1276 = vmatpush.msra.mxu1 %v4125_v4 }
 0x2a0   :  { %1296 = vmatpush.msra.mxu2 %v5298_v17  ;;  %1316 = vmatpush.msra.mxu3 %v5299_v5 }
 0x2a1   :  { %1257 = vmatpush.msra.mxu0 %v5300_v6  ;;  %1277 = vmatpush.msra.mxu1 %v5301_v8 }
 0x2a2   :  { %1297 = vmatpush.msra.mxu2 %v5302_v10  ;;  %1317 = vmatpush.msra.mxu3 %v5303_v29 }
 0x2a3   :  { %1258 = vmatpush.msra.mxu0 %v5304_v19  ;;  %1278 = vmatpush.msra.mxu1 %v5305_v25 }
 0x2a4   :  { %1298 = vmatpush.msra.mxu2 %v5306_v12  ;;  %1318 = vmatpush.msra.mxu3 %v5307_v28 }
 0x2a5   :  { %1259 = vmatpush.msra.mxu0 %v5308_v21  ;;  %1279 = vmatpush.msra.mxu1 %v5309_v18 }
 0x2a6   :  { %1299 = vmatpush.msra.mxu2 %v5310_v20  ;;  %1319 = vmatpush.msra.mxu3 %v5311_v30 }
 0x2a7   :  { %1260 = vmatpush.msra.mxu0 %v5312_v32  ;;  %1280 = vmatpush.msra.mxu1 %v5313_v22 }
 0x2a8   :  { %1300 = vmatpush.msra.mxu2 %v5314_v15  ;;  %1320 = vmatpush.msra.mxu3 %v5315_v27  ;;  %v5324_v27 = vld [vmem:[#allocation57_spill] sm:$0xff]  ;;  %v5325_v15 = vld [vmem:[#allocation58_spill] sm:$0xff] }
 0x2a9   :  { %1261 = vmatpush.msra.mxu0 %v5316_v16  ;;  %1281 = vmatpush.msra.mxu1 %v5317_v31  ;;  %v4275_v31 = vld [vmem:[#allocation4 + $0x18] sm:$0xff] }
 0x2aa   :  { %1301 = vmatpush.msra.mxu2 %v4260_v23  ;;  %1321 = vmatpush.msra.mxu3 %v4263_v24  ;;  %5323 = vst [vmem:[#allocation46_spill] sm:$0xff] %v4275_v31 }
 0x2ab   :  { %1262 = vmatpush.msra.mxu0 %v4266_v9  ;;  %1282 = vmatpush.msra.mxu1 %v4269_v11  ;;  %v5326_v11 = vld [vmem:[#allocation59_spill] sm:$0xff] }
 0x2ac   :  { %1302 = vmatpush.msra.mxu2 %v4272_v7  ;;  %1322 = vmatpush.msra.mxu3 %v4275_v31 }
 0x308   :  { %v970_v23 = vpop.f32.mrf.mxu0  ;;  %v990_v16 = vpop.f32.mrf.mxu1 }
 0x309   :  { %v1033_v24 = vadd.f32 %v970_v23, %v5324_v27  ;;  %v1034_v22 = vadd.f32 %v990_v16, %v5325_v15  ;;  %v5327_v15 = vld [vmem:[#allocation60_spill] sm:$0xff] }
 0x30b   :  { %v2791_v32 = vmul.f32 -1.442695, %v1033_v24  ;;  %v2792_v9 = vmul.f32 -1.442695, %v1034_v22 }
 0x30d   :  { %2884 = vpow2.f32 %v2791_v32 }
 0x30e   :  { %2886 = vpow2.f32 %v2792_v9 }
 0x30f   :  { %v1010_v30 = vpop.f32.mrf.mxu2  ;;  %v1030_v31 = vpop.f32.mrf.mxu3 }
 0x310   :  { %v1035_v20 = vadd.f32 %v1010_v30, %v5326_v11  ;;  %v1036_v16 = vadd.f32 %v1030_v31, %v5327_v15 }
 0x312   :  { %v2793_v18 = vmul.f32 -1.442695, %v1035_v20 }
 0x313   :  { %v2885_v21 = vpop.eup %2884 }
 0x314   :  { %v2887_v7 = vpop.eup %2886  ;;  %v1046_v28 = vadd.f32 1.0, %v2885_v21  ;;  %2888 = vpow2.f32 %v2793_v18 }
 0x315   :  { %v1047_v12 = vadd.f32 1.0, %v2887_v7 }
 0x316   :  { %2890 = vrcp.f32 %v1046_v28  ;;  %v1060_v20 = vand.u32 2147483648, %v1046_v28  ;;  %v1058_v18 = vand.u32 2147483647, %v1046_v28  ;;  %vm1054_vm6 = vweird.f32 %v1046_v28 }
 0x317   :  { %2892 = vrcp.f32 %v1047_v12  ;;  %v1075_v11 = vand.u32 2147483648, %v1047_v12  ;;  %v1073_v19 = vand.u32 2147483647, %v1047_v12  ;;  %vm1069_vm7 = vweird.f32 %v1047_v12 }
 0x318   :  { %v1061_v15 = vor.u32 1.1754944e-38, %v1060_v20  ;;  %vm1059_vm10 = vcmp.eq.f32.partialorder %v1058_v18, 8.507059e+37 }
 0x319   :  { %vm1074_vm11 = vcmp.eq.f32.partialorder %v1073_v19, 8.507059e+37 }
 0x31a   :  { %v2889_v25 = vpop.eup %2888 }
 0x31b   :  { %v1048_v27 = vadd.f32 1.0, %v2889_v25 }
 0x31c   :  { %v2891_v23 = vpop.eup %2890 }
 0x31d   :  { %v2893_v22 = vpop.eup %2892  ;;  %v1050_v32 = vmul.f32 %v2891_v23, %v1046_v28  ;;  %2894 = vrcp.f32 %v1048_v27  ;;  %vm1055_vm4 = vweird.f32 %v2891_v23  ;;  %v1090_v20 = vand.u32 2147483648, %v1048_v27 }
 0x31e   :  { %v1065_v24 = vmul.f32 %v2893_v22, %v1047_v12  ;;  %2896 = vtanh.f32 %v1036_v16  ;;  %vm1070_vm5 = vweird.f32 %v2893_v22  ;;  %vm1056_vm8 = vmor %vm1054_vm6, %vm1055_vm4  ;;  %vm1084_vm13 = vweird.f32 %v1048_v27 }
 0x31f   :  { %v1051_v9 = vsub.f32 1.0, %v1050_v32  ;;  %vm1071_vm9 = vmor %vm1069_vm7, %vm1070_vm5  ;;  %v1076_v32 = vor.u32 1.1754944e-38, %v1075_v11  ;;  %v1091_v18 = vor.u32 1.1754944e-38, %v1090_v20  ;;  %v5346_v20 = vld [vmem:[#allocation39_spill] sm:$0xff] }
 0x320   :  { %v1066_v30 = vsub.f32 1.0, %v1065_v24 }
 0x321   :  { %v1052_v21 = vmul.f32 %v2891_v23, %v1051_v9 }
 0x322   :  { %v1067_v7 = vmul.f32 %v2893_v22, %v1066_v30 }
 0x323   :  { %v2895_v29 = vpop.eup %2894  ;;  %v1053_v25 = vadd.f32 %v2891_v23, %v1052_v21 }
 0x324   :  { %v1080_v31 = vmul.f32 %v2895_v29, %v1048_v27  ;;  %v1068_v10 = vadd.f32 %v2893_v22, %v1067_v7  ;;  %v2897_v16 = vpop.eup %2896  ;;  %vm1085_vm12 = vweird.f32 %v2895_v29  ;;  %v5335_v7 = vld [vmem:[#allocation28_spill] sm:$0xff] }
 0x325   :  { %v1057_v24 = vsel %vm1056_vm8, %v2891_v23, %v1053_v25  ;;  %v1088_v23 = vand.u32 2147483647, %v1048_v27  ;;  %vm1086_vm14 = vmor %vm1084_vm13, %vm1085_vm12  ;;  %v5333_v27 = vld [vmem:[#allocation26_spill] sm:$0xff]  ;;  %v5336_v25 = vld [vmem:[#allocation29_spill] sm:$0xff] }
 0x326   :  { %v1081_v8 = vsub.f32 1.0, %v1080_v31  ;;  %v1062_v9 = vsel %vm1059_vm10, %v1061_v15, %v1057_v24  ;;  %v1072_v6 = vsel %vm1071_vm9, %v2893_v22, %v1068_v10  ;;  %v5334_v22 = vld [vmem:[#allocation27_spill] sm:$0xff]  ;;  %v5337_v31 = vld [vmem:[#allocation30_spill] sm:$0xff]  ;;  %v5340_v24 = vld [vmem:[#allocation33_spill] sm:$0xff] }
 0x327   :  { %v1077_v30 = vsel %vm1074_vm11, %v1076_v32, %v1072_v6  ;;  %v1096_v5 = vmul.f32 %v2897_v16, %v1062_v9  ;;  %vm1089_vm15 = vcmp.eq.f32.partialorder %v1088_v23, 8.507059e+37  ;;  %v5338_v15 = vld [vmem:[#allocation31_spill] sm:$0xff]  ;;  %v5339_v32 = vld [vmem:[#allocation32_spill] sm:$0xff]  ;;  %v5341_v16 = vld [vmem:[#allocation34_spill] sm:$0xff] }
 0x328   :  { %v1095_v17 = vmul.f32 %v1077_v30, %v4199_v14  ;;  %v1082_v21 = vmul.f32 %v2895_v29, %v1081_v8  ;;  %v5328_v14 = vld [vmem:[#allocation21_spill] sm:$0xff]  ;;  %v5331_v8 = vld [vmem:[#allocation24_spill] sm:$0xff]  ;;  %v5342_v9 = vld [vmem:[#allocation35_spill] sm:$0xff] }
 0x329   :  { %v5343_v30 = vld [vmem:[#allocation36_spill] sm:$0xff] }
 0x32a   :  { %v4283_v28 = vadd.f32 %v1096_v5, %v1095_v17  ;;  %v1083_v12 = vadd.f32 %v2895_v29, %v1082_v21  ;;  %v5329_v17 = vld [vmem:[#allocation22_spill] sm:$0xff]  ;;  %v5330_v5 = vld [vmem:[#allocation23_spill] sm:$0xff]  ;;  %v5344_v21 = vld [vmem:[#allocation37_spill] sm:$0xff] }
 0x32b   :  { %v5347_v23 = vld [vmem:[#allocation40_spill] sm:$0xff] }
 0x32c   :  { %2898 = vtanh.f32 %v4283_v28  ;;  %v1087_v11 = vsel %vm1086_vm14, %v2895_v29, %v1083_v12  ;;  %v5332_v29 = vld [vmem:[#allocation25_spill] sm:$0xff]  ;;  %v5345_v12 = vld [vmem:[#allocation38_spill] sm:$0xff] }
 0x32d   :  { %v1092_v19 = vsel %vm1089_vm15, %v1091_v18, %v1087_v11  ;;  %v5348_v11 = vld [vmem:[#allocation41_spill] sm:$0xff]  ;;  %v5349_v18 = vld [vmem:[#allocation42_spill] sm:$0xff] }
 0x332   :  { %v2899_v10 = vpop.eup %2898 }
 0x333   :  { %v1099_v6 = vmul.f32 %v2899_v10, %v1092_v19  ;;  %v5350_v10 = vld [vmem:[#allocation43_spill] sm:$0xff]  ;;  %v5351_v19 = vld [vmem:[#allocation44_spill] sm:$0xff] }
 0x335   :  { %1116 = vmatmul.f32.vlgmr.msrb.gmra.mxu0 %v1099_v6  ;;  %1136 = vmatmul.f32.vlgmr.msrb.gmra.mxu1 %v1099_v6 }
 0x336   :  { %1156 = vmatmul.f32.vlgmr.msrb.gmra.mxu2 %v1099_v6  ;;  %1176 = vmatmul.f32.vlgmr.msrb.gmra.mxu3 %v1099_v6  ;;  %v5352_v6 = vld [vmem:[#allocation45_spill] sm:$0xff] }
 0x337   :  { %1394 = vmatpush.msrb.mxu0 %v4014_v58  ;;  %1414 = vmatpush.msrb.mxu1 %v4017_v33 }
 0x338   :  { %1434 = vmatpush.msrb.mxu2 %v4020_v34  ;;  %1454 = vmatpush.msrb.mxu3 %v4023_v35 }
 0x339   :  { %1395 = vmatpush.msrb.mxu0 %v4026_v36  ;;  %1415 = vmatpush.msrb.mxu1 %v4029_v37 }
 0x33a   :  { %1435 = vmatpush.msrb.mxu2 %v4032_v38  ;;  %1455 = vmatpush.msrb.mxu3 %v4035_v40 }
 0x33b   :  { %1396 = vmatpush.msrb.mxu0 %v4038_v41  ;;  %1416 = vmatpush.msrb.mxu1 %v4041_v42 }
 0x33c   :  { %1436 = vmatpush.msrb.mxu2 %v4044_v43  ;;  %1456 = vmatpush.msrb.mxu3 %v4047_v44 }
 0x33d   :  { %1397 = vmatpush.msrb.mxu0 %v4050_v45  ;;  %1417 = vmatpush.msrb.mxu1 %v4053_v52 }
 0x33e   :  { %1437 = vmatpush.msrb.mxu2 %v4056_v54  ;;  %1457 = vmatpush.msrb.mxu3 %v4059_v61 }
 0x33f   :  { %1398 = vmatpush.msrb.mxu0 %v4062_v60  ;;  %1418 = vmatpush.msrb.mxu1 %v4065_v39 }
 0x340   :  { %1438 = vmatpush.msrb.mxu2 %v4068_v53  ;;  %1458 = vmatpush.msrb.mxu3 %v4071_v51 }
 0x341   :  { %1399 = vmatpush.msrb.mxu0 %v4074_v47  ;;  %1419 = vmatpush.msrb.mxu1 %v4077_v46 }
 0x342   :  { %1439 = vmatpush.msrb.mxu2 %v4080_v63  ;;  %1459 = vmatpush.msrb.mxu3 %v4083_v0 }
 0x343   :  { %1400 = vmatpush.msrb.mxu0 %v4086_v55  ;;  %1420 = vmatpush.msrb.mxu1 %v4089_v50 }
 0x344   :  { %1440 = vmatpush.msrb.mxu2 %v4092_v62  ;;  %1460 = vmatpush.msrb.mxu3 %v4095_v56 }
 0x345   :  { %1401 = vmatpush.msrb.mxu0 %v4098_v49  ;;  %1421 = vmatpush.msrb.mxu1 %v4101_v13 }
 0x346   :  { %1441 = vmatpush.msrb.mxu2 %v4104_v48  ;;  %1461 = vmatpush.msrb.mxu3 %v4107_v59 }
 0x347   :  { %1402 = vmatpush.msrb.mxu0 %v4110_v57  ;;  %1422 = vmatpush.msrb.mxu1 %v4113_v26 }
 0x348   :  { %1442 = vmatpush.msrb.mxu2 %v4116_v1  ;;  %1462 = vmatpush.msrb.mxu3 %v4119_v2 }
 0x349   :  { %1403 = vmatpush.msrb.mxu0 %v4122_v3  ;;  %1423 = vmatpush.msrb.mxu1 %v4125_v4 }
 0x34a   :  { %1443 = vmatpush.msrb.mxu2 %v5328_v14  ;;  %1463 = vmatpush.msrb.mxu3 %v5329_v17 }
 0x34b   :  { %1404 = vmatpush.msrb.mxu0 %v5330_v5  ;;  %1424 = vmatpush.msrb.mxu1 %v5331_v8 }
 0x34c   :  { %1444 = vmatpush.msrb.mxu2 %v5332_v29  ;;  %1464 = vmatpush.msrb.mxu3 %v5333_v27 }
 0x34d   :  { %1405 = vmatpush.msrb.mxu0 %v5334_v22  ;;  %1425 = vmatpush.msrb.mxu1 %v5335_v7 }
 0x34e   :  { %1445 = vmatpush.msrb.mxu2 %v5336_v25  ;;  %1465 = vmatpush.msrb.mxu3 %v5337_v31 }
 0x34f   :  { %1406 = vmatpush.msrb.mxu0 %v5338_v15  ;;  %1426 = vmatpush.msrb.mxu1 %v5339_v32 }
 0x350   :  { %1446 = vmatpush.msrb.mxu2 %v5340_v24  ;;  %1466 = vmatpush.msrb.mxu3 %v5341_v16  ;;  %v5354_v16 = vld [vmem:[#allocation61_spill] sm:$0xff]  ;;  %v5355_v24 = vld [vmem:[#allocation62_spill] sm:$0xff] }
 0x351   :  { %1407 = vmatpush.msrb.mxu0 %v5342_v9  ;;  %1427 = vmatpush.msrb.mxu1 %v5343_v30  ;;  %v5353_v9 = vld [vmem:[#allocation46_spill] sm:$0xff] }
 0x352   :  { %1447 = vmatpush.msrb.mxu2 %v5344_v21  ;;  %1467 = vmatpush.msrb.mxu3 %v5345_v12 }
 0x353   :  { %1408 = vmatpush.msrb.mxu0 %v5346_v20  ;;  %1428 = vmatpush.msrb.mxu1 %v5347_v23 }
 0x354   :  { %1448 = vmatpush.msrb.mxu2 %v5348_v11  ;;  %1468 = vmatpush.msrb.mxu3 %v5349_v18  ;;  %v5356_v18 = vld [vmem:[#allocation63_spill] sm:$0xff] }
 0x355   :  { %1409 = vmatpush.msrb.mxu0 %v5350_v10  ;;  %1429 = vmatpush.msrb.mxu1 %v5351_v19 }
 0x356   :  { %1449 = vmatpush.msrb.mxu2 %v5352_v6  ;;  %1469 = vmatpush.msrb.mxu3 %v5353_v9 }
 0x3b2   :  { %v1117_v30 = vpop.f32.mrf.mxu0  ;;  %v1137_v21 = vpop.f32.mrf.mxu1 }
 0x3b3   :  { %v1180_v12 = vadd.f32 %v1117_v30, %v5354_v16  ;;  %v1181_v20 = vadd.f32 %v1137_v21, %v5355_v24  ;;  %v5357_v24 = vld [vmem:[#allocation64_spill] sm:$0xff] }
 0x3b5   :  { %v2794_v32 = vmul.f32 -1.442695, %v1180_v12  ;;  %v2795_v23 = vmul.f32 -1.442695, %v1181_v20 }
 0x3b7   :  { %2900 = vpow2.f32 %v2794_v32 }
 0x3b8   :  { %2902 = vpow2.f32 %v2795_v23 }
 0x3b9   :  { %v1157_v11 = vpop.f32.mrf.mxu2  ;;  %v1177_v9 = vpop.f32.mrf.mxu3 }
 0x3ba   :  { %v1182_v15 = vadd.f32 %v1157_v11, %v5356_v18  ;;  %v1183_v21 = vadd.f32 %v1177_v9, %v5357_v24 }
 0x3bc   :  { %v2796_v10 = vmul.f32 -1.442695, %v1182_v15 }
 0x3bd   :  { %v2901_v31 = vpop.eup %2900 }
 0x3be   :  { %v2903_v19 = vpop.eup %2902  ;;  %v1193_v25 = vadd.f32 1.0, %v2901_v31  ;;  %2904 = vpow2.f32 %v2796_v10 }
 0x3bf   :  { %v1194_v6 = vadd.f32 1.0, %v2903_v19 }
 0x3c0   :  { %2906 = vrcp.f32 %v1193_v25  ;;  %v1207_v15 = vand.u32 2147483648, %v1193_v25  ;;  %v1205_v10 = vand.u32 2147483647, %v1193_v25  ;;  %vm1201_vm2 = vweird.f32 %v1193_v25 }
 0x3c1   :  { %2908 = vrcp.f32 %v1194_v6  ;;  %v1222_v18 = vand.u32 2147483648, %v1194_v6  ;;  %v1220_v22 = vand.u32 2147483647, %v1194_v6  ;;  %vm1216_vm3 = vweird.f32 %v1194_v6 }
 0x3c2   :  { %v1208_v24 = vor.u32 1.1754944e-38, %v1207_v15  ;;  %vm1206_vm6 = vcmp.eq.f32.partialorder %v1205_v10, 8.507059e+37 }
 0x3c3   :  { %vm1221_vm7 = vcmp.eq.f32.partialorder %v1220_v22, 8.507059e+37 }
 0x3c4   :  { %v2905_v7 = vpop.eup %2904 }
 0x3c5   :  { %v1195_v16 = vadd.f32 1.0, %v2905_v7 }
 0x3c6   :  { %v2907_v30 = vpop.eup %2906 }
 0x3c7   :  { %v2909_v12 = vpop.eup %2908  ;;  %v1197_v32 = vmul.f32 %v2907_v30, %v1193_v25  ;;  %2910 = vrcp.f32 %v1195_v16  ;;  %vm1202_vm0 = vweird.f32 %v2907_v30  ;;  %v1237_v15 = vand.u32 2147483648, %v1195_v16 }
 0x3c8   :  { %v1212_v20 = vmul.f32 %v2909_v12, %v1194_v6  ;;  %2912 = vtanh.f32 %v1183_v21  ;;  %vm1217_vm1 = vweird.f32 %v2909_v12  ;;  %vm1203_vm4 = vmor %vm1201_vm2, %vm1202_vm0  ;;  %vm1231_vm9 = vweird.f32 %v1195_v16 }
 0x3c9   :  { %v1198_v23 = vsub.f32 1.0, %v1197_v32  ;;  %vm1218_vm5 = vmor %vm1216_vm3, %vm1217_vm1  ;;  %v1223_v32 = vor.u32 1.1754944e-38, %v1222_v18  ;;  %v1238_v10 = vor.u32 1.1754944e-38, %v1237_v15 }
 0x3ca   :  { %v1213_v11 = vsub.f32 1.0, %v1212_v20 }
 0x3cb   :  { %v1199_v31 = vmul.f32 %v2907_v30, %v1198_v23 }
 0x3cc   :  { %v1214_v19 = vmul.f32 %v2909_v12, %v1213_v11 }
 0x3cd   :  { %v2911_v27 = vpop.eup %2910  ;;  %v1200_v7 = vadd.f32 %v2907_v30, %v1199_v31 }
 0x3ce   :  { %v1227_v9 = vmul.f32 %v2911_v27, %v1195_v16  ;;  %v1215_v29 = vadd.f32 %v2909_v12, %v1214_v19  ;;  %v2913_v21 = vpop.eup %2912  ;;  %vm1232_vm8 = vweird.f32 %v2911_v27 }
 0x3cf   :  { %v1204_v20 = vsel %vm1203_vm4, %v2907_v30, %v1200_v7  ;;  %v1235_v30 = vand.u32 2147483647, %v1195_v16  ;;  %vm1233_vm10 = vmor %vm1231_vm9, %vm1232_vm8  ;;  %v5387_v7 = vld [vmem:[#allocation68_spill] sm:$0xff] }
 0x3d0   :  { %v1228_v8 = vsub.f32 1.0, %v1227_v9  ;;  %v1209_v23 = vsel %vm1206_vm6, %v1208_v24, %v1204_v20  ;;  %v1219_v5 = vsel %vm1218_vm5, %v2909_v12, %v1215_v29 }
 0x3d1   :  { %v1224_v11 = vsel %vm1221_vm7, %v1223_v32, %v1219_v5  ;;  %v1243_v17 = vmul.f32 %v2913_v21, %v1209_v23  ;;  %vm1236_vm11 = vcmp.eq.f32.partialorder %v1235_v30, 8.507059e+37 }
 0x3d2   :  { %v1242_v14 = vmul.f32 %v1224_v11, %v4283_v28  ;;  %v1229_v31 = vmul.f32 %v2911_v27, %v1228_v8 }
 0x3d4   :  { %v4355_v25 = vadd.f32 %v1243_v17, %v1242_v14  ;;  %v1230_v6 = vadd.f32 %v2911_v27, %v1229_v31 }
 0x3d6   :  { %2914 = vtanh.f32 %v4355_v25  ;;  %v1234_v18 = vsel %vm1233_vm10, %v2911_v27, %v1230_v6 }
 0x3d7   :  { %v1239_v22 = vsel %vm1236_vm11, %v1238_v10, %v1234_v18 }
 0x3dc   :  { %v2915_v29 = vpop.eup %2914 }
 0x3dd   :  { %v1246_v5 = vmul.f32 %v2915_v29, %v1239_v22 }
 0x3df   :  { %1263 = vmatmul.f32.vlgmr.msra.gmra.mxu0 %v1246_v5  ;;  %1283 = vmatmul.f32.vlgmr.msra.gmra.mxu1 %v1246_v5 }
 0x3e0   :  { %1303 = vmatmul.f32.vlgmr.msra.gmra.mxu2 %v1246_v5  ;;  %1323 = vmatmul.f32.vlgmr.msra.gmra.mxu3 %v1246_v5 }
 0x3e1   :  { %1541 = vmatpush.msra.mxu0 %v4014_v58  ;;  %1561 = vmatpush.msra.mxu1 %v4017_v33  ;;  %v5358_v58 = vld [vmem:[#allocation21_spill] sm:$0xff]  ;;  %v5359_v33 = vld [vmem:[#allocation22_spill] sm:$0xff] }
 0x3e2   :  { %1581 = vmatpush.msra.mxu2 %v4020_v34  ;;  %1601 = vmatpush.msra.mxu3 %v4023_v35  ;;  %v5360_v34 = vld [vmem:[#allocation23_spill] sm:$0xff]  ;;  %v5361_v35 = vld [vmem:[#allocation24_spill] sm:$0xff] }
 0x3e3   :  { %1542 = vmatpush.msra.mxu0 %v4026_v36  ;;  %1562 = vmatpush.msra.mxu1 %v4029_v37  ;;  %v5362_v36 = vld [vmem:[#allocation25_spill] sm:$0xff]  ;;  %v5363_v37 = vld [vmem:[#allocation26_spill] sm:$0xff] }
 0x3e4   :  { %1582 = vmatpush.msra.mxu2 %v4032_v38  ;;  %1602 = vmatpush.msra.mxu3 %v4035_v40  ;;  %v5364_v38 = vld [vmem:[#allocation27_spill] sm:$0xff]  ;;  %v5365_v40 = vld [vmem:[#allocation28_spill] sm:$0xff] }
 0x3e5   :  { %1543 = vmatpush.msra.mxu0 %v4038_v41  ;;  %1563 = vmatpush.msra.mxu1 %v4041_v42  ;;  %v5366_v41 = vld [vmem:[#allocation29_spill] sm:$0xff]  ;;  %v5367_v42 = vld [vmem:[#allocation30_spill] sm:$0xff] }
 0x3e6   :  { %1583 = vmatpush.msra.mxu2 %v4044_v43  ;;  %1603 = vmatpush.msra.mxu3 %v4047_v44  ;;  %v5368_v43 = vld [vmem:[#allocation31_spill] sm:$0xff]  ;;  %v5369_v44 = vld [vmem:[#allocation32_spill] sm:$0xff] }
 0x3e7   :  { %1544 = vmatpush.msra.mxu0 %v4050_v45  ;;  %1564 = vmatpush.msra.mxu1 %v4053_v52  ;;  %v5370_v45 = vld [vmem:[#allocation33_spill] sm:$0xff]  ;;  %v5371_v52 = vld [vmem:[#allocation34_spill] sm:$0xff] }
 0x3e8   :  { %1584 = vmatpush.msra.mxu2 %v4056_v54  ;;  %1604 = vmatpush.msra.mxu3 %v4059_v61  ;;  %v5372_v54 = vld [vmem:[#allocation35_spill] sm:$0xff]  ;;  %v5373_v61 = vld [vmem:[#allocation36_spill] sm:$0xff] }
 0x3e9   :  { %1545 = vmatpush.msra.mxu0 %v4062_v60  ;;  %1565 = vmatpush.msra.mxu1 %v4065_v39  ;;  %v5374_v60 = vld [vmem:[#allocation37_spill] sm:$0xff]  ;;  %v5375_v39 = vld [vmem:[#allocation38_spill] sm:$0xff] }
 0x3ea   :  { %1585 = vmatpush.msra.mxu2 %v4068_v53  ;;  %1605 = vmatpush.msra.mxu3 %v4071_v51  ;;  %v5376_v53 = vld [vmem:[#allocation39_spill] sm:$0xff]  ;;  %v5377_v51 = vld [vmem:[#allocation40_spill] sm:$0xff] }
 0x3eb   :  { %1546 = vmatpush.msra.mxu0 %v4074_v47  ;;  %1566 = vmatpush.msra.mxu1 %v4077_v46  ;;  %v5378_v47 = vld [vmem:[#allocation41_spill] sm:$0xff]  ;;  %v5379_v46 = vld [vmem:[#allocation42_spill] sm:$0xff] }
 0x3ec   :  { %1586 = vmatpush.msra.mxu2 %v4080_v63  ;;  %1606 = vmatpush.msra.mxu3 %v4083_v0  ;;  %v5380_v63 = vld [vmem:[#allocation43_spill] sm:$0xff]  ;;  %v5381_v0 = vld [vmem:[#allocation44_spill] sm:$0xff] }
 0x3ed   :  { %1547 = vmatpush.msra.mxu0 %v4086_v55  ;;  %1567 = vmatpush.msra.mxu1 %v4089_v50  ;;  %v5382_v55 = vld [vmem:[#allocation45_spill] sm:$0xff]  ;;  %v5383_v50 = vld [vmem:[#allocation46_spill] sm:$0xff] }
 0x3ee   :  { %1587 = vmatpush.msra.mxu2 %v4092_v62  ;;  %1607 = vmatpush.msra.mxu3 %v4095_v56 }
 0x3ef   :  { %1548 = vmatpush.msra.mxu0 %v4098_v49  ;;  %1568 = vmatpush.msra.mxu1 %v4101_v13  ;;  %v5384_v49 = vld [vmem:[#allocation65_spill] sm:$0xff] }
 0x3f0   :  { %1588 = vmatpush.msra.mxu2 %v4104_v48  ;;  %1608 = vmatpush.msra.mxu3 %v4107_v59  ;;  %v5385_v48 = vld [vmem:[#allocation66_spill] sm:$0xff] }
 0x3f1   :  { %1549 = vmatpush.msra.mxu0 %v4110_v57  ;;  %1569 = vmatpush.msra.mxu1 %v4113_v26 }
 0x3f2   :  { %1589 = vmatpush.msra.mxu2 %v4116_v1  ;;  %1609 = vmatpush.msra.mxu3 %v4119_v2  ;;  %v5386_v2 = vld [vmem:[#allocation67_spill] sm:$0xff] }
 0x3f3   :  { %1550 = vmatpush.msra.mxu0 %v4122_v3  ;;  %1570 = vmatpush.msra.mxu1 %v4125_v4 }
 0x3f4   :  { %1590 = vmatpush.msra.mxu2 %v5358_v58  ;;  %1610 = vmatpush.msra.mxu3 %v5359_v33 }
 0x3f5   :  { %1551 = vmatpush.msra.mxu0 %v5360_v34  ;;  %1571 = vmatpush.msra.mxu1 %v5361_v35 }
 0x3f6   :  { %1591 = vmatpush.msra.mxu2 %v5362_v36  ;;  %1611 = vmatpush.msra.mxu3 %v5363_v37 }
 0x3f7   :  { %1552 = vmatpush.msra.mxu0 %v5364_v38  ;;  %1572 = vmatpush.msra.mxu1 %v5365_v40 }
 0x3f8   :  { %1592 = vmatpush.msra.mxu2 %v5366_v41  ;;  %1612 = vmatpush.msra.mxu3 %v5367_v42 }
 0x3f9   :  { %1553 = vmatpush.msra.mxu0 %v5368_v43  ;;  %1573 = vmatpush.msra.mxu1 %v5369_v44 }
 0x3fa   :  { %1593 = vmatpush.msra.mxu2 %v5370_v45  ;;  %1613 = vmatpush.msra.mxu3 %v5371_v52 }
 0x3fb   :  { %1554 = vmatpush.msra.mxu0 %v5372_v54  ;;  %1574 = vmatpush.msra.mxu1 %v5373_v61 }
 0x3fc   :  { %1594 = vmatpush.msra.mxu2 %v5374_v60  ;;  %1614 = vmatpush.msra.mxu3 %v5375_v39 }
 0x3fd   :  { %1555 = vmatpush.msra.mxu0 %v5376_v53  ;;  %1575 = vmatpush.msra.mxu1 %v5377_v51 }
 0x3fe   :  { %1595 = vmatpush.msra.mxu2 %v5378_v47  ;;  %1615 = vmatpush.msra.mxu3 %v5379_v46  ;;  %v1753_v47 = vld [vmem:[#allocation6 + $0x1e8] sm:$0xff]  ;;  %v1754_v46 = vld [vmem:[#allocation6 + $0x1f0] sm:$0xff] }
 0x3ff   :  { %1556 = vmatpush.msra.mxu0 %v5380_v63  ;;  %1576 = vmatpush.msra.mxu1 %v5381_v0  ;;  %v1755_v63 = vld [vmem:[#allocation6 + $0x1f8] sm:$0xff]  ;;  %v1748_v0 = vld [vmem:[#allocation6 + $0x1c0] sm:$0xff] }
 0x400   :  { %1596 = vmatpush.msra.mxu2 %v5382_v55  ;;  %1616 = vmatpush.msra.mxu3 %v5383_v50  ;;  %v1749_v55 = vld [vmem:[#allocation6 + $0x1c8] sm:$0xff]  ;;  %v1750_v50 = vld [vmem:[#allocation6 + $0x1d0] sm:$0xff] }
 0x45c   :  { %v1264_v62 = vpop.f32.mrf.mxu0  ;;  %v1284_v56 = vpop.f32.mrf.mxu1 }
 0x45d   :  { %v1327_v13 = vadd.f32 %v1264_v62, %v5384_v49  ;;  %v1328_v59 = vadd.f32 %v1284_v56, %v5385_v48  ;;  %v1751_v62 = vld [vmem:[#allocation6 + $0x1d8] sm:$0xff]  ;;  %v1744_v56 = vld [vmem:[#allocation6 + $0x1a0] sm:$0xff]  ;;  %v1745_v49 = vld [vmem:[#allocation6 + $0x1a8] sm:$0xff] }
 0x45e   :  { %v1747_v48 = vld [vmem:[#allocation6 + $0x1b8] sm:$0xff] }
 0x45f   :  { %v2797_v57 = vmul.f32 -1.442695, %v1327_v13  ;;  %v2798_v26 = vmul.f32 -1.442695, %v1328_v59  ;;  %v1746_v13 = vld [vmem:[#allocation6 + $0x1b0] sm:$0xff]  ;;  %v1740_v59 = vld [vmem:[#allocation6 + $0x180] sm:$0xff] }
 0x461   :  { %2916 = vpow2.f32 %v2797_v57  ;;  %v1741_v57 = vld [vmem:[#allocation6 + $0x188] sm:$0xff] }
 0x462   :  { %2918 = vpow2.f32 %v2798_v26  ;;  %v1742_v26 = vld [vmem:[#allocation6 + $0x190] sm:$0xff] }
 0x463   :  { %v1304_v1 = vpop.f32.mrf.mxu2  ;;  %v1324_v27 = vpop.f32.mrf.mxu3 }
 0x464   :  { %v1329_v3 = vadd.f32 %v1304_v1, %v5386_v2  ;;  %v1330_v9 = vadd.f32 %v1324_v27, %v5387_v7  ;;  %v1743_v1 = vld [vmem:[#allocation6 + $0x198] sm:$0xff]  ;;  %v1736_v2 = vld [vmem:[#allocation6 + $0x160] sm:$0xff] }
 0x466   :  { %v2799_v4 = vmul.f32 -1.442695, %v1329_v3  ;;  %v1737_v3 = vld [vmem:[#allocation6 + $0x168] sm:$0xff] }
 0x467   :  { %v2917_v28 = vpop.eup %2916 }
 0x468   :  { %v2919_v14 = vpop.eup %2918  ;;  %v1340_v17 = vadd.f32 1.0, %v2917_v28  ;;  %2920 = vpow2.f32 %v2799_v4  ;;  %v1738_v4 = vld [vmem:[#allocation6 + $0x170] sm:$0xff]  ;;  %v1739_v28 = vld [vmem:[#allocation6 + $0x178] sm:$0xff] }
 0x469   :  { %v1341_v8 = vadd.f32 1.0, %v2919_v14  ;;  %v1732_v14 = vld [vmem:[#allocation6 + $0x140] sm:$0xff] }
 0x46a   :  { %2922 = vrcp.f32 %v1340_v17  ;;  %v1354_v11 = vand.u32 2147483648, %v1340_v17  ;;  %v1352_v15 = vand.u32 2147483647, %v1340_v17  ;;  %vm1348_vm14 = vweird.f32 %v1340_v17 }
 0x46b   :  { %2924 = vrcp.f32 %v1341_v8  ;;  %v1369_v31 = vand.u32 2147483648, %v1341_v8  ;;  %v1367_v18 = vand.u32 2147483647, %v1341_v8  ;;  %vm1363_vm15 = vweird.f32 %v1341_v8 }
 0x46c   :  { %v1355_v5 = vor.u32 1.1754944e-38, %v1354_v11  ;;  %vm1353_vm2 = vcmp.eq.f32.partialorder %v1352_v15, 8.507059e+37  ;;  %v1725_v15 = vld [vmem:[#allocation6 + $0x108] sm:$0xff] }
 0x46d   :  { %v1370_v33 = vor.u32 1.1754944e-38, %v1369_v31  ;;  %vm1368_vm3 = vcmp.eq.f32.partialorder %v1367_v18, 8.507059e+37  ;;  %v1727_v18 = vld [vmem:[#allocation6 + $0x118] sm:$0xff] }
 0x46e   :  { %v2921_v16 = vpop.eup %2920 }
 0x46f   :  { %v1342_v12 = vadd.f32 1.0, %v2921_v16 }
 0x470   :  { %v2923_v19 = vpop.eup %2922 }
 0x471   :  { %v2925_v24 = vpop.eup %2924  ;;  %v1344_v32 = vmul.f32 %v2923_v19, %v1340_v17  ;;  %2926 = vrcp.f32 %v1342_v12  ;;  %vm1349_vm12 = vweird.f32 %v2923_v19  ;;  %v1384_v52 = vand.u32 2147483648, %v1342_v12  ;;  %v1733_v17 = vld [vmem:[#allocation6 + $0x148] sm:$0xff] }
 0x472   :  { %v1359_v20 = vmul.f32 %v2925_v24, %v1341_v8  ;;  %2928 = vtanh.f32 %v1330_v9  ;;  %vm1364_vm13 = vweird.f32 %v2925_v24  ;;  %vm1350_vm0 = vmor %vm1348_vm14, %vm1349_vm12  ;;  %vm1378_vm5 = vweird.f32 %v1342_v12  ;;  %v1734_v8 = vld [vmem:[#allocation6 + $0x150] sm:$0xff]  ;;  %v5389_v9 = vld [vmem:[#allocation70_spill] sm:$0xff] }
 0x473   :  { %v1345_v21 = vsub.f32 1.0, %v1344_v32  ;;  %vm1365_vm1 = vmor %vm1363_vm15, %vm1364_vm13  ;;  %v1382_v54 = vand.u32 2147483647, %v1342_v12  ;;  %v1385_v60 = vor.u32 1.1754944e-38, %v1384_v52  ;;  %v1728_v32 = vld [vmem:[#allocation6 + $0x120] sm:$0xff]  ;;  %v1709_v52 = vld [vmem:[#allocation6 + $0x88] sm:$0xff] }
 0x474   :  { %v1360_v23 = vsub.f32 1.0, %v1359_v20  ;;  %v1729_v20 = vld [vmem:[#allocation6 + $0x128] sm:$0xff] }
 0x475   :  { %v1346_v6 = vmul.f32 %v2923_v19, %v1345_v21  ;;  %vm1383_vm7 = vcmp.eq.f32.partialorder %v1382_v54, 8.507059e+37  ;;  %v1730_v21 = vld [vmem:[#allocation6 + $0x130] sm:$0xff] }
 0x476   :  { %v1361_v30 = vmul.f32 %v2925_v24, %v1360_v23  ;;  %v1731_v23 = vld [vmem:[#allocation6 + $0x138] sm:$0xff] }
 0x477   :  { %v2927_v10 = vpop.eup %2926  ;;  %v1347_v29 = vadd.f32 %v2923_v19, %v1346_v6  ;;  %v1724_v6 = vld [vmem:[#allocation6 + $0x100] sm:$0xff] }
 0x478   :  { %v1374_v22 = vmul.f32 %v2927_v10, %v1342_v12  ;;  %v1362_v58 = vadd.f32 %v2925_v24, %v1361_v30  ;;  %v2929_v35 = vpop.eup %2928  ;;  %vm1379_vm4 = vweird.f32 %v2927_v10  ;;  %v1735_v12 = vld [vmem:[#allocation6 + $0x158] sm:$0xff]  ;;  %v1726_v30 = vld [vmem:[#allocation6 + $0x110] sm:$0xff] }
 0x479   :  { %v1351_v34 = vsel %vm1350_vm0, %v2923_v19, %v1347_v29  ;;  %vm1380_vm6 = vmor %vm1378_vm5, %vm1379_vm4  ;;  %v5388_v19 = vld [vmem:[#allocation69_spill] sm:$0xff]  ;;  %v1721_v29 = vld [vmem:[#allocation6 + $0xe8] sm:$0xff] }
 0x47a   :  { %v1375_v36 = vsub.f32 1.0, %v1374_v22  ;;  %v1356_v37 = vsel %vm1353_vm2, %v1355_v5, %v1351_v34  ;;  %v1366_v38 = vsel %vm1365_vm1, %v2925_v24, %v1362_v58  ;;  %v1722_v22 = vld [vmem:[#allocation6 + $0xf0] sm:$0xff]  ;;  %v1723_v5 = vld [vmem:[#allocation6 + $0xf8] sm:$0xff]  ;;  %v1716_v58 = vld [vmem:[#allocation6 + $0xc0] sm:$0xff] }
 0x47b   :  { %v1371_v40 = vsel %vm1368_vm3, %v1370_v33, %v1366_v38  ;;  %v1390_v41 = vmul.f32 %v2929_v35, %v1356_v37  ;;  %v1717_v33 = vld [vmem:[#allocation6 + $0xc8] sm:$0xff]  ;;  %v1718_v34 = vld [vmem:[#allocation6 + $0xd0] sm:$0xff]  ;;  %v1712_v37 = vld [vmem:[#allocation6 + $0xa0] sm:$0xff] }
 0x47c   :  { %v1389_v42 = vmul.f32 %v1371_v40, %v4355_v25  ;;  %v1376_v43 = vmul.f32 %v2927_v10, %v1375_v36  ;;  %v1752_v25 = vld [vmem:[#allocation6 + $0x1e0] sm:$0xff]  ;;  %v1719_v36 = vld [vmem:[#allocation6 + $0xd8] sm:$0xff]  ;;  %v1713_v38 = vld [vmem:[#allocation6 + $0xa8] sm:$0xff] }
 0x47d   :  { %v5390_v40 = vld [vmem:[#allocation71_spill] sm:$0xff] }
 0x47e   :  { %v4427_v44 = vadd.f32 %v1390_v41, %v1389_v42  ;;  %v1377_v45 = vadd.f32 %v2927_v10, %v1376_v43  ;;  %v1714_v42 = vld [vmem:[#allocation6 + $0xb0] sm:$0xff]  ;;  %v1715_v43 = vld [vmem:[#allocation6 + $0xb8] sm:$0xff] }
 0x480   :  { %2930 = vtanh.f32 %v4427_v44  ;;  %v1381_v61 = vsel %vm1380_vm6, %v2927_v10, %v1377_v45  ;;  %v1720_v10 = vld [vmem:[#allocation6 + $0xe0] sm:$0xff] }
 0x481   :  { %v1386_v53 = vsel %vm1383_vm7, %v1385_v60, %v1381_v61  ;;  %v1708_v45 = vld [vmem:[#allocation6 + $0x80] sm:$0xff]  ;;  %v1710_v61 = vld [vmem:[#allocation6 + $0x90] sm:$0xff]  ;;  %v1711_v60 = vld [vmem:[#allocation6 + $0x98] sm:$0xff] }
 0x486   :  { %v2931_v39 = vpop.eup %2930 }
 0x487   :  { %v1393_v51 = vmul.f32 %v2931_v39, %v1386_v53 }
 0x489   :  { %1410 = vmatmul.f32.vlgmr.msrb.gmra.mxu0 %v1393_v51  ;;  %1430 = vmatmul.f32.vlgmr.msrb.gmra.mxu1 %v1393_v51 }
 0x48a   :  { %1450 = vmatmul.f32.vlgmr.msrb.gmra.mxu2 %v1393_v51  ;;  %1470 = vmatmul.f32.vlgmr.msrb.gmra.mxu3 %v1393_v51 }
 0x48b   :  { %1830 = vmatpush.msrb.mxu0 %v1752_v25  ;;  %1859 = vmatpush.msrb.mxu1 %v1753_v47  ;;  %v1704_v47 = vld [vmem:[#allocation6 + $0x60] sm:$0xff] }
 0x48c   :  { %1888 = vmatpush.msrb.mxu2 %v1754_v46  ;;  %1917 = vmatpush.msrb.mxu3 %v1755_v63  ;;  %v1705_v46 = vld [vmem:[#allocation6 + $0x68] sm:$0xff]  ;;  %v1706_v63 = vld [vmem:[#allocation6 + $0x70] sm:$0xff] }
 0x48d   :  { %1831 = vmatpush.msrb.mxu0 %v1748_v0  ;;  %1860 = vmatpush.msrb.mxu1 %v1749_v55  ;;  %v1707_v0 = vld [vmem:[#allocation6 + $0x78] sm:$0xff]  ;;  %v1700_v55 = vld [vmem:[#allocation6 + $0x40] sm:$0xff] }
 0x48e   :  { %1889 = vmatpush.msrb.mxu2 %v1750_v50  ;;  %1918 = vmatpush.msrb.mxu3 %v1751_v62  ;;  %v1701_v50 = vld [vmem:[#allocation6 + $0x48] sm:$0xff]  ;;  %v1702_v62 = vld [vmem:[#allocation6 + $0x50] sm:$0xff] }
 0x48f   :  { %1832 = vmatpush.msrb.mxu0 %v1744_v56  ;;  %1861 = vmatpush.msrb.mxu1 %v1745_v49  ;;  %v1703_v56 = vld [vmem:[#allocation6 + $0x58] sm:$0xff]  ;;  %v1696_v49 = vld [vmem:[#allocation6 + $0x20] sm:$0xff] }
 0x490   :  { %1890 = vmatpush.msrb.mxu2 %v1746_v13  ;;  %1919 = vmatpush.msrb.mxu3 %v1747_v48  ;;  %v1697_v48 = vld [vmem:[#allocation6 + $0x28] sm:$0xff] }
 0x491   :  { %1833 = vmatpush.msrb.mxu0 %v1740_v59  ;;  %1862 = vmatpush.msrb.mxu1 %v1741_v57  ;;  %v1698_v59 = vld [vmem:[#allocation6 + $0x30] sm:$0xff]  ;;  %v1699_v57 = vld [vmem:[#allocation6 + $0x38] sm:$0xff] }
 0x492   :  { %1891 = vmatpush.msrb.mxu2 %v1742_v26  ;;  %1920 = vmatpush.msrb.mxu3 %v1743_v1  ;;  %v1692_v1 = vld [vmem:[#allocation6] sm:$0xff] }
 0x493   :  { %1834 = vmatpush.msrb.mxu0 %v1736_v2  ;;  %1863 = vmatpush.msrb.mxu1 %v1737_v3  ;;  %v1693_v2 = vld [vmem:[#allocation6 + $0x8] sm:$0xff] }
 0x494   :  { %1892 = vmatpush.msrb.mxu2 %v1738_v4  ;;  %1921 = vmatpush.msrb.mxu3 %v1739_v28  ;;  %v1694_v4 = vld [vmem:[#allocation6 + $0x10] sm:$0xff]  ;;  %v1695_v28 = vld [vmem:[#allocation6 + $0x18] sm:$0xff] }
 0x495   :  { %1835 = vmatpush.msrb.mxu0 %v1732_v14  ;;  %1864 = vmatpush.msrb.mxu1 %v1733_v17  ;;  %v5391_v17 = vld [vmem:[#allocation72_spill] sm:$0xff] }
 0x496   :  { %1893 = vmatpush.msrb.mxu2 %v1734_v8  ;;  %1922 = vmatpush.msrb.mxu3 %v1735_v12 }
 0x497   :  { %1836 = vmatpush.msrb.mxu0 %v1728_v32  ;;  %1865 = vmatpush.msrb.mxu1 %v1729_v20 }
 0x498   :  { %1894 = vmatpush.msrb.mxu2 %v1730_v21  ;;  %1923 = vmatpush.msrb.mxu3 %v1731_v23 }
 0x499   :  { %1837 = vmatpush.msrb.mxu0 %v1724_v6  ;;  %1866 = vmatpush.msrb.mxu1 %v1725_v15 }
 0x49a   :  { %1895 = vmatpush.msrb.mxu2 %v1726_v30  ;;  %1924 = vmatpush.msrb.mxu3 %v1727_v18 }
 0x49b   :  { %1838 = vmatpush.msrb.mxu0 %v1720_v10  ;;  %1867 = vmatpush.msrb.mxu1 %v1721_v29 }
 0x49c   :  { %1896 = vmatpush.msrb.mxu2 %v1722_v22  ;;  %1925 = vmatpush.msrb.mxu3 %v1723_v5 }
 0x49d   :  { %1839 = vmatpush.msrb.mxu0 %v1716_v58  ;;  %1868 = vmatpush.msrb.mxu1 %v1717_v33 }
 0x49e   :  { %1897 = vmatpush.msrb.mxu2 %v1718_v34  ;;  %1926 = vmatpush.msrb.mxu3 %v1719_v36 }
 0x49f   :  { %1840 = vmatpush.msrb.mxu0 %v1712_v37  ;;  %1869 = vmatpush.msrb.mxu1 %v1713_v38 }
 0x4a0   :  { %1898 = vmatpush.msrb.mxu2 %v1714_v42  ;;  %1927 = vmatpush.msrb.mxu3 %v1715_v43 }
 0x4a1   :  { %1841 = vmatpush.msrb.mxu0 %v1708_v45  ;;  %1870 = vmatpush.msrb.mxu1 %v1709_v52 }
 0x4a2   :  { %1899 = vmatpush.msrb.mxu2 %v1710_v61  ;;  %1928 = vmatpush.msrb.mxu3 %v1711_v60  ;;  %v4452_v61 = vld [vmem:[#allocation7 + $0x1e0] sm:$0xff]  ;;  %v4456_v60 = vld [vmem:[#allocation7 + $0x1f0] sm:$0xff] }
 0x4a3   :  { %1842 = vmatpush.msrb.mxu0 %v1704_v47  ;;  %1871 = vmatpush.msrb.mxu1 %v1705_v46  ;;  %v4468_v47 = vld [vmem:[#allocation7 + $0x1d8] sm:$0xff]  ;;  %v4472_v46 = vld [vmem:[#allocation7 + $0x1a0] sm:$0xff] }
 0x4a4   :  { %1900 = vmatpush.msrb.mxu2 %v1706_v63  ;;  %1929 = vmatpush.msrb.mxu3 %v1707_v0  ;;  %v4474_v63 = vld [vmem:[#allocation7 + $0x1a8] sm:$0xff]  ;;  %v4478_v0 = vld [vmem:[#allocation7 + $0x1b0] sm:$0xff] }
 0x4a5   :  { %1843 = vmatpush.msrb.mxu0 %v1700_v55  ;;  %1872 = vmatpush.msrb.mxu1 %v1701_v50  ;;  %v4480_v55 = vld [vmem:[#allocation7 + $0x1b8] sm:$0xff]  ;;  %v1688_v50 = vld [vmem:[%s5393_s7] sm:$0xff] }
 0x4a6   :  { %1901 = vmatpush.msrb.mxu2 %v1702_v62  ;;  %1930 = vmatpush.msrb.mxu3 %v1703_v56  ;;  %v4491_v62 = vld [vmem:[#allocation7 + $0x180] sm:$0xff]  ;;  %v4493_v56 = vld [vmem:[#allocation7 + $0x188] sm:$0xff] }
 0x4a7   :  { %1844 = vmatpush.msrb.mxu0 %v1696_v49  ;;  %1873 = vmatpush.msrb.mxu1 %v1697_v48  ;;  %v4495_v49 = vld [vmem:[#allocation7 + $0x190] sm:$0xff]  ;;  %v4499_v48 = vld [vmem:[#allocation7 + $0x160] sm:$0xff] }
 0x4a8   :  { %1902 = vmatpush.msrb.mxu2 %v1698_v59  ;;  %1931 = vmatpush.msrb.mxu3 %v1699_v57  ;;  %v4501_v59 = vld [vmem:[#allocation7 + $0x168] sm:$0xff]  ;;  %v4505_v57 = vld [vmem:[#allocation7 + $0x170] sm:$0xff] }
 0x4a9   :  { %1845 = vmatpush.msrb.mxu0 %v1692_v1  ;;  %1874 = vmatpush.msrb.mxu1 %v1693_v2  ;;  %v4511_v1 = vld [vmem:[#allocation7 + $0x140] sm:$0xff]  ;;  %v4513_v2 = vld [vmem:[#allocation7 + $0x148] sm:$0xff] }
 0x4aa   :  { %1903 = vmatpush.msrb.mxu2 %v1694_v4  ;;  %1932 = vmatpush.msrb.mxu3 %v1695_v28  ;;  %v4519_v4 = vld [vmem:[#allocation7 + $0x158] sm:$0xff]  ;;  %v1689_v28 = vld [vmem:[%s5393_s7 + $0x8] sm:$0xff] }
 0x506   :  { %v1411_v27 = vpop.f32.mrf.mxu0  ;;  %v1431_v16 = vpop.f32.mrf.mxu1 }
 0x507   :  { %v1474_v7 = vadd.f32 %v1411_v27, %v5388_v19  ;;  %v1475_v24 = vadd.f32 %v1431_v16, %v5389_v9 }
 0x509   :  { %v2800_v11 = vmul.f32 -1.442695, %v1474_v7  ;;  %v2801_v31 = vmul.f32 -1.442695, %v1475_v24 }
 0x50b   :  { %2932 = vpow2.f32 %v2800_v11 }
 0x50c   :  { %2934 = vpow2.f32 %v2801_v31 }
 0x50d   :  { %v1451_v35 = vpop.f32.mrf.mxu2  ;;  %v1471_v13 = vpop.f32.mrf.mxu3 }
 0x50e   :  { %v1476_v41 = vadd.f32 %v1451_v35, %v5390_v40  ;;  %v1477_v8 = vadd.f32 %v1471_v13, %v5391_v17  ;;  %v4497_v13 = vld [vmem:[#allocation7 + $0x198] sm:$0xff]  ;;  %v4532_v17 = vld [vmem:[#allocation7 + $0x128] sm:$0xff] }
 0x510   :  { %v2802_v54 = vmul.f32 -1.442695, %v1476_v41 }
 0x511   :  { %v2933_v39 = vpop.eup %2932 }
 0x512   :  { %v2935_v53 = vpop.eup %2934  ;;  %v4433_v51 = vadd.f32 1.0, %v2933_v39  ;;  %2936 = vpow2.f32 %v2802_v54  ;;  %v4458_v39 = vld [vmem:[#allocation7 + $0x1f8] sm:$0xff] }
 0x513   :  { %v4435_v25 = vadd.f32 1.0, %v2935_v53  ;;  %v4460_v53 = vld [vmem:[#allocation7 + $0x1c0] sm:$0xff] }
 0x514   :  { %2938 = vrcp.f32 %v4433_v51  ;;  %v1501_v9 = vand.u32 2147483648, %v4433_v51  ;;  %v1499_v20 = vand.u32 2147483647, %v4433_v51  ;;  %vm1495_vm10 = vweird.f32 %v4433_v51 }
 0x515   :  { %2940 = vrcp.f32 %v4435_v25  ;;  %v1516_v24 = vand.u32 2147483648, %v4435_v25  ;;  %v1514_v23 = vand.u32 2147483647, %v4435_v25  ;;  %vm1510_vm11 = vweird.f32 %v4435_v25 }
 0x516   :  { %v1502_v15 = vor.u32 1.1754944e-38, %v1501_v9  ;;  %vm1500_vm14 = vcmp.eq.f32.partialorder %v1499_v20, 8.507059e+37  ;;  %v4550_v9 = vld [vmem:[#allocation7 + $0xe0] sm:$0xff]  ;;  %v4558_v20 = vld [vmem:[#allocation7 + $0xf8] sm:$0xff] }
 0x517   :  { %v1517_v18 = vor.u32 1.1754944e-38, %v1516_v24  ;;  %vm1515_vm15 = vcmp.eq.f32.partialorder %v1514_v23, 8.507059e+37  ;;  %5397 = vst [vmem:[#allocation51_spill] sm:$0xff] %v4550_v9  ;;  %v4552_v24 = vld [vmem:[#allocation7 + $0xe8] sm:$0xff]  ;;  %v4569_v23 = vld [vmem:[#allocation7 + $0xc0] sm:$0xff] }
 0x518   :  { %v2937_v26 = vpop.eup %2936  ;;  %5398 = vst [vmem:[#allocation52_spill] sm:$0xff] %v4552_v24 }
 0x519   :  { %v1489_v3 = vadd.f32 1.0, %v2937_v26  ;;  %v4507_v26 = vld [vmem:[#allocation7 + $0x178] sm:$0xff]  ;;  %5400 = vst [vmem:[#allocation54_spill] sm:$0xff] %v4558_v20 }
 0x51a   :  { %v2939_v14 = vpop.eup %2938  ;;  %5401 = vst [vmem:[#allocation55_spill] sm:$0xff] %v4569_v23 }
 0x51b   :  { %v2941_v27 = vpop.eup %2940  ;;  %v1491_v16 = vmul.f32 %v2939_v14, %v4433_v51  ;;  %2942 = vrcp.f32 %v1489_v3  ;;  %vm1496_vm8 = vweird.f32 %v2939_v14  ;;  %v1531_v40 = vand.u32 2147483648, %v1489_v3  ;;  %v4462_v51 = vld [vmem:[#allocation7 + $0x1c8] sm:$0xff] }
 0x51c   :  { %v1506_v12 = vmul.f32 %v2941_v27, %v4435_v25  ;;  %2944 = vtanh.f32 %v1477_v8  ;;  %vm1511_vm9 = vweird.f32 %v2941_v27  ;;  %vm1497_vm12 = vmor %vm1495_vm10, %vm1496_vm8  ;;  %vm1525_vm1 = vweird.f32 %v1489_v3  ;;  %v4466_v25 = vld [vmem:[#allocation7 + $0x1d0] sm:$0xff] }
 0x51d   :  { %v1492_v19 = vsub.f32 1.0, %v1491_v16  ;;  %vm1512_vm13 = vmor %vm1510_vm11, %vm1511_vm9  ;;  %v1529_v41 = vand.u32 2147483647, %v1489_v3  ;;  %v1532_v43 = vor.u32 1.1754944e-38, %v1531_v40  ;;  %v4534_v8 = vld [vmem:[#allocation7 + $0x130] sm:$0xff]  ;;  %v4538_v16 = vld [vmem:[#allocation7 + $0x100] sm:$0xff] }
 0x51e   :  { %v1507_v7 = vsub.f32 1.0, %v1506_v12  ;;  %v4540_v12 = vld [vmem:[#allocation7 + $0x108] sm:$0xff]  ;;  %v4616_v40 = vld [vmem:[#allocation7 + $0x40] sm:$0xff] }
 0x51f   :  { %v1493_v32 = vmul.f32 %v2939_v14, %v1492_v19  ;;  %vm1530_vm3 = vcmp.eq.f32.partialorder %v1529_v41, 8.507059e+37  ;;  %5394 = vst [vmem:[#allocation47_spill] sm:$0xff] %v4540_v12  ;;  %v4544_v19 = vld [vmem:[#allocation7 + $0x110] sm:$0xff]  ;;  %v4618_v41 = vld [vmem:[#allocation7 + $0x48] sm:$0xff] }
 0x520   :  { %v1508_v21 = vmul.f32 %v2941_v27, %v1507_v7  ;;  %5395 = vst [vmem:[#allocation50_spill] sm:$0xff] %v4544_v19  ;;  %v4546_v7 = vld [vmem:[#allocation7 + $0x118] sm:$0xff] }
 0x521   :  { %v2943_v11 = vpop.eup %2942  ;;  %v1494_v31 = vadd.f32 %v2939_v14, %v1493_v32  ;;  %5396 = vst [vmem:[#allocation48_spill] sm:$0xff] %v4546_v7  ;;  %v4556_v32 = vld [vmem:[#allocation7 + $0xf0] sm:$0xff] }
 0x522   :  { %v1521_v6 = vmul.f32 %v2943_v11, %v1489_v3  ;;  %v1509_v30 = vadd.f32 %v2941_v27, %v1508_v21  ;;  %v2945_v29 = vpop.eup %2944  ;;  %vm1526_vm0 = vweird.f32 %v2943_v11  ;;  %v4517_v3 = vld [vmem:[#allocation7 + $0x150] sm:$0xff]  ;;  %5399 = vst [vmem:[#allocation53_spill] sm:$0xff] %v4556_v32 }
 0x523   :  { %v1498_v10 = vsel %vm1497_vm12, %v2939_v14, %v1494_v31  ;;  %vm1527_vm2 = vmor %vm1525_vm1, %vm1526_vm0  ;;  %v4530_v14 = vld [vmem:[#allocation7 + $0x120] sm:$0xff]  ;;  %v1690_v21 = vld [vmem:[%s5393_s7 + $0x10] sm:$0xff]  ;;  %5417 = vst [vmem:[#allocation27_spill] sm:$0xff] %v4616_v40 }
 0x524   :  { %v1522_v22 = vsub.f32 1.0, %v1521_v6  ;;  %v1503_v5 = vsel %vm1500_vm14, %v1502_v15, %v1498_v10  ;;  %v1513_v58 = vsel %vm1512_vm13, %v2941_v27, %v1509_v30  ;;  %v4536_v27 = vld [vmem:[#allocation7 + $0x138] sm:$0xff]  ;;  %v4573_v31 = vld [vmem:[#allocation7 + $0xd0] sm:$0xff]  ;;  %v4577_v15 = vld [vmem:[#allocation7 + $0xa0] sm:$0xff]  ;;  %5418 = vst [vmem:[#allocation28_spill] sm:$0xff] %v4618_v41 }
 0x525   :  { %v1518_v33 = vsel %vm1515_vm15, %v1517_v18, %v1513_v58  ;;  %v1537_v34 = vmul.f32 %v2945_v29, %v1503_v5  ;;  %5403 = vst [vmem:[#allocation57_spill] sm:$0xff] %v4573_v31  ;;  %v4575_v6 = vld [vmem:[#allocation7 + $0xd8] sm:$0xff]  ;;  %v4579_v30 = vld [vmem:[#allocation7 + $0xa8] sm:$0xff]  ;;  %v4583_v18 = vld [vmem:[#allocation7 + $0xb0] sm:$0xff] }
 0x526   :  { %v1536_v35 = vmul.f32 %v1518_v33, %v4427_v44  ;;  %v1523_v36 = vmul.f32 %v2943_v11, %v1522_v22  ;;  %v4454_v44 = vld [vmem:[#allocation7 + $0x1e8] sm:$0xff]  ;;  %5404 = vst [vmem:[#allocation58_spill] sm:$0xff] %v4575_v6  ;;  %v4585_v10 = vld [vmem:[#allocation7 + $0xb8] sm:$0xff]  ;;  %v4589_v29 = vld [vmem:[#allocation7 + $0x80] sm:$0xff] }
 0x527   :  { %5405 = vst [vmem:[#allocation59_spill] sm:$0xff] %v4577_v15  ;;  %v4591_v22 = vld [vmem:[#allocation7 + $0x88] sm:$0xff]  ;;  %v4595_v5 = vld [vmem:[#allocation7 + $0x90] sm:$0xff]  ;;  %v4597_v58 = vld [vmem:[#allocation7 + $0x98] sm:$0xff] }
 0x528   :  { %v4449_v37 = vadd.f32 %v1537_v34, %v1536_v35  ;;  %v1524_v38 = vadd.f32 %v2943_v11, %v1523_v36  ;;  %5406 = vst [vmem:[#allocation60_spill] sm:$0xff] %v4579_v30  ;;  %v1691_v33 = vld [vmem:[%s5393_s7 + $0x18] sm:$0xff]  ;;  %v4608_v34 = vld [vmem:[#allocation7 + $0x60] sm:$0xff]  ;;  %v4610_v35 = vld [vmem:[#allocation7 + $0x68] sm:$0xff] }
 0x529   :  { %5407 = vst [vmem:[#allocation61_spill] sm:$0xff] %v4583_v18  ;;  %v4612_v36 = vld [vmem:[#allocation7 + $0x70] sm:$0xff] }
 0x52a   :  { %5392 = vst [vmem:[#allocation49_spill] sm:$0xff] %v4449_v37  ;;  %2946 = vtanh.f32 %v4449_v37  ;;  %v1528_v42 = vsel %vm1527_vm2, %v2943_v11, %v1524_v38  ;;  %v4571_v11 = vld [vmem:[#allocation7 + $0xc8] sm:$0xff]  ;;  %v4614_v38 = vld [vmem:[#allocation7 + $0x78] sm:$0xff] }
 0x52b   :  { %v1533_v52 = vsel %vm1530_vm3, %v1532_v43, %v1528_v42  ;;  %5402 = vst [vmem:[#allocation56_spill] sm:$0xff] %v4571_v11  ;;  %v4622_v42 = vld [vmem:[#allocation7 + $0x50] sm:$0xff]  ;;  %v4624_v43 = vld [vmem:[#allocation7 + $0x58] sm:$0xff] }
 0x52c   :  { %5408 = vst [vmem:[#allocation62_spill] sm:$0xff] %v4585_v10  ;;  %v4648_v37 = vld [vmem:[#allocation7 + $0x18] sm:$0xff] }
 0x52d   :  { %5409 = vst [vmem:[#allocation63_spill] sm:$0xff] %v4589_v29 }
 0x52e   :  { %5410 = vst [vmem:[#allocation64_spill] sm:$0xff] %v4591_v22 }
 0x52f   :  { %5411 = vst [vmem:[#allocation21_spill] sm:$0xff] %v4595_v5 }
 0x530   :  { %v2947_v45 = vpop.eup %2946  ;;  %5412 = vst [vmem:[#allocation22_spill] sm:$0xff] %v4597_v58 }
 0x531   :  { %v1540_v54 = vmul.f32 %v2947_v45, %v1533_v52  ;;  %5413 = vst [vmem:[#allocation23_spill] sm:$0xff] %v4608_v34  ;;  %v4628_v45 = vld [vmem:[#allocation7 + $0x20] sm:$0xff]  ;;  %v4630_v52 = vld [vmem:[#allocation7 + $0x28] sm:$0xff] }
 0x532   :  { %5414 = vst [vmem:[#allocation24_spill] sm:$0xff] %v4610_v35 }
 0x533   :  { %1557 = vmatmul.f32.vlgmr.msra.gmra.mxu0 %v1540_v54  ;;  %1577 = vmatmul.f32.vlgmr.msra.gmra.mxu1 %v1540_v54  ;;  %5415 = vst [vmem:[#allocation25_spill] sm:$0xff] %v4612_v36 }
 0x534   :  { %1597 = vmatmul.f32.vlgmr.msra.gmra.mxu2 %v1540_v54  ;;  %1617 = vmatmul.f32.vlgmr.msra.gmra.mxu3 %v1540_v54  ;;  %5416 = vst [vmem:[#allocation26_spill] sm:$0xff] %v4614_v38  ;;  %v4634_v54 = vld [vmem:[#allocation7 + $0x30] sm:$0xff] }
 0x535   :  { %1946 = vmatpush.msra.mxu0 %v4452_v61  ;;  %1966 = vmatpush.msra.mxu1 %v4454_v44  ;;  %5419 = vst [vmem:[#allocation29_spill] sm:$0xff] %v4622_v42 }
 0x536   :  { %1986 = vmatpush.msra.mxu2 %v4456_v60  ;;  %2006 = vmatpush.msra.mxu3 %v4458_v39  ;;  %5420 = vst [vmem:[#allocation30_spill] sm:$0xff] %v4624_v43 }
 0x537   :  { %1947 = vmatpush.msra.mxu0 %v4460_v53  ;;  %1967 = vmatpush.msra.mxu1 %v4462_v51  ;;  %5421 = vst [vmem:[#allocation31_spill] sm:$0xff] %v4628_v45 }
 0x538   :  { %1987 = vmatpush.msra.mxu2 %v4466_v25  ;;  %2007 = vmatpush.msra.mxu3 %v4468_v47  ;;  %5422 = vst [vmem:[#allocation32_spill] sm:$0xff] %v4630_v52 }
 0x539   :  { %1948 = vmatpush.msra.mxu0 %v4472_v46  ;;  %1968 = vmatpush.msra.mxu1 %v4474_v63  ;;  %5423 = vst [vmem:[#allocation33_spill] sm:$0xff] %v4634_v54 }
 0x53a   :  { %1988 = vmatpush.msra.mxu2 %v4478_v0  ;;  %2008 = vmatpush.msra.mxu3 %v4480_v55  ;;  %5428 = vst [vmem:[#allocation38_spill] sm:$0xff] %v4648_v37 }
 0x53b   :  { %1846 = vmatmul.f32.vlgmr.msrb.gmra.mxu0 %v1688_v50  ;;  %1875 = vmatmul.f32.vlgmr.msrb.gmra.mxu1 %v1688_v50 }
 0x53c   :  { %1904 = vmatmul.f32.vlgmr.msrb.gmra.mxu2 %v1688_v50  ;;  %1933 = vmatmul.f32.vlgmr.msrb.gmra.mxu3 %v1688_v50  ;;  %v4636_v50 = vld [vmem:[#allocation7 + $0x38] sm:$0xff] }
 0x53d   :  { %1949 = vmatpush.msra.mxu0 %v4491_v62  ;;  %1969 = vmatpush.msra.mxu1 %v4493_v56  ;;  %5424 = vst [vmem:[#allocation34_spill] sm:$0xff] %v4636_v50 }
 0x53e   :  { %1989 = vmatpush.msra.mxu2 %v4495_v49  ;;  %2009 = vmatpush.msra.mxu3 %v4497_v13 }
 0x53f   :  { %1950 = vmatpush.msra.mxu0 %v4499_v48  ;;  %1970 = vmatpush.msra.mxu1 %v4501_v59 }
 0x540   :  { %1990 = vmatpush.msra.mxu2 %v4505_v57  ;;  %2010 = vmatpush.msra.mxu3 %v4507_v26 }
 0x541   :  { %1951 = vmatpush.msra.mxu0 %v4511_v1  ;;  %1971 = vmatpush.msra.mxu1 %v4513_v2 }
 0x542   :  { %1991 = vmatpush.msra.mxu2 %v4517_v3  ;;  %2011 = vmatpush.msra.mxu3 %v4519_v4 }
 0x543   :  { %1849 = vmatmul.f32.gmra.mxu0 %v1689_v28  ;;  %1878 = vmatmul.f32.gmra.mxu1 %v1689_v28 }
 0x544   :  { %1907 = vmatmul.f32.gmra.mxu2 %v1689_v28  ;;  %1936 = vmatmul.f32.gmra.mxu3 %v1689_v28  ;;  %v4640_v28 = vld [vmem:[#allocation7] sm:$0xff] }
 0x545   :  { %1952 = vmatpush.msra.mxu0 %v4530_v14  ;;  %1972 = vmatpush.msra.mxu1 %v4532_v17  ;;  %5425 = vst [vmem:[#allocation35_spill] sm:$0xff] %v4640_v28 }
 0x546   :  { %1992 = vmatpush.msra.mxu2 %v4534_v8  ;;  %2012 = vmatpush.msra.mxu3 %v4536_v27 }
 0x547   :  { %1953 = vmatpush.msra.mxu0 %v4538_v16  ;;  %1973 = vmatpush.msra.mxu1 %v4540_v12 }
 0x548   :  { %1993 = vmatpush.msra.mxu2 %v4544_v19  ;;  %2013 = vmatpush.msra.mxu3 %v4546_v7 }
 0x549   :  { %1954 = vmatpush.msra.mxu0 %v4550_v9  ;;  %1974 = vmatpush.msra.mxu1 %v4552_v24 }
 0x54a   :  { %1994 = vmatpush.msra.mxu2 %v4556_v32  ;;  %2014 = vmatpush.msra.mxu3 %v4558_v20 }
 0x54b   :  { %1852 = vmatmul.f32.gmra.mxu0 %v1690_v21  ;;  %1881 = vmatmul.f32.gmra.mxu1 %v1690_v21 }
 0x54c   :  { %1910 = vmatmul.f32.gmra.mxu2 %v1690_v21  ;;  %1939 = vmatmul.f32.gmra.mxu3 %v1690_v21  ;;  %v4642_v21 = vld [vmem:[#allocation7 + $0x8] sm:$0xff] }
 0x54d   :  { %1955 = vmatpush.msra.mxu0 %v4569_v23  ;;  %1975 = vmatpush.msra.mxu1 %v4571_v11  ;;  %5426 = vst [vmem:[#allocation36_spill] sm:$0xff] %v4642_v21 }
 0x54e   :  { %1995 = vmatpush.msra.mxu2 %v4573_v31  ;;  %2015 = vmatpush.msra.mxu3 %v4575_v6 }
 0x54f   :  { %1956 = vmatpush.msra.mxu0 %v4577_v15  ;;  %1976 = vmatpush.msra.mxu1 %v4579_v30 }
 0x550   :  { %1996 = vmatpush.msra.mxu2 %v4583_v18  ;;  %2016 = vmatpush.msra.mxu3 %v4585_v10 }
 0x551   :  { %1957 = vmatpush.msra.mxu0 %v4589_v29  ;;  %1977 = vmatpush.msra.mxu1 %v4591_v22 }
 0x552   :  { %1997 = vmatpush.msra.mxu2 %v4595_v5  ;;  %2017 = vmatpush.msra.mxu3 %v4597_v58 }
 0x553   :  { %1855 = vmatmul.f32.gmra.mxu0 %v1691_v33  ;;  %1884 = vmatmul.f32.gmra.mxu1 %v1691_v33 }
 0x554   :  { %1913 = vmatmul.f32.gmra.mxu2 %v1691_v33  ;;  %1942 = vmatmul.f32.gmra.mxu3 %v1691_v33  ;;  %v4646_v33 = vld [vmem:[#allocation7 + $0x10] sm:$0xff] }
 0x555   :  { %1958 = vmatpush.msra.mxu0 %v4608_v34  ;;  %1978 = vmatpush.msra.mxu1 %v4610_v35  ;;  %5427 = vst [vmem:[#allocation37_spill] sm:$0xff] %v4646_v33 }
 0x556   :  { %1998 = vmatpush.msra.mxu2 %v4612_v36  ;;  %2018 = vmatpush.msra.mxu3 %v4614_v38 }
 0x557   :  { %1959 = vmatpush.msra.mxu0 %v4616_v40  ;;  %1979 = vmatpush.msra.mxu1 %v4618_v41 }
 0x558   :  { %1999 = vmatpush.msra.mxu2 %v4622_v42  ;;  %2019 = vmatpush.msra.mxu3 %v4624_v43  ;;  %v5429_v43 = vmov 0.0  }
 0x559   :  { %1960 = vmatpush.msra.mxu0 %v4628_v45  ;;  %1980 = vmatpush.msra.mxu1 %v4630_v52 }
 0x55a   :  { %2000 = vmatpush.msra.mxu2 %v4634_v54  ;;  %2020 = vmatpush.msra.mxu3 %v4636_v50 }
 0x55b   :  { %1961 = vmatpush.msra.mxu0 %v4640_v28  ;;  %1981 = vmatpush.msra.mxu1 %v4642_v21 }
 0x55c   :  { %2001 = vmatpush.msra.mxu2 %v4646_v33  ;;  %2021 = vmatpush.msra.mxu3 %v4648_v37 }
 0x55d   :  { %1962 = vmatmul.f32.vlgmr.msra.gmra.mxu0 %v5429_v43  ;;  %1982 = vmatmul.f32.vlgmr.msra.gmra.mxu1 %v5429_v43 }
 0x55e   :  { %2002 = vmatmul.f32.vlgmr.msra.gmra.mxu2 %v5429_v43  ;;  %2022 = vmatmul.f32.vlgmr.msra.gmra.mxu3 %v5429_v43  ;;  %v5430_v43 = vld [vmem:[#allocation30_spill] sm:$0xff] }
 0x55f   :  { %2093 = vmatpush.msrb.mxu0 %v4452_v61  ;;  %2113 = vmatpush.msrb.mxu1 %v4454_v44 }
 0x560   :  { %2133 = vmatpush.msrb.mxu2 %v4456_v60  ;;  %2153 = vmatpush.msrb.mxu3 %v4458_v39 }
 0x561   :  { %2094 = vmatpush.msrb.mxu0 %v4460_v53  ;;  %2114 = vmatpush.msrb.mxu1 %v4462_v51 }
 0x562   :  { %2134 = vmatpush.msrb.mxu2 %v4466_v25  ;;  %2154 = vmatpush.msrb.mxu3 %v4468_v47 }
 0x563   :  { %2095 = vmatpush.msrb.mxu0 %v4472_v46  ;;  %2115 = vmatpush.msrb.mxu1 %v4474_v63 }
 0x564   :  { %2135 = vmatpush.msrb.mxu2 %v4478_v0  ;;  %2155 = vmatpush.msrb.mxu3 %v4480_v55 }
 0x565   :  { %2096 = vmatpush.msrb.mxu0 %v4491_v62  ;;  %2116 = vmatpush.msrb.mxu1 %v4493_v56 }
 0x566   :  { %2136 = vmatpush.msrb.mxu2 %v4495_v49  ;;  %2156 = vmatpush.msrb.mxu3 %v4497_v13 }
 0x567   :  { %2097 = vmatpush.msrb.mxu0 %v4499_v48  ;;  %2117 = vmatpush.msrb.mxu1 %v4501_v59 }
 0x568   :  { %2137 = vmatpush.msrb.mxu2 %v4505_v57  ;;  %2157 = vmatpush.msrb.mxu3 %v4507_v26 }
 0x569   :  { %2098 = vmatpush.msrb.mxu0 %v4511_v1  ;;  %2118 = vmatpush.msrb.mxu1 %v4513_v2 }
 0x56a   :  { %2138 = vmatpush.msrb.mxu2 %v4517_v3  ;;  %2158 = vmatpush.msrb.mxu3 %v4519_v4 }
 0x56b   :  { %2099 = vmatpush.msrb.mxu0 %v4530_v14  ;;  %2119 = vmatpush.msrb.mxu1 %v4532_v17 }
 0x56c   :  { %2139 = vmatpush.msrb.mxu2 %v4534_v8  ;;  %2159 = vmatpush.msrb.mxu3 %v4536_v27 }
 0x56d   :  { %2100 = vmatpush.msrb.mxu0 %v4538_v16  ;;  %2120 = vmatpush.msrb.mxu1 %v4540_v12 }
 0x56e   :  { %2140 = vmatpush.msrb.mxu2 %v4544_v19  ;;  %2160 = vmatpush.msrb.mxu3 %v4546_v7 }
 0x56f   :  { %2101 = vmatpush.msrb.mxu0 %v4550_v9  ;;  %2121 = vmatpush.msrb.mxu1 %v4552_v24 }
 0x570   :  { %2141 = vmatpush.msrb.mxu2 %v4556_v32  ;;  %2161 = vmatpush.msrb.mxu3 %v4558_v20 }
 0x571   :  { %2102 = vmatpush.msrb.mxu0 %v4569_v23  ;;  %2122 = vmatpush.msrb.mxu1 %v4571_v11 }
 0x572   :  { %2142 = vmatpush.msrb.mxu2 %v4573_v31  ;;  %2162 = vmatpush.msrb.mxu3 %v4575_v6 }
 0x573   :  { %2103 = vmatpush.msrb.mxu0 %v4577_v15  ;;  %2123 = vmatpush.msrb.mxu1 %v4579_v30 }
 0x574   :  { %2143 = vmatpush.msrb.mxu2 %v4583_v18  ;;  %2163 = vmatpush.msrb.mxu3 %v4585_v10 }
 0x575   :  { %2104 = vmatpush.msrb.mxu0 %v4589_v29  ;;  %2124 = vmatpush.msrb.mxu1 %v4591_v22 }
 0x576   :  { %2144 = vmatpush.msrb.mxu2 %v4595_v5  ;;  %2164 = vmatpush.msrb.mxu3 %v4597_v58 }
 0x577   :  { %2105 = vmatpush.msrb.mxu0 %v4608_v34  ;;  %2125 = vmatpush.msrb.mxu1 %v4610_v35 }
 0x578   :  { %2145 = vmatpush.msrb.mxu2 %v4612_v36  ;;  %2165 = vmatpush.msrb.mxu3 %v4614_v38 }
 0x579   :  { %2106 = vmatpush.msrb.mxu0 %v4616_v40  ;;  %2126 = vmatpush.msrb.mxu1 %v4618_v41 }
 0x57a   :  { %2146 = vmatpush.msrb.mxu2 %v4622_v42  ;;  %2166 = vmatpush.msrb.mxu3 %v5430_v43 }
 0x57b   :  { %2107 = vmatpush.msrb.mxu0 %v4628_v45  ;;  %2127 = vmatpush.msrb.mxu1 %v4630_v52 }
 0x57c   :  { %2147 = vmatpush.msrb.mxu2 %v4634_v54  ;;  %2167 = vmatpush.msrb.mxu3 %v4636_v50 }
 0x57d   :  { %2108 = vmatpush.msrb.mxu0 %v4640_v28  ;;  %2128 = vmatpush.msrb.mxu1 %v4642_v21 }
 0x57e   :  { %2148 = vmatpush.msrb.mxu2 %v4646_v33  ;;  %2168 = vmatpush.msrb.mxu3 %v4648_v37 }
 0x57f   :  { %2240 = vmatpush.msra.mxu0 %v4452_v61  ;;  %2260 = vmatpush.msra.mxu1 %v4454_v44 }
 0x580   :  { %2280 = vmatpush.msra.mxu2 %v4456_v60  ;;  %2300 = vmatpush.msra.mxu3 %v4458_v39 }
 0x581   :  { %2241 = vmatpush.msra.mxu0 %v4460_v53  ;;  %2261 = vmatpush.msra.mxu1 %v4462_v51 }
 0x582   :  { %2281 = vmatpush.msra.mxu2 %v4466_v25  ;;  %2301 = vmatpush.msra.mxu3 %v4468_v47 }
 0x583   :  { %2242 = vmatpush.msra.mxu0 %v4472_v46  ;;  %2262 = vmatpush.msra.mxu1 %v4474_v63 }
 0x584   :  { %2282 = vmatpush.msra.mxu2 %v4478_v0  ;;  %2302 = vmatpush.msra.mxu3 %v4480_v55 }
 0x585   :  { %2243 = vmatpush.msra.mxu0 %v4491_v62  ;;  %2263 = vmatpush.msra.mxu1 %v4493_v56 }
 0x586   :  { %2283 = vmatpush.msra.mxu2 %v4495_v49  ;;  %2303 = vmatpush.msra.mxu3 %v4497_v13 }
 0x587   :  { %2244 = vmatpush.msra.mxu0 %v4499_v48  ;;  %2264 = vmatpush.msra.mxu1 %v4501_v59 }
 0x588   :  { %2284 = vmatpush.msra.mxu2 %v4505_v57  ;;  %2304 = vmatpush.msra.mxu3 %v4507_v26 }
 0x589   :  { %2245 = vmatpush.msra.mxu0 %v4511_v1  ;;  %2265 = vmatpush.msra.mxu1 %v4513_v2 }
 0x58a   :  { %2285 = vmatpush.msra.mxu2 %v4517_v3  ;;  %2305 = vmatpush.msra.mxu3 %v4519_v4 }
 0x58b   :  { %2246 = vmatpush.msra.mxu0 %v4530_v14  ;;  %2266 = vmatpush.msra.mxu1 %v4532_v17 }
 0x58c   :  { %2286 = vmatpush.msra.mxu2 %v4534_v8  ;;  %2306 = vmatpush.msra.mxu3 %v4536_v27 }
 0x58d   :  { %2247 = vmatpush.msra.mxu0 %v4538_v16  ;;  %2267 = vmatpush.msra.mxu1 %v4540_v12 }
 0x58e   :  { %2287 = vmatpush.msra.mxu2 %v4544_v19  ;;  %2307 = vmatpush.msra.mxu3 %v4546_v7 }
 0x58f   :  { %2248 = vmatpush.msra.mxu0 %v4550_v9  ;;  %2268 = vmatpush.msra.mxu1 %v4552_v24 }
 0x590   :  { %2288 = vmatpush.msra.mxu2 %v4556_v32  ;;  %2308 = vmatpush.msra.mxu3 %v4558_v20 }
 0x591   :  { %2249 = vmatpush.msra.mxu0 %v4569_v23  ;;  %2269 = vmatpush.msra.mxu1 %v4571_v11 }
 0x592   :  { %2289 = vmatpush.msra.mxu2 %v4573_v31  ;;  %2309 = vmatpush.msra.mxu3 %v4575_v6 }
 0x593   :  { %2250 = vmatpush.msra.mxu0 %v4577_v15  ;;  %2270 = vmatpush.msra.mxu1 %v4579_v30 }
 0x594   :  { %2290 = vmatpush.msra.mxu2 %v4583_v18  ;;  %2310 = vmatpush.msra.mxu3 %v4585_v10 }
 0x595   :  { %2251 = vmatpush.msra.mxu0 %v4589_v29  ;;  %2271 = vmatpush.msra.mxu1 %v4591_v22 }
 0x596   :  { %2291 = vmatpush.msra.mxu2 %v4595_v5  ;;  %2311 = vmatpush.msra.mxu3 %v4597_v58 }
 0x597   :  { %2252 = vmatpush.msra.mxu0 %v4608_v34  ;;  %2272 = vmatpush.msra.mxu1 %v4610_v35  ;;  %v5433_v35 = vld [vmem:[#allocation75_spill] sm:$0xff]  ;;  %v5434_v34 = vld [vmem:[#allocation76_spill] sm:$0xff] }
 0x598   :  { %2292 = vmatpush.msra.mxu2 %v4612_v36  ;;  %2312 = vmatpush.msra.mxu3 %v4614_v38  ;;  %v5432_v38 = vld [vmem:[#allocation74_spill] sm:$0xff] }
 0x599   :  { %2253 = vmatpush.msra.mxu0 %v4616_v40  ;;  %2273 = vmatpush.msra.mxu1 %v4618_v41  ;;  %v5431_v40 = vld [vmem:[#allocation73_spill] sm:$0xff] }
 0x59a   :  { %2293 = vmatpush.msra.mxu2 %v4622_v42  ;;  %2313 = vmatpush.msra.mxu3 %v5430_v43 }
 0x59b   :  { %2254 = vmatpush.msra.mxu0 %v4628_v45  ;;  %2274 = vmatpush.msra.mxu1 %v4630_v52 }
 0x59c   :  { %2294 = vmatpush.msra.mxu2 %v4634_v54  ;;  %2314 = vmatpush.msra.mxu3 %v4636_v50 }
 0x59d   :  { %2255 = vmatpush.msra.mxu0 %v4640_v28  ;;  %2275 = vmatpush.msra.mxu1 %v4642_v21 }
 0x59e   :  { %2295 = vmatpush.msra.mxu2 %v4646_v33  ;;  %2315 = vmatpush.msra.mxu3 %v4648_v37 }
 0x5b0   :  { %v1558_v41 = vpop.f32.mrf.mxu0  ;;  %v1578_v42 = vpop.f32.mrf.mxu1 }
 0x5b1   :  { %v1621_v43 = vadd.f32 %v1558_v41, %v5431_v40  ;;  %v1622_v45 = vadd.f32 %v1578_v42, %v5432_v38 }
 0x5b3   :  { %v2803_v36 = vmul.f32 -1.442695, %v1621_v43  ;;  %v2804_v52 = vmul.f32 -1.442695, %v1622_v45 }
 0x5b5   :  { %2948 = vpow2.f32 %v2803_v36  ;;  %v1820_v36 = vld [vmem:[%s5035_s8] sm:$0xf] }
 0x5b6   :  { %2950 = vpow2.f32 %v2804_v52  ;;  %v4799_v41 = vperm.slane %v1820_v36, 0  ;;  %v4816_v10 = vperm.slane %v1820_v36, 2  ;;  %v4818_v18 = vperm.slane %v1820_v36, 3 }
 0x5b7   :  { %v1598_v54 = vpop.f32.mrf.mxu2  ;;  %v1618_v50 = vpop.f32.mrf.mxu3 }
 0x5b8   :  { %v1623_v28 = vadd.f32 %v1598_v54, %v5433_v35  ;;  %v1624_v21 = vadd.f32 %v1618_v50, %v5434_v34  ;;  %v4792_v58 = vpop.f32.mrf.mxu0  ;;  %v4794_v33 = vpop.f32.mrf.mxu1  ;;  %v4801_v35 = vperm.slane %v1820_v36, 1 }
 0x5ba   :  { %v2805_v37 = vmul.f32 -1.442695, %v1623_v28 }
 0x5bb   :  { %v2949_v5 = vpop.eup %2948 }
 0x5bc   :  { %v2951_v22 = vpop.eup %2950  ;;  %v1634_v40 = vadd.f32 1.0, %v2949_v5  ;;  %2952 = vpow2.f32 %v2805_v37 }
 0x5bd   :  { %v1635_v38 = vadd.f32 1.0, %v2951_v22 }
 0x5be   :  { %2954 = vrcp.f32 %v1634_v40  ;;  %v1646_v15 = vand.u32 2147483647, %v1634_v40  ;;  %vm1642_vm6 = vweird.f32 %v1634_v40 }
 0x5bf   :  { %2956 = vrcp.f32 %v1635_v38  ;;  %v4803_v34 = vpop.f32.mrf.mxu2  ;;  %v4805_v42 = vpop.f32.mrf.mxu3  ;;  %v1663_v6 = vand.u32 2147483648, %v1635_v38  ;;  %vm1657_vm7 = vweird.f32 %v1635_v38 }
 0x5c0   :  { %v1850_v45 = vpop.f32.mrf.mxu0  ;;  %v1879_v52 = vpop.f32.mrf.mxu1  ;;  %vm1647_vm10 = vcmp.eq.f32.partialorder %v1646_v15, 8.507059e+37 }
 0x5c1   :  { %v4808_v5 = vadd.f32 %v1850_v45, %v4799_v41  ;;  %v4811_v37 = vadd.f32 %v1879_v52, %v4801_v35  ;;  %v1648_v45 = vand.u32 2147483648, %v1634_v40 }
 0x5c2   :  { %v2953_v54 = vpop.eup %2952 }
 0x5c3   :  { %5435 = vst [vmem:[#allocation39_spill] sm:$0xff] %v4808_v5  ;;  %v4813_v22 = vadd.f32 1.0, %v2953_v54 }
 0x5c4   :  { %5436 = vst [vmem:[#allocation40_spill] sm:$0xff] %v4811_v37  ;;  %v2955_v50 = vpop.eup %2954 }
 0x5c5   :  { %v2957_v28 = vpop.eup %2956  ;;  %v1638_v43 = vmul.f32 %v2955_v50, %v1634_v40  ;;  %2958 = vrcp.f32 %v4813_v22  ;;  %vm1643_vm4 = vweird.f32 %v2955_v50  ;;  %vm1672_vm13 = vweird.f32 %v4813_v22 }
 0x5c6   :  { %v1653_v29 = vmul.f32 %v2957_v28, %v1635_v38  ;;  %2960 = vtanh.f32 %v1624_v21  ;;  %vm1658_vm5 = vweird.f32 %v2957_v28  ;;  %vm1644_vm8 = vmor %vm1642_vm6, %vm1643_vm4 }
 0x5c7   :  { %v1639_v30 = vsub.f32 1.0, %v1638_v43  ;;  %v1908_v5 = vpop.f32.mrf.mxu2  ;;  %v1937_v52 = vpop.f32.mrf.mxu3  ;;  %vm1659_vm9 = vmor %vm1657_vm7, %vm1658_vm5 }
 0x5c8   :  { %v1654_v37 = vsub.f32 1.0, %v1653_v29  ;;  %v4821_v54 = vadd.f32 %v1908_v5, %v4816_v10  ;;  %v4824_v31 = vadd.f32 %v1937_v52, %v4818_v18  ;;  %v1853_v11 = vpop.f32.mrf.mxu0  ;;  %v1882_v23 = vpop.f32.mrf.mxu1  ;;  %v1661_v29 = vand.u32 2147483647, %v1635_v38  ;;  %v5441_v38 = vld [vmem:[#allocation49_spill] sm:$0xff] }
 0x5c9   :  { %v1640_v20 = vmul.f32 %v2955_v50, %v1639_v30  ;;  %v4827_v36 = vadd.f32 %v1853_v11, %v4799_v41  ;;  %v4830_v43 = vadd.f32 %v1882_v23, %v4801_v35  ;;  %v1649_v52 = vor.u32 1.1754944e-38, %v1648_v45 }
 0x5ca   :  { %5437 = vst [vmem:[#allocation41_spill] sm:$0xff] %v4821_v54  ;;  %v1655_v21 = vmul.f32 %v2957_v28, %v1654_v37  ;;  %v1664_v54 = vor.u32 1.1754944e-38, %v1663_v6  ;;  %vm1662_vm11 = vcmp.eq.f32.partialorder %v1661_v29, 8.507059e+37 }
 0x5cb   :  { %5438 = vst [vmem:[#allocation42_spill] sm:$0xff] %v4824_v31  ;;  %v2959_v32 = vpop.eup %2958  ;;  %v1641_v24 = vadd.f32 %v2955_v50, %v1640_v20 }
 0x5cc   :  { %5439 = vst [vmem:[#allocation43_spill] sm:$0xff] %v4827_v36  ;;  %v1668_v5 = vmul.f32 %v2959_v32, %v4813_v22  ;;  %v1656_v31 = vadd.f32 %v2957_v28, %v1655_v21  ;;  %v2961_v30 = vpop.eup %2960  ;;  %vm1673_vm12 = vweird.f32 %v2959_v32 }
 0x5cd   :  { %5440 = vst [vmem:[#allocation44_spill] sm:$0xff] %v4830_v43  ;;  %v1645_v11 = vsel %vm1644_vm8, %v2955_v50, %v1641_v24  ;;  %vm1674_vm14 = vmor %vm1672_vm13, %vm1673_vm12 }
 0x5ce   :  { %v1669_v36 = vsub.f32 1.0, %v1668_v5  ;;  %v1650_v23 = vsel %vm1647_vm10, %v1649_v52, %v1645_v11  ;;  %v1660_v43 = vsel %vm1659_vm9, %v2957_v28, %v1656_v31 }
 0x5cf   :  { %v1665_v37 = vsel %vm1662_vm11, %v1664_v54, %v1660_v43  ;;  %v1684_v9 = vmul.f32 %v2961_v30, %v1650_v23  ;;  %v1911_v7 = vpop.f32.mrf.mxu2  ;;  %v1940_v20 = vpop.f32.mrf.mxu3  ;;  %v1678_v54 = vand.u32 2147483648, %v4813_v22 }
 0x5d0   :  { %v1670_v40 = vmul.f32 %v2959_v32, %v1669_v36  ;;  %v1683_v19 = vmul.f32 %v1665_v37, %v5441_v38  ;;  %v4835_v12 = vadd.f32 %v1911_v7, %v4816_v10  ;;  %v4838_v45 = vadd.f32 %v1940_v20, %v4818_v18  ;;  %v1856_v6 = vpop.f32.mrf.mxu0  ;;  %v1885_v24 = vpop.f32.mrf.mxu1 }
 0x5d1   :  { %v4841_v15 = vadd.f32 %v1856_v6, %v4799_v41  ;;  %v4844_v31 = vadd.f32 %v1885_v24, %v4801_v35  ;;  %v1676_v7 = vand.u32 2147483647, %v4813_v22  ;;  %v1679_v29 = vor.u32 1.1754944e-38, %v1678_v54 }
 0x5d2   :  { %v1685_v50 = vadd.f32 %v1684_v9, %v1683_v19  ;;  %v1671_v28 = vadd.f32 %v2959_v32, %v1670_v40  ;;  %v1848_v19 = vadd.f32 %v4792_v58, %v4799_v41  ;;  %v1877_v9 = vadd.f32 %v4794_v33, %v4801_v35 }
 0x5d3   :  { %vm1677_vm15 = vcmp.eq.f32.partialorder %v1676_v7, 8.507059e+37  ;;  %v1906_v6 = vadd.f32 %v4803_v34, %v4816_v10 }
 0x5d4   :  { %2962 = vtanh.f32 %v1685_v50  ;;  %v1675_v21 = vsel %vm1674_vm14, %v2959_v32, %v1671_v28 }
 0x5d5   :  { %v1680_v23 = vsel %vm1677_vm15, %v1679_v29, %v1675_v21 }
 0x5d7   :  { %v1914_v36 = vpop.f32.mrf.mxu2  ;;  %v1943_v43 = vpop.f32.mrf.mxu3 }
 0x5d8   :  { %v4850_v5 = vadd.f32 %v1914_v36, %v4816_v10  ;;  %v4853_v52 = vadd.f32 %v1943_v43, %v4818_v18  ;;  %v1935_v36 = vadd.f32 %v4805_v42, %v4818_v18 }
 0x5da   :  { %v2963_v30 = vpop.eup %2962  ;;  %v1963_v22 = vpop.f32.mrf.mxu0 }
 0x5db   :  { %v1983_v11 = vpop.f32.mrf.mxu1  ;;  %v2026_v37 = vadd.f32 %v1963_v22, %v1848_v19  ;;  %v4859_v20 = vmul.f32 %v2963_v30, %v1680_v23 }
 0x5dc   :  { %v2027_v32 = vadd.f32 %v1983_v11, %v1877_v9 }
 0x5dd   :  { %v2806_v40 = vmul.f32 -1.442695, %v2026_v37 }
 0x5de   :  { %v2807_v38 = vmul.f32 -1.442695, %v2027_v32 }
 0x5df   :  { %2964 = vpow2.f32 %v2806_v40 }
 0x5e0   :  { %2966 = vpow2.f32 %v2807_v38 }
 0x5e1   :  { %v2003_v58 = vpop.f32.mrf.mxu2  ;;  %v2023_v54 = vpop.f32.mrf.mxu3 }
 0x5e2   :  { %v2028_v41 = vadd.f32 %v2003_v58, %v1906_v6  ;;  %v2029_v29 = vadd.f32 %v2023_v54, %v1935_v36 }
 0x5e4   :  { %v2808_v24 = vmul.f32 -1.442695, %v2028_v41 }
 0x5e5   :  { %v2965_v33 = vpop.eup %2964 }
 0x5e6   :  { %v2967_v35 = vpop.eup %2966  ;;  %v2039_v50 = vadd.f32 1.0, %v2965_v33  ;;  %2968 = vpow2.f32 %v2808_v24 }
 0x5e7   :  { %v2040_v28 = vadd.f32 1.0, %v2967_v35 }
 0x5e8   :  { %2970 = vrcp.f32 %v2039_v50  ;;  %v2053_v22 = vand.u32 2147483648, %v2039_v50  ;;  %v2051_v37 = vand.u32 2147483647, %v2039_v50  ;;  %vm2047_vm2 = vweird.f32 %v2039_v50 }
 0x5e9   :  { %2972 = vrcp.f32 %v2040_v28  ;;  %v2068_v11 = vand.u32 2147483648, %v2040_v28  ;;  %v2066_v40 = vand.u32 2147483647, %v2040_v28  ;;  %vm2062_vm3 = vweird.f32 %v2040_v28 }
 0x5ea   :  { %v2054_v6 = vor.u32 1.1754944e-38, %v2053_v22  ;;  %vm2052_vm5 = vcmp.eq.f32.partialorder %v2051_v37, 8.507059e+37  ;;  %v5472_v37 = vld [vmem:[#allocation34_spill] sm:$0xff] }
 0x5eb   :  { %v2069_v41 = vor.u32 1.1754944e-38, %v2068_v11  ;;  %vm2067_vm7 = vcmp.eq.f32.partialorder %v2066_v40, 8.507059e+37  ;;  %v5474_v40 = vld [vmem:[#allocation36_spill] sm:$0xff] }
 0x5ec   :  { %v2969_v7 = vpop.eup %2968 }
 0x5ed   :  { %v2041_v43 = vadd.f32 1.0, %v2969_v7 }
 0x5ee   :  { %v2971_v21 = vpop.eup %2970 }
 0x5ef   :  { %v2973_v10 = vpop.eup %2972  ;;  %v2043_v34 = vmul.f32 %v2971_v21, %v2039_v50  ;;  %2974 = vrcp.f32 %v2041_v43  ;;  %vm2048_vm0 = vweird.f32 %v2971_v21  ;;  %vm2077_vm9 = vweird.f32 %v2041_v43 }
 0x5f0   :  { %v2058_v19 = vmul.f32 %v2973_v10, %v2040_v28  ;;  %2976 = vtanh.f32 %v2029_v29  ;;  %vm2063_vm1 = vweird.f32 %v2973_v10  ;;  %vm2049_vm4 = vmor %vm2047_vm2, %vm2048_vm0  ;;  %v2083_v28 = vand.u32 2147483648, %v2041_v43 }
 0x5f1   :  { %v2044_v9 = vsub.f32 1.0, %v2043_v34  ;;  %vm2064_vm6 = vmor %vm2062_vm3, %vm2063_vm1 }
 0x5f2   :  { %v2059_v30 = vsub.f32 1.0, %v2058_v19  ;;  %v2084_v22 = vor.u32 1.1754944e-38, %v2083_v28 }
 0x5f3   :  { %v2045_v23 = vmul.f32 %v2971_v21, %v2044_v9 }
 0x5f4   :  { %v2060_v32 = vmul.f32 %v2973_v10, %v2059_v30 }
 0x5f5   :  { %v2975_v38 = vpop.eup %2974  ;;  %v2046_v18 = vadd.f32 %v2971_v21, %v2045_v23 }
 0x5f6   :  { %v2073_v42 = vmul.f32 %v2975_v38, %v2041_v43  ;;  %v2061_v58 = vadd.f32 %v2973_v10, %v2060_v32  ;;  %v2977_v33 = vpop.eup %2976  ;;  %vm2078_vm8 = vweird.f32 %v2975_v38  ;;  %v5473_v32 = vld [vmem:[#allocation35_spill] sm:$0xff] }
 0x5f7   :  { %v2050_v24 = vsel %vm2049_vm4, %v2971_v21, %v2046_v18  ;;  %v2081_v21 = vand.u32 2147483647, %v2041_v43  ;;  %vm2079_vm10 = vmor %vm2077_vm9, %vm2078_vm8  ;;  %v5471_v43 = vld [vmem:[#allocation33_spill] sm:$0xff]  ;;  %v5476_v18 = vld [vmem:[#allocation38_spill] sm:$0xff] }
 0x5f8   :  { %v2074_v35 = vsub.f32 1.0, %v2073_v42  ;;  %v2055_v54 = vsel %vm2052_vm5, %v2054_v6, %v2050_v24  ;;  %v2065_v7 = vsel %vm2064_vm6, %v2973_v10, %v2061_v58  ;;  %v5477_v58 = vld [vmem:[#allocation39_spill] sm:$0xff]  ;;  %v5478_v24 = vld [vmem:[#allocation40_spill] sm:$0xff] }
 0x5f9   :  { %v2070_v36 = vsel %vm2067_vm7, %v2069_v41, %v2065_v7  ;;  %v2089_v29 = vmul.f32 %v2977_v33, %v2055_v54  ;;  %vm2082_vm11 = vcmp.eq.f32.partialorder %v2081_v21, 8.507059e+37 }
 0x5fa   :  { %v2088_v34 = vmul.f32 0.0, %v2070_v36  ;;  %v2075_v19 = vmul.f32 %v2975_v38, %v2074_v35  ;;  %v5479_v36 = vld [vmem:[#allocation41_spill] sm:$0xff] }
 0x5fc   :  { %v4865_v9 = vadd.f32 %v2089_v29, %v2088_v34  ;;  %v2076_v50 = vadd.f32 %v2975_v38, %v2075_v19 }
 0x5fe   :  { %2978 = vtanh.f32 %v4865_v9  ;;  %v2080_v30 = vsel %vm2079_vm10, %v2975_v38, %v2076_v50  ;;  %v5475_v38 = vld [vmem:[#allocation37_spill] sm:$0xff] }
 0x5ff   :  { %v2085_v10 = vsel %vm2082_vm11, %v2084_v22, %v2080_v30 }
 0x604   :  { %v2979_v11 = vpop.eup %2978 }
 0x605   :  { %v2092_v23 = vmul.f32 %v2979_v11, %v2085_v10 }
 0x607   :  { %2109 = vmatmul.f32.vlgmr.msrb.gmra.mxu0 %v2092_v23  ;;  %2129 = vmatmul.f32.vlgmr.msrb.gmra.mxu1 %v2092_v23 }
 0x608   :  { %2149 = vmatmul.f32.vlgmr.msrb.gmra.mxu2 %v2092_v23  ;;  %2169 = vmatmul.f32.vlgmr.msrb.gmra.mxu3 %v2092_v23  ;;  %v5480_v23 = vld [vmem:[#allocation42_spill] sm:$0xff] }
 0x609   :  { %2387 = vmatpush.msrb.mxu0 %v4452_v61  ;;  %2407 = vmatpush.msrb.mxu1 %v4454_v44  ;;  %v5442_v61 = vld [vmem:[#allocation47_spill] sm:$0xff]  ;;  %v5443_v44 = vld [vmem:[#allocation50_spill] sm:$0xff] }
 0x60a   :  { %2427 = vmatpush.msrb.mxu2 %v4456_v60  ;;  %2447 = vmatpush.msrb.mxu3 %v4458_v39  ;;  %v5444_v60 = vld [vmem:[#allocation48_spill] sm:$0xff]  ;;  %v5445_v39 = vld [vmem:[#allocation51_spill] sm:$0xff] }
 0x60b   :  { %2388 = vmatpush.msrb.mxu0 %v4460_v53  ;;  %2408 = vmatpush.msrb.mxu1 %v4462_v51  ;;  %v5446_v53 = vld [vmem:[#allocation52_spill] sm:$0xff]  ;;  %v5447_v51 = vld [vmem:[#allocation53_spill] sm:$0xff] }
 0x60c   :  { %2428 = vmatpush.msrb.mxu2 %v4466_v25  ;;  %2448 = vmatpush.msrb.mxu3 %v4468_v47  ;;  %v5448_v25 = vld [vmem:[#allocation54_spill] sm:$0xff]  ;;  %v5449_v47 = vld [vmem:[#allocation55_spill] sm:$0xff] }
 0x60d   :  { %2389 = vmatpush.msrb.mxu0 %v4472_v46  ;;  %2409 = vmatpush.msrb.mxu1 %v4474_v63  ;;  %v5450_v46 = vld [vmem:[#allocation56_spill] sm:$0xff]  ;;  %v5451_v63 = vld [vmem:[#allocation57_spill] sm:$0xff] }
 0x60e   :  { %2429 = vmatpush.msrb.mxu2 %v4478_v0  ;;  %2449 = vmatpush.msrb.mxu3 %v4480_v55  ;;  %v5452_v0 = vld [vmem:[#allocation58_spill] sm:$0xff]  ;;  %v5453_v55 = vld [vmem:[#allocation59_spill] sm:$0xff] }
 0x60f   :  { %2390 = vmatpush.msrb.mxu0 %v4491_v62  ;;  %2410 = vmatpush.msrb.mxu1 %v4493_v56  ;;  %v5454_v62 = vld [vmem:[#allocation60_spill] sm:$0xff]  ;;  %v5455_v56 = vld [vmem:[#allocation61_spill] sm:$0xff] }
 0x610   :  { %2430 = vmatpush.msrb.mxu2 %v4495_v49  ;;  %2450 = vmatpush.msrb.mxu3 %v4497_v13  ;;  %v5456_v49 = vld [vmem:[#allocation62_spill] sm:$0xff]  ;;  %v5457_v13 = vld [vmem:[#allocation63_spill] sm:$0xff] }
 0x611   :  { %2391 = vmatpush.msrb.mxu0 %v4499_v48  ;;  %2411 = vmatpush.msrb.mxu1 %v4501_v59  ;;  %v5458_v48 = vld [vmem:[#allocation64_spill] sm:$0xff]  ;;  %v5459_v59 = vld [vmem:[#allocation21_spill] sm:$0xff] }
 0x612   :  { %2431 = vmatpush.msrb.mxu2 %v4505_v57  ;;  %2451 = vmatpush.msrb.mxu3 %v4507_v26  ;;  %v5460_v57 = vld [vmem:[#allocation22_spill] sm:$0xff]  ;;  %v5461_v26 = vld [vmem:[#allocation23_spill] sm:$0xff] }
 0x613   :  { %2392 = vmatpush.msrb.mxu0 %v4511_v1  ;;  %2412 = vmatpush.msrb.mxu1 %v4513_v2  ;;  %v5462_v1 = vld [vmem:[#allocation24_spill] sm:$0xff]  ;;  %v5463_v2 = vld [vmem:[#allocation25_spill] sm:$0xff] }
 0x614   :  { %2432 = vmatpush.msrb.mxu2 %v4517_v3  ;;  %2452 = vmatpush.msrb.mxu3 %v4519_v4  ;;  %v5464_v3 = vld [vmem:[#allocation26_spill] sm:$0xff]  ;;  %v5465_v4 = vld [vmem:[#allocation27_spill] sm:$0xff] }
 0x615   :  { %2393 = vmatpush.msrb.mxu0 %v4530_v14  ;;  %2413 = vmatpush.msrb.mxu1 %v4532_v17  ;;  %v5466_v14 = vld [vmem:[#allocation28_spill] sm:$0xff]  ;;  %v5467_v17 = vld [vmem:[#allocation29_spill] sm:$0xff] }
 0x616   :  { %2433 = vmatpush.msrb.mxu2 %v4534_v8  ;;  %2453 = vmatpush.msrb.mxu3 %v4536_v27  ;;  %v5468_v8 = vld [vmem:[#allocation30_spill] sm:$0xff]  ;;  %v5469_v27 = vld [vmem:[#allocation31_spill] sm:$0xff] }
 0x617   :  { %2394 = vmatpush.msrb.mxu0 %v4538_v16  ;;  %2414 = vmatpush.msrb.mxu1 %v5442_v61  ;;  %v5470_v16 = vld [vmem:[#allocation32_spill] sm:$0xff] }
 0x618   :  { %2434 = vmatpush.msrb.mxu2 %v5443_v44  ;;  %2454 = vmatpush.msrb.mxu3 %v5444_v60 }
 0x619   :  { %2395 = vmatpush.msrb.mxu0 %v5445_v39  ;;  %2415 = vmatpush.msrb.mxu1 %v5446_v53 }
 0x61a   :  { %2435 = vmatpush.msrb.mxu2 %v5447_v51  ;;  %2455 = vmatpush.msrb.mxu3 %v5448_v25 }
 0x61b   :  { %2396 = vmatpush.msrb.mxu0 %v5449_v47  ;;  %2416 = vmatpush.msrb.mxu1 %v5450_v46 }
 0x61c   :  { %2436 = vmatpush.msrb.mxu2 %v5451_v63  ;;  %2456 = vmatpush.msrb.mxu3 %v5452_v0 }
 0x61d   :  { %2397 = vmatpush.msrb.mxu0 %v5453_v55  ;;  %2417 = vmatpush.msrb.mxu1 %v5454_v62 }
 0x61e   :  { %2437 = vmatpush.msrb.mxu2 %v5455_v56  ;;  %2457 = vmatpush.msrb.mxu3 %v5456_v49 }
 0x61f   :  { %2398 = vmatpush.msrb.mxu0 %v5457_v13  ;;  %2418 = vmatpush.msrb.mxu1 %v5458_v48 }
 0x620   :  { %2438 = vmatpush.msrb.mxu2 %v5459_v59  ;;  %2458 = vmatpush.msrb.mxu3 %v5460_v57 }
 0x621   :  { %2399 = vmatpush.msrb.mxu0 %v5461_v26  ;;  %2419 = vmatpush.msrb.mxu1 %v5462_v1 }
 0x622   :  { %2439 = vmatpush.msrb.mxu2 %v5463_v2  ;;  %2459 = vmatpush.msrb.mxu3 %v5464_v3 }
 0x623   :  { %2400 = vmatpush.msrb.mxu0 %v5465_v4  ;;  %2420 = vmatpush.msrb.mxu1 %v5466_v14 }
 0x624   :  { %2440 = vmatpush.msrb.mxu2 %v5467_v17  ;;  %2460 = vmatpush.msrb.mxu3 %v5468_v8 }
 0x625   :  { %2401 = vmatpush.msrb.mxu0 %v5469_v27  ;;  %2421 = vmatpush.msrb.mxu1 %v5470_v16 }
 0x626   :  { %2441 = vmatpush.msrb.mxu2 %v5471_v43  ;;  %2461 = vmatpush.msrb.mxu3 %v5472_v37 }
 0x627   :  { %2402 = vmatpush.msrb.mxu0 %v5473_v32  ;;  %2422 = vmatpush.msrb.mxu1 %v5474_v40 }
 0x628   :  { %2442 = vmatpush.msrb.mxu2 %v5475_v38  ;;  %2462 = vmatpush.msrb.mxu3 %v5476_v18 }
 0x684   :  { %v2110_v42 = vpop.f32.mrf.mxu0  ;;  %v2130_v6 = vpop.f32.mrf.mxu1 }
 0x685   :  { %v2173_v41 = vadd.f32 %v2110_v42, %v5477_v58  ;;  %v2174_v33 = vadd.f32 %v2130_v6, %v5478_v24  ;;  %v2550_v6 = vld [vmem:[%s5036_s9 + $0x78] sm:$0xff]  ;;  %v2565_v58 = vld [vmem:[#allocation9 + $0x70] sm:$0xff]  ;;  %v2564_v24 = vld [vmem:[#allocation9 + $0x68] sm:$0xff] }
 0x687   :  { %v2809_v35 = vmul.f32 -1.442695, %v2173_v41  ;;  %v2810_v54 = vmul.f32 -1.442695, %v2174_v33  ;;  %v2549_v41 = vld [vmem:[%s5036_s9 + $0x70] sm:$0xff]  ;;  %v2548_v33 = vld [vmem:[%s5036_s9 + $0x68] sm:$0xff] }
 0x689   :  { %2980 = vpow2.f32 %v2809_v35  ;;  %v2563_v35 = vld [vmem:[#allocation9 + $0x60] sm:$0xff] }
 0x68a   :  { %2982 = vpow2.f32 %v2810_v54  ;;  %v2547_v54 = vld [vmem:[%s5036_s9 + $0x60] sm:$0xff] }
 0x68b   :  { %v2150_v7 = vpop.f32.mrf.mxu2  ;;  %v2170_v30 = vpop.f32.mrf.mxu3 }
 0x68c   :  { %v2175_v29 = vadd.f32 %v2150_v7, %v5479_v36  ;;  %v2176_v61 = vadd.f32 %v2170_v30, %v5480_v23  ;;  %v2562_v7 = vld [vmem:[#allocation9 + $0x58] sm:$0xff] }
 0x68d   :  { %v2546_v36 = vld [vmem:[%s5036_s9 + $0x58] sm:$0xff] }
 0x68e   :  { %v2811_v34 = vmul.f32 -1.442695, %v2175_v29  ;;  %v2561_v29 = vld [vmem:[#allocation9 + $0x50] sm:$0xff]  ;;  %v5482_v30 = vld [vmem:[#allocation44_spill] sm:$0xff] }
 0x68f   :  { %v2981_v19 = vpop.eup %2980 }
 0x690   :  { %v2983_v50 = vpop.eup %2982  ;;  %v2186_v28 = vadd.f32 1.0, %v2981_v19  ;;  %2984 = vpow2.f32 %v2811_v34  ;;  %v2545_v34 = vld [vmem:[%s5036_s9 + $0x50] sm:$0xff] }
 0x691   :  { %v2187_v21 = vadd.f32 1.0, %v2983_v50 }
 0x692   :  { %2986 = vrcp.f32 %v2186_v28  ;;  %v2200_v25 = vand.u32 2147483648, %v2186_v28  ;;  %v2198_v63 = vand.u32 2147483647, %v2186_v28  ;;  %vm2194_vm14 = vweird.f32 %v2186_v28 }
 0x693   :  { %2988 = vrcp.f32 %v2187_v21  ;;  %v2215_v47 = vand.u32 2147483648, %v2187_v21  ;;  %v2213_v55 = vand.u32 2147483647, %v2187_v21  ;;  %vm2209_vm15 = vweird.f32 %v2187_v21 }
 0x694   :  { %v2201_v13 = vor.u32 1.1754944e-38, %v2200_v25  ;;  %vm2199_vm2 = vcmp.eq.f32.partialorder %v2198_v63, 8.507059e+37  ;;  %v2541_v25 = vld [vmem:[%s5036_s9 + $0x30] sm:$0xff]  ;;  %v2540_v63 = vld [vmem:[%s5036_s9 + $0x28] sm:$0xff] }
 0x695   :  { %v2216_v59 = vor.u32 1.1754944e-38, %v2215_v47  ;;  %vm2214_vm3 = vcmp.eq.f32.partialorder %v2213_v55, 8.507059e+37  ;;  %v2555_v55 = vld [vmem:[#allocation9 + $0x20] sm:$0xff] }
 0x696   :  { %v2985_v22 = vpop.eup %2984 }
 0x697   :  { %v2188_v11 = vadd.f32 1.0, %v2985_v22 }
 0x698   :  { %v2987_v10 = vpop.eup %2986 }
 0x699   :  { %v2989_v44 = vpop.eup %2988  ;;  %v2190_v60 = vmul.f32 %v2987_v10, %v2186_v28  ;;  %2990 = vrcp.f32 %v2188_v11  ;;  %vm2195_vm12 = vweird.f32 %v2987_v10  ;;  %v2230_v43 = vand.u32 2147483648, %v2188_v11  ;;  %v5481_v28 = vld [vmem:[#allocation43_spill] sm:$0xff] }
 0x69a   :  { %v2205_v39 = vmul.f32 %v2989_v44, %v2187_v21  ;;  %2992 = vtanh.f32 %v2176_v61  ;;  %vm2210_vm13 = vweird.f32 %v2989_v44  ;;  %vm2196_vm0 = vmor %vm2194_vm14, %vm2195_vm12  ;;  %vm2224_vm5 = vweird.f32 %v2188_v11 }
 0x69b   :  { %v2191_v53 = vsub.f32 1.0, %v2190_v60  ;;  %vm2211_vm1 = vmor %vm2209_vm15, %vm2210_vm13  ;;  %v2228_v37 = vand.u32 2147483647, %v2188_v11  ;;  %v2231_v40 = vor.u32 1.1754944e-38, %v2230_v43  ;;  %v2543_v60 = vld [vmem:[%s5036_s9 + $0x40] sm:$0xff] }
 0x69c   :  { %v2206_v51 = vsub.f32 1.0, %v2205_v39  ;;  %v2558_v39 = vld [vmem:[#allocation9 + $0x38] sm:$0xff] }
 0x69d   :  { %v2192_v46 = vmul.f32 %v2987_v10, %v2191_v53  ;;  %vm2229_vm7 = vcmp.eq.f32.partialorder %v2228_v37, 8.507059e+37  ;;  %v2542_v53 = vld [vmem:[%s5036_s9 + $0x38] sm:$0xff] }
 0x69e   :  { %v2207_v0 = vmul.f32 %v2989_v44, %v2206_v51  ;;  %v2557_v51 = vld [vmem:[#allocation9 + $0x30] sm:$0xff] }
 0x69f   :  { %v2991_v62 = vpop.eup %2990  ;;  %v2193_v56 = vadd.f32 %v2987_v10, %v2192_v46  ;;  %v2556_v46 = vld [vmem:[#allocation9 + $0x28] sm:$0xff] }
 0x6a0   :  { %v2220_v49 = vmul.f32 %v2991_v62, %v2188_v11  ;;  %v2208_v48 = vadd.f32 %v2989_v44, %v2207_v0  ;;  %v2993_v26 = vpop.eup %2992  ;;  %vm2225_vm4 = vweird.f32 %v2991_v62  ;;  %v2560_v11 = vld [vmem:[#allocation9 + $0x48] sm:$0xff] }
 0x6a1   :  { %v2197_v57 = vsel %vm2196_vm0, %v2987_v10, %v2193_v56  ;;  %vm2226_vm6 = vmor %vm2224_vm5, %vm2225_vm4  ;;  %v2544_v10 = vld [vmem:[%s5036_s9 + $0x48] sm:$0xff] }
 0x6a2   :  { %v2221_v1 = vsub.f32 1.0, %v2220_v49  ;;  %v2202_v2 = vsel %vm2199_vm2, %v2201_v13, %v2197_v57  ;;  %v2212_v3 = vsel %vm2211_vm1, %v2989_v44, %v2208_v48  ;;  %v2559_v44 = vld [vmem:[#allocation9 + $0x40] sm:$0xff]  ;;  %v2554_v57 = vld [vmem:[#allocation9 + $0x18] sm:$0xff] }
 0x6a3   :  { %v2217_v4 = vsel %vm2214_vm3, %v2216_v59, %v2212_v3  ;;  %v2236_v14 = vmul.f32 %v2993_v26, %v2202_v2  ;;  %v2553_v26 = vld [vmem:[#allocation9 + $0x10] sm:$0xff]  ;;  %v2552_v2 = vld [vmem:[#allocation9 + $0x8] sm:$0xff] }
 0x6a4   :  { %v2235_v17 = vmul.f32 %v2217_v4, %v4865_v9  ;;  %v2222_v8 = vmul.f32 %v2991_v62, %v2221_v1  ;;  %v2566_v9 = vld [vmem:[#allocation9 + $0x78] sm:$0xff]  ;;  %v2537_v1 = vld [vmem:[%s5036_s9 + $0x10] sm:$0xff]  ;;  %v2536_v3 = vld [vmem:[%s5036_s9 + $0x8] sm:$0xff] }
 0x6a6   :  { %v4937_v27 = vadd.f32 %v2236_v14, %v2235_v17  ;;  %v2223_v16 = vadd.f32 %v2991_v62, %v2222_v8  ;;  %v2551_v17 = vld [vmem:[#allocation9] sm:$0xff] }
 0x6a7   :  { %v2535_v8 = vld [vmem:[%s5036_s9] sm:$0xff] }
 0x6a8   :  { %2994 = vtanh.f32 %v4937_v27  ;;  %v2227_v32 = vsel %vm2226_vm6, %v2991_v62, %v2223_v16  ;;  %v2539_v62 = vld [vmem:[%s5036_s9 + $0x20] sm:$0xff] }
 0x6a9   :  { %v2232_v18 = vsel %vm2229_vm7, %v2231_v40, %v2227_v32 }
 0x6ae   :  { %v2995_v38 = vpop.eup %2994 }
 0x6af   :  { %v2239_v42 = vmul.f32 %v2995_v38, %v2232_v18 }
 0x6b1   :  { %2256 = vmatmul.f32.vlgmr.msra.gmra.mxu0 %v2239_v42  ;;  %2276 = vmatmul.f32.vlgmr.msra.gmra.mxu1 %v2239_v42 }
 0x6b2   :  { %2296 = vmatmul.f32.vlgmr.msra.gmra.mxu2 %v2239_v42  ;;  %2316 = vmatmul.f32.vlgmr.msra.gmra.mxu3 %v2239_v42 }
 0x6b3   :  { %2567 = vmatpush.msra.mxu0 %v2566_v9  ;;  %2587 = vmatpush.msra.mxu1 %v2550_v6 }
 0x6b5   :  { %2568 = vmatpush.msra.mxu0 %v2565_v58  ;;  %2588 = vmatpush.msra.mxu1 %v2549_v41 }
 0x6b7   :  { %2569 = vmatpush.msra.mxu0 %v2564_v24  ;;  %2589 = vmatpush.msra.mxu1 %v2548_v33 }
 0x6b9   :  { %2570 = vmatpush.msra.mxu0 %v2563_v35  ;;  %2590 = vmatpush.msra.mxu1 %v2547_v54 }
 0x6bb   :  { %2571 = vmatpush.msra.mxu0 %v2562_v7  ;;  %2591 = vmatpush.msra.mxu1 %v2546_v36 }
 0x6bd   :  { %2572 = vmatpush.msra.mxu0 %v2561_v29  ;;  %2592 = vmatpush.msra.mxu1 %v2545_v34 }
 0x6bf   :  { %2573 = vmatpush.msra.mxu0 %v2560_v11  ;;  %2593 = vmatpush.msra.mxu1 %v2544_v10 }
 0x6c1   :  { %2574 = vmatpush.msra.mxu0 %v2559_v44  ;;  %2594 = vmatpush.msra.mxu1 %v2543_v60 }
 0x6c3   :  { %2575 = vmatpush.msra.mxu0 %v2558_v39  ;;  %2595 = vmatpush.msra.mxu1 %v2542_v53 }
 0x6c5   :  { %2576 = vmatpush.msra.mxu0 %v2557_v51  ;;  %2596 = vmatpush.msra.mxu1 %v2541_v25 }
 0x6c7   :  { %2577 = vmatpush.msra.mxu0 %v2556_v46  ;;  %2597 = vmatpush.msra.mxu1 %v2540_v63  ;;  %v2622_v46 = vld [vmem:[#allocation10 + $0x78] sm:$0xff]  ;;  %v2621_v63 = vld [vmem:[#allocation10 + $0x70] sm:$0xff] }
 0x6c8   :  { %2623 = vmatpush.msra.mxu2 %v2622_v46 }
 0x6c9   :  { %2578 = vmatpush.msra.mxu0 %v2555_v55  ;;  %2598 = vmatpush.msra.mxu1 %v2539_v62  ;;  %v2619_v55 = vld [vmem:[#allocation10 + $0x60] sm:$0xff]  ;;  %v2618_v62 = vld [vmem:[#allocation10 + $0x58] sm:$0xff] }
 0x6ca   :  { %2624 = vmatpush.msra.mxu2 %v2621_v63 }
 0x6cb   :  { %2579 = vmatpush.msra.mxu0 %v2554_v57  ;;  %v2613_v57 = vld [vmem:[#allocation10 + $0x30] sm:$0xff] }
 0x6cd   :  { %2580 = vmatpush.msra.mxu0 %v2553_v26 }
 0x6cf   :  { %2581 = vmatpush.msra.mxu0 %v2552_v2 }
 0x6d1   :  { %2582 = vmatpush.msra.mxu0 %v2551_v17  ;;  %v2609_v17 = vld [vmem:[#allocation10 + $0x10] sm:$0xff] }
 0x72e   :  { %v2257_v19 = vpop.f32.mrf.mxu0  ;;  %v2277_v50 = vpop.f32.mrf.mxu1 }
 0x72f   :  { %v2320_v21 = vadd.f32 %v2257_v19, %v5481_v28  ;;  %v2321_v22 = vadd.f32 %v2277_v50, %v5482_v30 }
 0x731   :  { %v2812_v23 = vmul.f32 -1.442695, %v2320_v21  ;;  %v2813_v61 = vmul.f32 -1.442695, %v2321_v22 }
 0x733   :  { %2996 = vpow2.f32 %v2812_v23 }
 0x734   :  { %2998 = vpow2.f32 %v2813_v61 }
 0x735   :  { %v2297_v47 = vpop.f32.mrf.mxu2  ;;  %v2317_v4 = vpop.f32.mrf.mxu3 }
 0x736   :  { %v2322_v0 = vadd.f32 %v2297_v47, %v4835_v12  ;;  %v2538_v12 = vld [vmem:[%s5036_s9 + $0x18] sm:$0xff]  ;;  %v2323_v37 = vadd.f32 %v2317_v4, %v4838_v45  ;;  %v2611_v4 = vld [vmem:[#allocation10 + $0x20] sm:$0xff] }
 0x737   :  { %2599 = vmatpush.msra.mxu1 %v2538_v12 }
 0x738   :  { %v2814_v56 = vmul.f32 -1.442695, %v2322_v0  ;;  %v2620_v0 = vld [vmem:[#allocation10 + $0x68] sm:$0xff] }
 0x739   :  { %v2997_v49 = vpop.eup %2996  ;;  %2600 = vmatpush.msra.mxu1 %v2537_v1  ;;  %2625 = vmatpush.msra.mxu2 %v2620_v0  ;;  %v2612_v1 = vld [vmem:[#allocation10 + $0x28] sm:$0xff] }
 0x73a   :  { %v2999_v13 = vpop.eup %2998  ;;  %v2333_v48 = vadd.f32 1.0, %v2997_v49  ;;  %3000 = vpow2.f32 %v2814_v56  ;;  %v2617_v56 = vld [vmem:[#allocation10 + $0x50] sm:$0xff]  ;;  %v2616_v49 = vld [vmem:[#allocation10 + $0x48] sm:$0xff] }
 0x73b   :  { %v2334_v59 = vadd.f32 1.0, %v2999_v13  ;;  %2601 = vmatpush.msra.mxu1 %v2536_v3  ;;  %2626 = vmatpush.msra.mxu2 %v2619_v55  ;;  %v2615_v13 = vld [vmem:[#allocation10 + $0x40] sm:$0xff] }
 0x73c   :  { %3002 = vrcp.f32 %v2333_v48  ;;  %v2347_v9 = vand.u32 2147483648, %v2333_v48  ;;  %v2345_v41 = vand.u32 2147483647, %v2333_v48  ;;  %vm2341_vm10 = vweird.f32 %v2333_v48 }
 0x73d   :  { %3004 = vrcp.f32 %v2334_v59  ;;  %2602 = vmatpush.msra.mxu1 %v2535_v8  ;;  %v2362_v6 = vand.u32 2147483648, %v2334_v59  ;;  %v2360_v33 = vand.u32 2147483647, %v2334_v59  ;;  %vm2356_vm11 = vweird.f32 %v2334_v59  ;;  %2627 = vmatpush.msra.mxu2 %v2618_v62 }
 0x73e   :  { %v2348_v7 = vor.u32 1.1754944e-38, %v2347_v9  ;;  %vm2346_vm14 = vcmp.eq.f32.partialorder %v2345_v41, 8.507059e+37  ;;  %v2663_v9 = vld [vmem:[#allocation12 + $0x68] sm:$0xff] }
 0x73f   :  { %v2363_v29 = vor.u32 1.1754944e-38, %v2362_v6  ;;  %vm2361_vm15 = vcmp.eq.f32.partialorder %v2360_v33, 8.507059e+37  ;;  %2628 = vmatpush.msra.mxu2 %v2617_v56  ;;  %v2655_v56 = vld [vmem:[#allocation12 + $0x28] sm:$0xff] }
 0x740   :  { %v3001_v14 = vpop.eup %3000 }
 0x741   :  { %v2335_v16 = vadd.f32 1.0, %v3001_v14  ;;  %2629 = vmatpush.msra.mxu2 %v2616_v49  ;;  %v2610_v14 = vld [vmem:[#allocation10 + $0x18] sm:$0xff] }
 0x742   :  { %v3003_v43 = vpop.eup %3002 }
 0x743   :  { %v3005_v32 = vpop.eup %3004  ;;  %v2337_v40 = vmul.f32 %v3003_v43, %v2333_v48  ;;  %3006 = vrcp.f32 %v2335_v16  ;;  %vm2342_vm8 = vweird.f32 %v3003_v43  ;;  %v2377_v44 = vand.u32 2147483648, %v2335_v16  ;;  %2630 = vmatpush.msra.mxu2 %v2615_v13  ;;  %v2614_v48 = vld [vmem:[#allocation10 + $0x38] sm:$0xff] }
 0x744   :  { %v2352_v38 = vmul.f32 %v3005_v32, %v2334_v59  ;;  %3008 = vtanh.f32 %v2323_v37  ;;  %vm2357_vm9 = vweird.f32 %v3005_v32  ;;  %vm2343_vm12 = vmor %vm2341_vm10, %vm2342_vm8  ;;  %vm2371_vm1 = vweird.f32 %v2335_v16  ;;  %v2607_v37 = vld [vmem:[#allocation10] sm:$0xff] }
 0x745   :  { %v2338_v18 = vsub.f32 1.0, %v2337_v40  ;;  %vm2358_vm13 = vmor %vm2356_vm11, %vm2357_vm9  ;;  %v2375_v60 = vand.u32 2147483647, %v2335_v16  ;;  %v2378_v53 = vor.u32 1.1754944e-38, %v2377_v44  ;;  %2631 = vmatpush.msra.mxu2 %v2614_v48  ;;  %v2657_v44 = vld [vmem:[#allocation12 + $0x38] sm:$0xff]  ;;  %v2654_v48 = vld [vmem:[#allocation12 + $0x20] sm:$0xff] }
 0x746   :  { %v2353_v42 = vsub.f32 1.0, %v2352_v38 }
 0x747   :  { %v2339_v58 = vmul.f32 %v3003_v43, %v2338_v18  ;;  %vm2376_vm3 = vcmp.eq.f32.partialorder %v2375_v60, 8.507059e+37  ;;  %2632 = vmatpush.msra.mxu2 %v2613_v57  ;;  %v2665_v18 = vld [vmem:[#allocation12 + $0x78] sm:$0xff] }
 0x748   :  { %v2354_v24 = vmul.f32 %v3005_v32, %v2353_v42  ;;  %v2664_v42 = vld [vmem:[#allocation12 + $0x70] sm:$0xff]  ;;  %2670 = vmatpush.msra.mxu3 %v2665_v18  ;;  %v2698_v18 = vld [vmem:[#allocation13 + $0x38] sm:$0xff] }
 0x749   :  { %v3007_v35 = vpop.eup %3006  ;;  %v2340_v54 = vadd.f32 %v3003_v43, %v2339_v58  ;;  %2633 = vmatpush.msra.mxu2 %v2612_v1 }
 0x74a   :  { %v2367_v45 = vmul.f32 %v3007_v35, %v2335_v16  ;;  %v2355_v36 = vadd.f32 %v3005_v32, %v2354_v24  ;;  %v3009_v19 = vpop.eup %3008  ;;  %vm2372_vm0 = vweird.f32 %v3007_v35  ;;  %2671 = vmatpush.msra.mxu3 %v2664_v42  ;;  %v2661_v24 = vld [vmem:[#allocation12 + $0x58] sm:$0xff]  ;;  %v2697_v42 = vld [vmem:[#allocation13 + $0x30] sm:$0xff] }
 0x74b   :  { %v2344_v34 = vsel %vm2343_vm12, %v3003_v43, %v2340_v54  ;;  %vm2373_vm2 = vmor %vm2371_vm1, %vm2372_vm0  ;;  %2634 = vmatpush.msra.mxu2 %v2611_v4  ;;  %v2608_v43 = vld [vmem:[#allocation10 + $0x8] sm:$0xff]  ;;  %v2653_v4 = vld [vmem:[#allocation12 + $0x18] sm:$0xff] }
 0x74c   :  { %v2368_v50 = vsub.f32 1.0, %v2367_v45  ;;  %v2349_v28 = vsel %vm2346_vm14, %v2348_v7, %v2344_v34  ;;  %v2359_v21 = vsel %vm2358_vm13, %v3005_v32, %v2355_v36  ;;  %2672 = vmatpush.msra.mxu3 %v2663_v9  ;;  %v2660_v7 = vld [vmem:[#allocation12 + $0x50] sm:$0xff]  ;;  %v2659_v34 = vld [vmem:[#allocation12 + $0x48] sm:$0xff] }
 0x74d   :  { %v2364_v30 = vsel %vm2361_vm15, %v2363_v29, %v2359_v21  ;;  %v2383_v22 = vmul.f32 %v3009_v19, %v2349_v28  ;;  %2635 = vmatpush.msra.mxu2 %v2610_v14  ;;  %v2652_v14 = vld [vmem:[#allocation12 + $0x10] sm:$0xff]  ;;  %v2696_v9 = vld [vmem:[#allocation13 + $0x28] sm:$0xff] }
 0x74e   :  { %v2382_v11 = vmul.f32 %v2364_v30, %v4937_v27  ;;  %v2369_v10 = vmul.f32 %v3007_v35, %v2368_v50  ;;  %v2534_v27 = vld [vmem:[%s5483_s2] sm:$0xff] }
 0x74f   :  { %2636 = vmatpush.msra.mxu2 %v2609_v17  ;;  %v2651_v17 = vld [vmem:[#allocation12 + $0x8] sm:$0xff] }
 0x750   :  { %v4993_v23 = vadd.f32 %v2383_v22, %v2382_v11  ;;  %v2370_v61 = vadd.f32 %v3007_v35, %v2369_v10  ;;  %v2658_v22 = vld [vmem:[#allocation12 + $0x40] sm:$0xff] }
 0x751   :  { %2637 = vmatpush.msra.mxu2 %v2608_v43  ;;  %v2705_v43 = vld [vmem:[#allocation13 + $0x70] sm:$0xff] }
 0x752   :  { %3010 = vtanh.f32 %v4993_v23  ;;  %v2374_v39 = vsel %vm2373_vm2, %v3007_v35, %v2370_v61 }
 0x753   :  { %v2379_v25 = vsel %vm2376_vm3, %v2378_v53, %v2374_v39  ;;  %2638 = vmatpush.msra.mxu2 %v2607_v37  ;;  %v2703_v37 = vld [vmem:[#allocation13 + $0x60] sm:$0xff] }
 0x758   :  { %v3011_v51 = vpop.eup %3010 }
 0x759   :  { %v2386_v47 = vmul.f32 %v3011_v51, %v2379_v25 }
 0x75b   :  { %2403 = vmatmul.f32.vlgmr.msrb.gmra.mxu0 %v2386_v47  ;;  %2423 = vmatmul.f32.vlgmr.msrb.gmra.mxu1 %v2386_v47 }
 0x75c   :  { %2443 = vmatmul.f32.vlgmr.msrb.gmra.mxu2 %v2386_v47  ;;  %2463 = vmatmul.f32.vlgmr.msrb.gmra.mxu3 %v2386_v47  ;;  %v2656_v47 = vld [vmem:[#allocation12 + $0x30] sm:$0xff] }
 0x763   :  { %2583 = vmatmul.f32.vlgmr.msra.gmra.mxu0 %v4859_v20  ;;  %2603 = vmatmul.f32.vlgmr.msra.gmra.mxu1 %v2534_v27 }
 0x7d8   :  { %v2404_v20 = vpop.f32.mrf.mxu0  ;;  %v2424_v59 = vpop.f32.mrf.mxu1 }
 0x7d9   :  { %v2467_v12 = vadd.f32 %v2404_v20, %v4841_v15  ;;  %v2468_v26 = vadd.f32 %v2424_v59, %v4844_v31 }
 0x7db   :  { %v2815_v2 = vmul.f32 -1.442695, %v2467_v12  ;;  %v2816_v3 = vmul.f32 -1.442695, %v2468_v26 }
 0x7dd   :  { %3012 = vpow2.f32 %v2815_v2 }
 0x7de   :  { %3014 = vpow2.f32 %v2816_v3 }
 0x7df   :  { %v2444_v8 = vpop.f32.mrf.mxu2  ;;  %v2464_v6 = vpop.f32.mrf.mxu3 }
 0x7e0   :  { %v2469_v16 = vadd.f32 %v2444_v8, %v4850_v5  ;;  %v2662_v5 = vld [vmem:[#allocation12 + $0x60] sm:$0xff]  ;;  %v2470_v35 = vadd.f32 %v2464_v6, %v4853_v52 }
 0x7e1   :  { %2673 = vmatpush.msra.mxu3 %v2662_v5  ;;  %v2650_v8 = vld [vmem:[#allocation12] sm:$0xff]  ;;  %v2584_v5 = vpop.f32.mrf.mxu0 }
 0x7e2   :  { %v2817_v15 = vmul.f32 -1.442695, %v2469_v16  ;;  %v2706_v16 = vld [vmem:[#allocation13 + $0x78] sm:$0xff]  ;;  %v2695_v6 = vld [vmem:[#allocation13 + $0x20] sm:$0xff] }
 0x7e3   :  { %v3013_v31 = vpop.eup %3012  ;;  %2674 = vmatpush.msra.mxu3 %v2661_v24  ;;  %2711 = vmatpush.msrb.mxu0 %v2706_v16 }
 0x7e4   :  { %v3015_v32 = vpop.eup %3014  ;;  %v2480_v40 = vadd.f32 1.0, %v3013_v31  ;;  %3016 = vpow2.f32 %v2817_v15  ;;  %v2704_v15 = vld [vmem:[#allocation13 + $0x68] sm:$0xff]  ;;  %v2702_v31 = vld [vmem:[#allocation13 + $0x58] sm:$0xff] }
 0x7e5   :  { %v2481_v38 = vadd.f32 1.0, %v3015_v32  ;;  %2675 = vmatpush.msra.mxu3 %v2660_v7  ;;  %2712 = vmatpush.msrb.mxu0 %v2705_v43  ;;  %v2701_v32 = vld [vmem:[#allocation13 + $0x50] sm:$0xff] }
 0x7e6   :  { %3018 = vrcp.f32 %v2480_v40  ;;  %v2494_v50 = vand.u32 2147483648, %v2480_v40  ;;  %v2492_v30 = vand.u32 2147483647, %v2480_v40  ;;  %vm2488_vm6 = vweird.f32 %v2480_v40 }
 0x7e7   :  { %3020 = vrcp.f32 %v2481_v38  ;;  %v2509_v28 = vand.u32 2147483648, %v2481_v38  ;;  %v2507_v11 = vand.u32 2147483647, %v2481_v38  ;;  %2676 = vmatpush.msra.mxu3 %v2659_v34  ;;  %vm2503_vm7 = vweird.f32 %v2481_v38  ;;  %2713 = vmatpush.msrb.mxu0 %v2704_v15  ;;  %v2691_v34 = vld [vmem:[#allocation13] sm:$0xff] }
 0x7e8   :  { %v2495_v39 = vor.u32 1.1754944e-38, %v2494_v50  ;;  %vm2493_vm10 = vcmp.eq.f32.partialorder %v2492_v30, 8.507059e+37  ;;  %v2746_v50 = vld [vmem:[#allocation15 + $0x70] sm:$0xff]  ;;  %v2743_v30 = vld [vmem:[#allocation15 + $0x58] sm:$0xff] }
 0x7e9   :  { %2677 = vmatpush.msra.mxu3 %v2658_v22  ;;  %v2510_v51 = vor.u32 1.1754944e-38, %v2509_v28  ;;  %vm2508_vm11 = vcmp.eq.f32.partialorder %v2507_v11, 8.507059e+37  ;;  %2714 = vmatpush.msrb.mxu0 %v2703_v37  ;;  %v2745_v28 = vld [vmem:[#allocation15 + $0x68] sm:$0xff]  ;;  %v2742_v22 = vld [vmem:[#allocation15 + $0x50] sm:$0xff]  ;;  %v2740_v11 = vld [vmem:[#allocation15 + $0x40] sm:$0xff] }
 0x7ea   :  { %v3017_v58 = vpop.eup %3016 }
 0x7eb   :  { %v5003_v41 = vadd.f32 1.0, %v3017_v58  ;;  %2678 = vmatpush.msra.mxu3 %v2657_v44  ;;  %2715 = vmatpush.msrb.mxu0 %v2702_v31  ;;  %v2604_v58 = vpop.f32.mrf.mxu1  ;;  %v2737_v44 = vld [vmem:[#allocation15 + $0x28] sm:$0xff] }
 0x7ec   :  { %v3019_v33 = vpop.eup %3018  ;;  %v2605_v24 = vadd.f32 %v2604_v58, %v2584_v5 }
 0x7ed   :  { %v3021_v54 = vpop.eup %3020  ;;  %v2484_v45 = vmul.f32 %v3019_v33, %v2480_v40  ;;  %3022 = vrcp.f32 %v5003_v41  ;;  %vm2489_vm4 = vweird.f32 %v3019_v33  ;;  %2679 = vmatpush.msra.mxu3 %v2656_v47  ;;  %v2524_v57 = vand.u32 2147483648, %v5003_v41  ;;  %v2700_v40 = vld [vmem:[#allocation13 + $0x48] sm:$0xff]  ;;  %2716 = vmatpush.msrb.mxu0 %v2701_v32 }
 0x7ee   :  { %v2499_v36 = vmul.f32 %v3021_v54, %v2481_v38  ;;  %3024 = vtanh.f32 %v2470_v35  ;;  %vm2504_vm5 = vweird.f32 %v3021_v54  ;;  %vm2490_vm8 = vmor %vm2488_vm6, %vm2489_vm4  ;;  %vm2518_vm13 = vweird.f32 %v5003_v41  ;;  %v2699_v38 = vld [vmem:[#allocation13 + $0x40] sm:$0xff] }
 0x7ef   :  { %v2485_v29 = vsub.f32 1.0, %v2484_v45  ;;  %vm2505_vm9 = vmor %vm2503_vm7, %vm2504_vm5  ;;  %2680 = vmatpush.msra.mxu3 %v2655_v56  ;;  %v2522_v12 = vand.u32 2147483647, %v5003_v41  ;;  %v2525_v1 = vor.u32 1.1754944e-38, %v2524_v57  ;;  %2717 = vmatpush.msrb.mxu0 %v2700_v40 }
 0x7f0   :  { %v2500_v19 = vsub.f32 1.0, %v2499_v36  ;;  %v2693_v36 = vld [vmem:[#allocation13 + $0x10] sm:$0xff] }
 0x7f1   :  { %v2486_v21 = vmul.f32 %v3019_v33, %v2485_v29  ;;  %2681 = vmatpush.msra.mxu3 %v2654_v48  ;;  %vm2523_vm15 = vcmp.eq.f32.partialorder %v2522_v12, 8.507059e+37  ;;  %2718 = vmatpush.msrb.mxu0 %v2699_v38  ;;  %v2692_v29 = vld [vmem:[#allocation13 + $0x8] sm:$0xff] }
 0x7f2   :  { %v2501_v52 = vmul.f32 %v3021_v54, %v2500_v19  ;;  %v2747_v19 = vld [vmem:[#allocation15 + $0x78] sm:$0xff] }
 0x7f3   :  { %v3023_v10 = vpop.eup %3022  ;;  %v2487_v61 = vadd.f32 %v3019_v33, %v2486_v21  ;;  %2682 = vmatpush.msra.mxu3 %v2653_v4  ;;  %2719 = vmatpush.msrb.mxu0 %v2698_v18  ;;  %v2744_v21 = vld [vmem:[#allocation15 + $0x60] sm:$0xff] }
 0x7f4   :  { %v2514_v60 = vmul.f32 %v3023_v10, %v5003_v41  ;;  %v2502_v53 = vadd.f32 %v3021_v54, %v2501_v52  ;;  %v3025_v27 = vpop.eup %3024  ;;  %vm2519_vm12 = vweird.f32 %v3023_v10  ;;  %v2694_v41 = vld [vmem:[#allocation13 + $0x18] sm:$0xff]  ;;  %2752 = vmatpush.msrb.mxu1 %v2747_v19  ;;  %v2741_v52 = vld [vmem:[#allocation15 + $0x48] sm:$0xff] }
 0x7f5   :  { %v2491_v25 = vsel %vm2490_vm8, %v3019_v33, %v2487_v61  ;;  %vm2520_vm14 = vmor %vm2518_vm13, %vm2519_vm12  ;;  %2683 = vmatpush.msra.mxu3 %v2652_v14  ;;  %2720 = vmatpush.msrb.mxu0 %v2697_v42  ;;  %v2832_v33 = vld [vmem:[%s5039_s12] ss:$0 sm:$0xff]  ;;  %v2738_v61 = vld [vmem:[#allocation15 + $0x30] sm:$0xff] }
 0x7f6   :  { %v2515_v46 = vsub.f32 1.0, %v2514_v60  ;;  %v2496_v63 = vsel %vm2493_vm10, %v2495_v39, %v2491_v25  ;;  %v2506_v0 = vsel %vm2505_vm9, %v3021_v54, %v2502_v53  ;;  %2753 = vmatpush.msrb.mxu1 %v2746_v50  ;;  %v2736_v60 = vld [vmem:[#allocation15 + $0x20] sm:$0xff]  ;;  %v2735_v39 = vld [vmem:[#allocation15 + $0x18] sm:$0xff] }
 0x7f7   :  { %v2511_v55 = vsel %vm2508_vm11, %v2510_v51, %v2506_v0  ;;  %v2530_v62 = vmul.f32 %v3025_v27, %v2496_v63  ;;  %2684 = vmatpush.msra.mxu3 %v2651_v17  ;;  %2721 = vmatpush.msrb.mxu0 %v2696_v9  ;;  %v2833_v53 = vld [vmem:[%s5041_s14] ss:$0 sm:$0xff]  ;;  %v2734_v27 = vld [vmem:[#allocation15 + $0x10] sm:$0xff] }
 0x7f8   :  { %v2516_v49 = vmul.f32 %v3023_v10, %v2515_v46  ;;  %v2529_v13 = vmul.f32 %v2511_v55, %v4993_v23  ;;  %2754 = vmatpush.msrb.mxu1 %v2745_v28  ;;  %v2733_v46 = vld [vmem:[#allocation15 + $0x8] sm:$0xff]  ;;  %v2732_v63 = vld [vmem:[#allocation15] sm:$0xff] }
 0x7f9   :  { %2685 = vmatpush.msra.mxu3 %v2650_v8  ;;  %2722 = vmatpush.msrb.mxu0 %v2695_v6  ;;  %v2834_v0 = vld [vmem:[%s5043_s16] ss:$0 sm:$0xff] }
 0x7fa   :  { %v2531_v20 = vadd.f32 %v2530_v62, %v2529_v13  ;;  %v2517_v59 = vadd.f32 %v3023_v10, %v2516_v49  ;;  %2755 = vmatpush.msrb.mxu1 %v2744_v21  ;;  %v2835_v49 = vld [vmem:[%s5045_s18] ss:$0 sm:$0xff] }
 0x7fb   :  { %2723 = vmatpush.msrb.mxu0 %v2694_v41 }
 0x7fc   :  { %3026 = vtanh.f32 %v2531_v20  ;;  %v2521_v26 = vsel %vm2520_vm14, %v3023_v10, %v2517_v59  ;;  %2756 = vmatpush.msrb.mxu1 %v2743_v30  ;;  %v2739_v10 = vld [vmem:[#allocation15 + $0x38] sm:$0xff] }
 0x7fd   :  { %v2526_v23 = vsel %vm2523_vm15, %v2525_v1, %v2521_v26  ;;  %2724 = vmatpush.msrb.mxu0 %v2693_v36 }
 0x7fe   :  { %2757 = vmatpush.msrb.mxu1 %v2742_v22 }
 0x7ff   :  { %2725 = vmatpush.msrb.mxu0 %v2692_v29 }
 0x800   :  { %2758 = vmatpush.msrb.mxu1 %v2741_v52 }
 0x801   :  { %2726 = vmatpush.msrb.mxu0 %v2691_v34 }
 0x802   :  { %v3027_v2 = vpop.eup %3026  ;;  %2759 = vmatpush.msrb.mxu1 %v2740_v11 }
 0x803   :  { %v2533_v3 = vmul.f32 %v3027_v2, %v2526_v23 }
 0x804   :  { %2760 = vmatpush.msrb.mxu1 %v2739_v10 }
 0x805   :  { %2639 = vmatmul.f32.vlgmr.msra.gmra.mxu2 %v2533_v3 }
 0x806   :  { %2761 = vmatpush.msrb.mxu1 %v2738_v61 }
 0x808   :  { %2762 = vmatpush.msrb.mxu1 %v2737_v44 }
 0x80a   :  { %2763 = vmatpush.msrb.mxu1 %v2736_v60 }
 0x80c   :  { %2764 = vmatpush.msrb.mxu1 %v2735_v39 }
 0x80e   :  { %2765 = vmatpush.msrb.mxu1 %v2734_v27 }
 0x810   :  { %2766 = vmatpush.msrb.mxu1 %v2733_v46 }
 0x812   :  { %2767 = vmatpush.msrb.mxu1 %v2732_v63 }
 0x888   :  { %v2640_v35 = vpop.f32.mrf.mxu2 }
 0x889   :  { %v2643_v54 = vadd.f32 %v2640_v35, %v2605_v24 }
 0x88b   :  { %v2648_v45 = vadd.f32 %v2832_v33, %v2643_v54 }
 0x88d   :  { %v2649_v7 = vmax.f32 %v2648_v45, 0.0 }
 0x88f   :  { %2686 = vmatmul.f32.vlgmr.msra.gmra.mxu3 %v2649_v7 }
 0x912   :  { %v2687_v51 = vpop.f32.mrf.mxu3 }
 0x913   :  { %v2688_v25 = vadd.f32 %v2833_v53, %v2687_v51 }
 0x915   :  { %v2690_v47 = vmax.f32 %v2688_v25, 0.0 }
 0x917   :  { %2727 = vmatmul.f32.vlgmr.msrb.gmra.mxu0 %v2690_v47 }
 0x994   :  { %v2728_v55 = vpop.f32.mrf.mxu0 }
 0x995   :  { %v2729_v62 = vadd.f32 %v2834_v0, %v2728_v55 }
 0x997   :  { %v2731_v56 = vmax.f32 %v2729_v62, 0.0 }
 0x999   :  { %2768 = vmatmul.f32.vlgmr.msrb.gmra.mxu1 %v2731_v56 }
 0xa16   :  { %v2769_v13 = vpop.f32.mrf.mxu1 }
 0xa17   :  { %v2770_v48 = vadd.f32 %v2835_v49, %v2769_v13 }
 0xa19   :  { %2772 = vst [vmem:[%s5046_s19] sm:$0xff] %v2770_v48 }
 0xa1a   :  { %2777 = vsyncpa [#allocation3], 1 }
 0xa1b   :  { %2778 = vsyncpa [#allocation5], 1 }
 0xa1c   :  { %2779 = vsyncpa [#allocation8], 1 }
 0xa1d   :  { %2780 = vsyncpa [#allocation11], 1 }
 0xa1e   :  { %2781 = vsyncpa [#allocation14], 1 }

</bundles_post_ra>
